<compile_context>
chip_gen: v7x
topology: tpu7x:2x2x1
jax: 0.10.0
libtpu: 0.0.40
codegen_flags: <defaults>
</compile_context>

<pallas_src>
import functools

import jax
import jax.numpy as jnp
import numpy as np
from jax.experimental import pallas as pl
from jax.experimental.pallas import tpu as pltpu

BN_EPS = 1e-5
VMEM_LIMIT = 32 * 1024 * 1024


# ---------------------------------------------------------------------------
# Fused FPN kernel: one grid step per batch element.
# ---------------------------------------------------------------------------
def _fpn_fused_kernel(x1_ref, x2_ref, x3_ref,
                      w1_ref, b1_ref, w2_ref, b2_ref, w3_ref, b3_ref,
                      wm1_ref, bm1_ref, wm2_ref, bm2_ref,
                      r21_ref, r32_ref,
                      o1_ref, o2_ref, o3_ref,
                      pad1_ref, pad2_ref,
                      *, leaky, dims):
    (H1, W1), (H2, W2), (H3, W3) = dims
    C = o1_ref.shape[-1]

    def lrelu(y):
        return jnp.where(y >= 0, y, leaky * y)

    def conv1x1(x_ref, w_ref, b_ref):
        # bf16 cast is free VPU work under the DMA; accumulate in f32.
        x = x_ref[0].astype(jnp.bfloat16)                       # (HW, Cin)
        y = jnp.dot(x, w_ref[...], preferred_element_type=jnp.float32)
        return lrelu(y + b_ref[...])                            # (HW, C) f32

    def merge3x3(s, pad_ref, wm_ref, bm_ref, H, W):
        # 3x3 'same' conv + BN + leaky on a flat-raster (HW, C) map.
        # Halo: pad_ref[P0 + p] = s[p]; rows [0,P0) and [P0+HW, end) stay 0.
        # Each tap (dy,dx) is one contiguous sublane-shifted slice of the
        # flat buffer; column wrap-around of the flat shift is masked out.
        HW = H * W
        P0 = W + 8                                  # multiple of 8, >= W + 1
        zeros_pad = jnp.zeros((P0, C), pad_ref.dtype)
        # Zero only the halo rows, every program (megacore-safe; interior is
        # fully overwritten by one aligned full-width store below).
        pad_ref[0:P0, :] = zeros_pad
        pad_ref[P0 + HW:, :] = zeros_pad
        pad_ref[P0:P0 + HW, :] = s.astype(pad_ref.dtype)

        iota = jax.lax.broadcasted_iota(jnp.int32, (HW, 1), 0)
        col = (iota & (W - 1)) if (W & (W - 1)) == 0 else (iota % W)
        edge_mask = {-1: col != 0, 0: None, 1: col != (W - 1)}

        acc = jnp.zeros((HW, C), jnp.float32)
        for dy in (-1, 0, 1):
            for dx in (-1, 0, 1):
                t = (dy + 1) * 3 + (dx + 1)
                start = P0 + dy * W + dx
                win = pad_ref[start:start + HW, :]              # (HW, C) bf16
                m = edge_mask[dx]
                if m is not None:
                    win = jnp.where(m, win, jnp.zeros_like(win))
                acc = acc + jnp.dot(win, wm_ref[t],
                                    preferred_element_type=jnp.float32)
        return lrelu(acc + bm_ref[...])                          # (HW, C) f32

    # Lateral 1x1 conv + BN + leaky for the three pyramid levels.
    o1 = conv1x1(x1_ref, w1_ref, b1_ref)      # (H1*W1, C)
    o2 = conv1x1(x2_ref, w2_ref, b2_ref)      # (H2*W2, C)
    o3 = conv1x1(x3_ref, w3_ref, b3_ref)      # (H3*W3, C)

    o3_ref[0] = o3.astype(o3_ref.dtype)

    # merge2: nearest-upsample(o3) (0/1 replication matmul) + o2, 3x3 conv.
    up3 = jnp.dot(r32_ref[...], o3.astype(jnp.bfloat16),
                  preferred_element_type=jnp.float32)
    o2m = merge3x3(o2 + up3, pad2_ref, wm2_ref, bm2_ref, H2, W2)
    o2_ref[0] = o2m.astype(o2_ref.dtype)

    # merge1: nearest-upsample(o2m) + o1, 3x3 conv.
    up2 = jnp.dot(r21_ref[...], o2m.astype(jnp.bfloat16),
                  preferred_element_type=jnp.float32)
    o1m = merge3x3(o1 + up2, pad1_ref, wm1_ref, bm1_ref, H1, W1)
    o1_ref[0] = o1m.astype(o1_ref.dtype)


# ---------------------------------------------------------------------------
# Wrapper
# ---------------------------------------------------------------------------
def fpn_forward_pallas(inputs_nhwc, prep, leaky):
    x1, x2, x3 = inputs_nhwc
    N, H1, W1, C1 = x1.shape
    _, H2, W2, C2 = x2.shape
    _, H3, W3, C3 = x3.shape
    C = prep["b1"].shape[-1]
    dims = ((H1, W1), (H2, W2), (H3, W3))
    hw1, hw2, hw3 = H1 * W1, H2 * W2, H3 * W3

    # Free metadata reshapes: NHWC -> flat raster (N, H*W, C).
    x1f = x1.reshape(N, hw1, C1)
    x2f = x2.reshape(N, hw2, C2)
    x3f = x3.reshape(N, hw3, C3)

    def batch_map(n):
        return (n, 0, 0)

    def full2d(n):
        return (0, 0)

    def full3d(n):
        return (0, 0, 0)

    in_specs = [
        pl.BlockSpec((1, hw1, C1), batch_map),
        pl.BlockSpec((1, hw2, C2), batch_map),
        pl.BlockSpec((1, hw3, C3), batch_map),
        pl.BlockSpec((C1, C), full2d), pl.BlockSpec((1, C), full2d),
        pl.BlockSpec((C2, C), full2d), pl.BlockSpec((1, C), full2d),
        pl.BlockSpec((C3, C), full2d), pl.BlockSpec((1, C), full2d),
        pl.BlockSpec((9, C, C), full3d), pl.BlockSpec((1, C), full2d),
        pl.BlockSpec((9, C, C), full3d), pl.BlockSpec((1, C), full2d),
        pl.BlockSpec((hw1, hw2), full2d),
        pl.BlockSpec((hw2, hw3), full2d),
    ]
    out_specs = [
        pl.BlockSpec((1, hw1, C), batch_map),
        pl.BlockSpec((1, hw2, C), batch_map),
        pl.BlockSpec((1, hw3, C), batch_map),
    ]
    out_shape = [
        jax.ShapeDtypeStruct((N, hw1, C), jnp.float32),
        jax.ShapeDtypeStruct((N, hw2, C), jnp.float32),
        jax.ShapeDtypeStruct((N, hw3, C), jnp.float32),
    ]
    scratch_shapes = [
        pltpu.VMEM((hw1 + 2 * (W1 + 8), C), jnp.bfloat16),   # merge1 halo
        pltpu.VMEM((hw2 + 2 * (W2 + 8), C), jnp.bfloat16),   # merge2 halo
    ]

    flops = 2 * N * (hw1 * C1 * C + hw2 * C2 * C + hw3 * C3 * C   # 1x1 convs
                     + hw2 * hw3 * C + hw1 * hw2 * C              # upsamples
                     + 9 * (hw1 + hw2) * C * C)                   # merge convs
    bytes_acc = (4 * N * (hw1 * C1 + hw2 * C2 + hw3 * C3)         # f32 inputs
                 + 2 * (C1 * C + C2 * C + C3 * C + 18 * C * C
                        + hw1 * hw2 + hw2 * hw3)                  # bf16 weights
                 + 4 * 5 * C                                      # f32 biases
                 + 4 * N * (hw1 + hw2 + hw3) * C)                 # f32 outputs

    o1, o2, o3 = pl.pallas_call(
        functools.partial(_fpn_fused_kernel, leaky=leaky, dims=dims),
        out_shape=out_shape,
        grid=(N,),
        in_specs=in_specs,
        out_specs=out_specs,
        scratch_shapes=scratch_shapes,
        compiler_params=pltpu.CompilerParams(
            dimension_semantics=("parallel",),
            vmem_limit_bytes=VMEM_LIMIT),
        cost_estimate=pl.CostEstimate(flops=flops, transcendentals=0,
                                      bytes_accessed=bytes_acc),
    )(x1f, x2f, x3f,
      prep["w1"], prep["b1"], prep["w2"], prep["b2"], prep["w3"], prep["b3"],
      prep["wm1"], prep["bm1"], prep["wm2"], prep["bm2"],
      prep["r21"], prep["r32"])

    return [o1.reshape(N, H1, W1, C),
            o2.reshape(N, H2, W2, C),
            o3.reshape(N, H3, W3, C)]


# ---------------------------------------------------------------------------
# Parameter init, BN folding, nearest-upsample matrices
# ---------------------------------------------------------------------------
def init_fpn_params(key, in_channels_list, out_channels):
    def bn_init(k, c):
        k1, k2, k3, k4 = jax.random.split(k, 4)
        gamma = 1.0 + 0.1 * jax.random.normal(k1, (c,), jnp.float32)
        beta = 0.1 * jax.random.normal(k2, (c,), jnp.float32)
        mean = 0.1 * jax.random.normal(k3, (c,), jnp.float32)
        var = 0.5 + jnp.abs(jax.random.normal(k4, (c,), jnp.float32))
        return gamma, beta, mean, var

    keys = jax.random.split(key, 10)
    params = {}
    for i, cin in enumerate(in_channels_list):
        params[f"output{i + 1}"] = {
            "w": 0.2 * jax.random.normal(keys[2 * i],
                                         (1, 1, cin, out_channels),
                                         jnp.float32),
            "bn": bn_init(keys[2 * i + 1], out_channels),
        }
    for j, name in enumerate(["merge1", "merge2"]):
        params[name] = {
            "w": 0.2 * jax.random.normal(keys[6 + 2 * j],
                                         (3, 3, out_channels, out_channels),
                                         jnp.float32),
            "bn": bn_init(keys[7 + 2 * j], out_channels),
        }
    return params


def _fold_bn(w, bn):
    gamma, beta, mean, var = bn
    scale = gamma / jnp.sqrt(var + BN_EPS)
    return w * scale, beta - mean * scale


def _nearest_matrix(h_out, w_out, h_in, w_in):
    # PyTorch F.interpolate(mode='nearest'): src = floor(dst * in / out).
    hi = (np.arange(h_out) * h_in) // h_out
    wi = (np.arange(w_out) * w_in) // w_out
    rows = np.arange(h_out * w_out)
    src = hi[rows // w_out] * w_in + wi[rows % w_out]
    m = np.zeros((h_out * w_out, h_in * w_in), np.float32)
    m[rows, src] = 1.0
    return m


def prepare_fpn_params(params, input_shapes):
    """Fold BN into conv weights, cast matmul operands to bf16 and build the
    nearest-upsample replication matrices (0/1 -> exact in bf16)."""
    (_, H1, W1, _), (_, H2, W2, _), (_, H3, W3, _) = input_shapes
    prep = {}
    for i in (1, 2, 3):
        w, b = _fold_bn(params[f"output{i}"]["w"], params[f"output{i}"]["bn"])
        cin, cout = w.shape[2], w.shape[3]
        prep[f"w{i}"] = w.reshape(cin, cout).astype(jnp.bfloat16)
        prep[f"b{i}"] = b.reshape(1, cout).astype(jnp.float32)
    for j, name in ((1, "merge1"), (2, "merge2")):
        w, b = _fold_bn(params[name]["w"], params[name]["bn"])
        cin, cout = w.shape[2], w.shape[3]
        # (3,3,C,C) -> (9,C,C); tap t = ky*3+kx matches the kernel loop.
        prep[f"wm{j}"] = w.reshape(9, cin, cout).astype(jnp.bfloat16)
        prep[f"bm{j}"] = b.reshape(1, cout).astype(jnp.float32)
    prep["r21"] = jnp.asarray(_nearest_matrix(H1, W1, H2, W2), jnp.bfloat16)
    prep["r32"] = jnp.asarray(_nearest_matrix(H2, W2, H3, W3), jnp.bfloat16)
    return prep


# ---------------------------------------------------------------------------
# Pure-JAX reference (lax.conv, original f32 params) for correctness check.
# ---------------------------------------------------------------------------
def nearest_resize(x, out_h, out_w):
    N, H, W, C = x.shape
    hi = (jnp.arange(out_h) * H) // out_h
    wi = (jnp.arange(out_w) * W) // out_w
    return x[:, hi][:, :, wi]


def fpn_forward_ref(inputs_nhwc, params, leaky):
    def cbl(x, p, padding):
        y = jax.lax.conv_general_dilated(
            x, p["w"], (1, 1), padding,
            dimension_numbers=("NHWC", "HWIO", "NHWC"))
        gamma, beta, mean, var = p["bn"]
        scale = gamma / jnp.sqrt(var + BN_EPS)
        y = y * scale + (beta - mean * scale)
        return jnp.where(y >= 0, y, leaky * y)

    x1, x2, x3 = inputs_nhwc
    o1 = cbl(x1, params["output1"], "VALID")
    o2 = cbl(x2, params["output2"], "VALID")
    o3 = cbl(x3, params["output3"], "VALID")
    up3 = nearest_resize(o3, o2.shape[1], o2.shape[2])
    o2 = cbl(o2 + up3, params["merge2"], ((1, 1), (1, 1)))
    up2 = nearest_resize(o2, o1.shape[1], o1.shape[2])
    o1 = cbl(o1 + up2, params["merge1"], ((1, 1), (1, 1)))
    return [o1, o2, o3]


# ---------------------------------------------------------------------------
if __name__ == "__main__":
    in_channels_list = [4, 8, 16]
    out_channels = 8
    leaky = 0.1 if out_channels <= 64 else 0.0     # matches FPN.__init__

    key = jax.random.PRNGKey(0)
    k_in, k_par = jax.random.split(key)
    k1, k2, k3 = jax.random.split(k_in, 3)

    # PyTorch-style NCHW pyramid inputs -> NHWC for the kernels.
    x1_nchw = jax.random.normal(k1, (2, 4, 16, 16), jnp.float32)
    x2_nchw = jax.random.normal(k2, (2, 8, 8, 8), jnp.float32)
    x3_nchw = jax.random.normal(k3, (2, 16, 4, 4), jnp.float32)
    inputs = [jnp.transpose(x, (0, 2, 3, 1))
              for x in (x1_nchw, x2_nchw, x3_nchw)]

    params = init_fpn_params(k_par, in_channels_list, out_channels)
    prep = prepare_fpn_params(params, [x.shape for x in inputs])

    outs = fpn_forward_pallas(inputs, prep, leaky)
    outs = [jax.block_until_ready(o) for o in outs]

    refs = fpn_forward_ref(inputs, params, leaky)
    for o, r in zip(outs, refs):
        np.testing.assert_allclose(np.asarray(o), np.asarray(r),
                                   rtol=5e-2, atol=5e-2)

    print("KERNEL_OK")
</pallas_src>

<mosaic_0001>
module attributes {stable_mosaic.version = 11 : i64} {
  func.func @_fpn_fused_kernel(%arg0: i32, %arg1: memref<1x256x4xf32, #tpu.memory_space<vmem>>, %arg2: memref<1x64x8xf32, #tpu.memory_space<vmem>>, %arg3: memref<1x16x16xf32, #tpu.memory_space<vmem>>, %arg4: memref<4x8xbf16, #tpu.memory_space<vmem>>, %arg5: memref<1x8xf32, #tpu.memory_space<vmem>>, %arg6: memref<8x8xbf16, #tpu.memory_space<vmem>>, %arg7: memref<1x8xf32, #tpu.memory_space<vmem>>, %arg8: memref<16x8xbf16, #tpu.memory_space<vmem>>, %arg9: memref<1x8xf32, #tpu.memory_space<vmem>>, %arg10: memref<9x8x8xbf16, #tpu.memory_space<vmem>>, %arg11: memref<1x8xf32, #tpu.memory_space<vmem>>, %arg12: memref<9x8x8xbf16, #tpu.memory_space<vmem>>, %arg13: memref<1x8xf32, #tpu.memory_space<vmem>>, %arg14: memref<256x64xbf16, #tpu.memory_space<vmem>>, %arg15: memref<64x16xbf16, #tpu.memory_space<vmem>>, %arg16: memref<1x256x8xf32, #tpu.memory_space<vmem>>, %arg17: memref<1x64x8xf32, #tpu.memory_space<vmem>>, %arg18: memref<1x16x8xf32, #tpu.memory_space<vmem>>, %arg19: memref<304x8xbf16, #tpu.memory_space<vmem>>, %arg20: memref<96x8xbf16, #tpu.memory_space<vmem>>) attributes {dimension_semantics = [#tpu.dimension_semantics<parallel>], iteration_bounds = array<i64: 2>, scalar_prefetch = 0 : i64, scratch_operands = 2 : i64, tpu.core_type = #tpu.core_type<tc>, window_params = [{transform_indices = @transform_0, window_bounds = array<i64: 1, 256, 4>}, {transform_indices = @transform_1, window_bounds = array<i64: 1, 64, 8>}, {transform_indices = @transform_2, window_bounds = array<i64: 1, 16, 16>}, {pipeline_mode = #tpu.pipeline_mode<synchronous>, transform_indices = @transform_3, window_bounds = array<i64: 4, 8>}, {pipeline_mode = #tpu.pipeline_mode<synchronous>, transform_indices = @transform_4, window_bounds = array<i64: 1, 8>}, {pipeline_mode = #tpu.pipeline_mode<synchronous>, transform_indices = @transform_5, window_bounds = array<i64: 8, 8>}, {pipeline_mode = #tpu.pipeline_mode<synchronous>, transform_indices = @transform_6, window_bounds = array<i64: 1, 8>}, {pipeline_mode = #tpu.pipeline_mode<synchronous>, transform_indices = @transform_7, window_bounds = array<i64: 16, 8>}, {pipeline_mode = #tpu.pipeline_mode<synchronous>, transform_indices = @transform_8, window_bounds = array<i64: 1, 8>}, {pipeline_mode = #tpu.pipeline_mode<synchronous>, transform_indices = @transform_9, window_bounds = array<i64: 9, 8, 8>}, {pipeline_mode = #tpu.pipeline_mode<synchronous>, transform_indices = @transform_10, window_bounds = array<i64: 1, 8>}, {pipeline_mode = #tpu.pipeline_mode<synchronous>, transform_indices = @transform_11, window_bounds = array<i64: 9, 8, 8>}, {pipeline_mode = #tpu.pipeline_mode<synchronous>, transform_indices = @transform_12, window_bounds = array<i64: 1, 8>}, {pipeline_mode = #tpu.pipeline_mode<synchronous>, transform_indices = @transform_13, window_bounds = array<i64: 256, 64>}, {pipeline_mode = #tpu.pipeline_mode<synchronous>, transform_indices = @transform_14, window_bounds = array<i64: 64, 16>}, {transform_indices = @transform_15, window_bounds = array<i64: 1, 256, 8>}, {transform_indices = @transform_16, window_bounds = array<i64: 1, 64, 8>}, {transform_indices = @transform_17, window_bounds = array<i64: 1, 16, 8>}]} {
    %c0 = arith.constant 0 : index
    %c0_0 = arith.constant 0 : index
    %c0_1 = arith.constant 0 : index
    %0 = vector.load %arg1[%c0, %c0_0, %c0_1] : memref<1x256x4xf32, #tpu.memory_space<vmem>>, vector<1x256x4xf32>
    %1 = vector.shape_cast %0 : vector<1x256x4xf32> to vector<256x4xf32>
    %2 = arith.truncf %1 : vector<256x4xf32> to vector<256x4xbf16>
    %c0_2 = arith.constant 0 : index
    %c0_3 = arith.constant 0 : index
    %3 = vector.load %arg4[%c0_2, %c0_3] : memref<4x8xbf16, #tpu.memory_space<vmem>>, vector<4x8xbf16>
    %cst = arith.constant dense<0.000000e+00> : vector<256x8xf32>
    %4 = tpu.matmul %2, %3, %cst {dimension_numbers = #tpu.dot_dimension_numbers<[1], [0], [0], [1], [0, 0, 1, 1], [], []>} : vector<256x4xbf16>, vector<4x8xbf16>, vector<256x8xf32> -> vector<256x8xf32>
    %c0_4 = arith.constant 0 : index
    %c0_5 = arith.constant 0 : index
    %5 = vector.load %arg5[%c0_4, %c0_5] : memref<1x8xf32, #tpu.memory_space<vmem>>, vector<1x8xf32>
    %6 = vector.broadcast %5 : vector<1x8xf32> to vector<256x8xf32>
    %7 = arith.addf %4, %6 : vector<256x8xf32>
    %cst_6 = arith.constant 0.000000e+00 : f32
    %8 = vector.broadcast %cst_6 : f32 to vector<256x8xf32>
    %9 = arith.cmpf oge, %7, %8 : vector<256x8xf32>
    %cst_7 = arith.constant 1.000000e-01 : f32
    %10 = vector.broadcast %cst_7 : f32 to vector<256x8xf32>
    %11 = arith.mulf %10, %7 : vector<256x8xf32>
    %12 = arith.select %9, %7, %11 : vector<256x8xi1>, vector<256x8xf32>
    %c0_8 = arith.constant 0 : index
    %c0_9 = arith.constant 0 : index
    %c0_10 = arith.constant 0 : index
    %13 = vector.load %arg2[%c0_8, %c0_9, %c0_10] : memref<1x64x8xf32, #tpu.memory_space<vmem>>, vector<1x64x8xf32>
    %14 = vector.shape_cast %13 : vector<1x64x8xf32> to vector<64x8xf32>
    %15 = arith.truncf %14 : vector<64x8xf32> to vector<64x8xbf16>
    %c0_11 = arith.constant 0 : index
    %c0_12 = arith.constant 0 : index
    %16 = vector.load %arg6[%c0_11, %c0_12] : memref<8x8xbf16, #tpu.memory_space<vmem>>, vector<8x8xbf16>
    %cst_13 = arith.constant dense<0.000000e+00> : vector<64x8xf32>
    %17 = tpu.matmul %15, %16, %cst_13 {dimension_numbers = #tpu.dot_dimension_numbers<[1], [0], [0], [1], [0, 0, 1, 1], [], []>} : vector<64x8xbf16>, vector<8x8xbf16>, vector<64x8xf32> -> vector<64x8xf32>
    %c0_14 = arith.constant 0 : index
    %c0_15 = arith.constant 0 : index
    %18 = vector.load %arg7[%c0_14, %c0_15] : memref<1x8xf32, #tpu.memory_space<vmem>>, vector<1x8xf32>
    %19 = vector.broadcast %18 : vector<1x8xf32> to vector<64x8xf32>
    %20 = arith.addf %17, %19 : vector<64x8xf32>
    %cst_16 = arith.constant 0.000000e+00 : f32
    %21 = vector.broadcast %cst_16 : f32 to vector<64x8xf32>
    %22 = arith.cmpf oge, %20, %21 : vector<64x8xf32>
    %cst_17 = arith.constant 1.000000e-01 : f32
    %23 = vector.broadcast %cst_17 : f32 to vector<64x8xf32>
    %24 = arith.mulf %23, %20 : vector<64x8xf32>
    %25 = arith.select %22, %20, %24 : vector<64x8xi1>, vector<64x8xf32>
    %c0_18 = arith.constant 0 : index
    %c0_19 = arith.constant 0 : index
    %c0_20 = arith.constant 0 : index
    %26 = vector.load %arg3[%c0_18, %c0_19, %c0_20] : memref<1x16x16xf32, #tpu.memory_space<vmem>>, vector<1x16x16xf32>
    %27 = vector.shape_cast %26 : vector<1x16x16xf32> to vector<16x16xf32>
    %28 = arith.truncf %27 : vector<16x16xf32> to vector<16x16xbf16>
    %c0_21 = arith.constant 0 : index
    %c0_22 = arith.constant 0 : index
    %29 = vector.load %arg8[%c0_21, %c0_22] : memref<16x8xbf16, #tpu.memory_space<vmem>>, vector<16x8xbf16>
    %cst_23 = arith.constant dense<0.000000e+00> : vector<16x8xf32>
    %30 = tpu.matmul %28, %29, %cst_23 {dimension_numbers = #tpu.dot_dimension_numbers<[1], [0], [0], [1], [0, 0, 1, 1], [], []>} : vector<16x16xbf16>, vector<16x8xbf16>, vector<16x8xf32> -> vector<16x8xf32>
    %c0_24 = arith.constant 0 : index
    %c0_25 = arith.constant 0 : index
    %31 = vector.load %arg9[%c0_24, %c0_25] : memref<1x8xf32, #tpu.memory_space<vmem>>, vector<1x8xf32>
    %32 = vector.broadcast %31 : vector<1x8xf32> to vector<16x8xf32>
    %33 = arith.addf %30, %32 : vector<16x8xf32>
    %cst_26 = arith.constant 0.000000e+00 : f32
    %34 = vector.broadcast %cst_26 : f32 to vector<16x8xf32>
    %35 = arith.cmpf oge, %33, %34 : vector<16x8xf32>
    %cst_27 = arith.constant 1.000000e-01 : f32
    %36 = vector.broadcast %cst_27 : f32 to vector<16x8xf32>
    %37 = arith.mulf %36, %33 : vector<16x8xf32>
    %38 = arith.select %35, %33, %37 : vector<16x8xi1>, vector<16x8xf32>
    %c0_28 = arith.constant 0 : index
    %c0_29 = arith.constant 0 : index
    %c0_30 = arith.constant 0 : index
    %39 = vector.load %arg18[%c0_28, %c0_29, %c0_30] : memref<1x16x8xf32, #tpu.memory_space<vmem>>, vector<1x16x8xf32>
    %40 = vector.shape_cast %39 : vector<1x16x8xf32> to vector<16x8xf32>
    %41 = vector.shape_cast %38 : vector<16x8xf32> to vector<1x16x8xf32>
    tpu.vector_store %arg18[%c0_28, %c0_29, %c0_30], %41 {strides = array<i32>} : memref<1x16x8xf32, #tpu.memory_space<vmem>>, vector<1x16x8xf32>,
    %c0_31 = arith.constant 0 : index
    %c0_32 = arith.constant 0 : index
    %42 = vector.load %arg15[%c0_31, %c0_32] : memref<64x16xbf16, #tpu.memory_space<vmem>>, vector<64x16xbf16>
    %43 = arith.truncf %38 : vector<16x8xf32> to vector<16x8xbf16>
    %cst_33 = arith.constant dense<0.000000e+00> : vector<64x8xf32>
    %44 = tpu.matmul %42, %43, %cst_33 {dimension_numbers = #tpu.dot_dimension_numbers<[1], [0], [0], [1], [0, 0, 1, 1], [], []>} : vector<64x16xbf16>, vector<16x8xbf16>, vector<64x8xf32> -> vector<64x8xf32>
    %45 = arith.addf %25, %44 : vector<64x8xf32>
    %cst_34 = arith.constant 0.000000e+00 : bf16
    %46 = vector.broadcast %cst_34 : bf16 to vector<16x8xbf16>
    %c0_35 = arith.constant 0 : index
    %c0_36 = arith.constant 0 : index
    %47 = vector.load %arg20[%c0_35, %c0_36] : memref<96x8xbf16, #tpu.memory_space<vmem>>, vector<16x8xbf16>
    tpu.vector_store %arg20[%c0_35, %c0_36], %46 {strides = array<i32>} : memref<96x8xbf16, #tpu.memory_space<vmem>>, vector<16x8xbf16>,
    %c80 = arith.constant 80 : index
    %c0_37 = arith.constant 0 : index
    %48 = vector.load %arg20[%c80, %c0_37] : memref<96x8xbf16, #tpu.memory_space<vmem>>, vector<16x8xbf16>
    tpu.vector_store %arg20[%c80, %c0_37], %46 {strides = array<i32>} : memref<96x8xbf16, #tpu.memory_space<vmem>>, vector<16x8xbf16>,
    %49 = arith.truncf %45 : vector<64x8xf32> to vector<64x8xbf16>
    %c16 = arith.constant 16 : index
    %c0_38 = arith.constant 0 : index
    %50 = vector.load %arg20[%c16, %c0_38] : memref<96x8xbf16, #tpu.memory_space<vmem>>, vector<64x8xbf16>
    tpu.vector_store %arg20[%c16, %c0_38], %49 {strides = array<i32>} : memref<96x8xbf16, #tpu.memory_space<vmem>>, vector<64x8xbf16>,
    %51 = tpu.iota {dimensions = array<i32: 0>} : vector<64x1xi32>
    %c7_i32 = arith.constant 7 : i32
    %52 = vector.broadcast %c7_i32 : i32 to vector<64x1xi32>
    %53 = arith.andi %51, %52 : vector<64x1xi32>
    %c0_i32 = arith.constant 0 : i32
    %54 = vector.broadcast %c0_i32 : i32 to vector<64x1xi32>
    %55 = arith.cmpi ne, %53, %54 : vector<64x1xi32>
    %c7_i32_39 = arith.constant 7 : i32
    %56 = vector.broadcast %c7_i32_39 : i32 to vector<64x1xi32>
    %57 = arith.cmpi ne, %53, %56 : vector<64x1xi32>
    %cst_40 = arith.constant 0.000000e+00 : f32
    %58 = vector.broadcast %cst_40 : f32 to vector<64x8xf32>
    %c7 = arith.constant 7 : index
    %c0_41 = arith.constant 0 : index
    %59 = vector.load %arg20[%c7, %c0_41] : memref<96x8xbf16, #tpu.memory_space<vmem>>, vector<64x8xbf16>
    %cst_42 = arith.constant 0.000000e+00 : bf16
    %60 = vector.broadcast %cst_42 : bf16 to vector<64x8xbf16>
    %61 = vector.shape_cast %55 : vector<64x1xi1> to vector<64x1xi1>
    %62 = vector.broadcast %61 : vector<64x1xi1> to vector<64x8xi1>
    %63 = arith.select %62, %59, %60 : vector<64x8xi1>, vector<64x8xbf16>
    %c0_43 = arith.constant 0 : index
    %c0_44 = arith.constant 0 : index
    %c0_45 = arith.constant 0 : index
    %64 = vector.load %arg12[%c0_43, %c0_44, %c0_45] : memref<9x8x8xbf16, #tpu.memory_space<vmem>>, vector<1x8x8xbf16>
    %65 = vector.shape_cast %64 : vector<1x8x8xbf16> to vector<8x8xbf16>
    %cst_46 = arith.constant dense<0.000000e+00> : vector<64x8xf32>
    %66 = tpu.matmul %63, %65, %cst_46 {dimension_numbers = #tpu.dot_dimension_numbers<[1], [0], [0], [1], [0, 0, 1, 1], [], []>} : vector<64x8xbf16>, vector<8x8xbf16>, vector<64x8xf32> -> vector<64x8xf32>
    %67 = arith.addf %58, %66 : vector<64x8xf32>
    %c8 = arith.constant 8 : index
    %c0_47 = arith.constant 0 : index
    %68 = vector.load %arg20[%c8, %c0_47] : memref<96x8xbf16, #tpu.memory_space<vmem>>, vector<64x8xbf16>
    %c1 = arith.constant 1 : index
    %c0_48 = arith.constant 0 : index
    %c0_49 = arith.constant 0 : index
    %69 = vector.load %arg12[%c1, %c0_48, %c0_49] : memref<9x8x8xbf16, #tpu.memory_space<vmem>>, vector<1x8x8xbf16>
    %70 = vector.shape_cast %69 : vector<1x8x8xbf16> to vector<8x8xbf16>
    %cst_50 = arith.constant dense<0.000000e+00> : vector<64x8xf32>
    %71 = tpu.matmul %68, %70, %cst_50 {dimension_numbers = #tpu.dot_dimension_numbers<[1], [0], [0], [1], [0, 0, 1, 1], [], []>} : vector<64x8xbf16>, vector<8x8xbf16>, vector<64x8xf32> -> vector<64x8xf32>
    %72 = arith.addf %67, %71 : vector<64x8xf32>
    %c9 = arith.constant 9 : index
    %c0_51 = arith.constant 0 : index
    %73 = vector.load %arg20[%c9, %c0_51] : memref<96x8xbf16, #tpu.memory_space<vmem>>, vector<64x8xbf16>
    %cst_52 = arith.constant 0.000000e+00 : bf16
    %74 = vector.broadcast %cst_52 : bf16 to vector<64x8xbf16>
    %75 = vector.shape_cast %57 : vector<64x1xi1> to vector<64x1xi1>
    %76 = vector.broadcast %75 : vector<64x1xi1> to vector<64x8xi1>
    %77 = arith.select %76, %73, %74 : vector<64x8xi1>, vector<64x8xbf16>
    %c2 = arith.constant 2 : index
    %c0_53 = arith.constant 0 : index
    %c0_54 = arith.constant 0 : index
    %78 = vector.load %arg12[%c2, %c0_53, %c0_54] : memref<9x8x8xbf16, #tpu.memory_space<vmem>>, vector<1x8x8xbf16>
    %79 = vector.shape_cast %78 : vector<1x8x8xbf16> to vector<8x8xbf16>
    %cst_55 = arith.constant dense<0.000000e+00> : vector<64x8xf32>
    %80 = tpu.matmul %77, %79, %cst_55 {dimension_numbers = #tpu.dot_dimension_numbers<[1], [0], [0], [1], [0, 0, 1, 1], [], []>} : vector<64x8xbf16>, vector<8x8xbf16>, vector<64x8xf32> -> vector<64x8xf32>
    %81 = arith.addf %72, %80 : vector<64x8xf32>
    %c15 = arith.constant 15 : index
    %c0_56 = arith.constant 0 : index
    %82 = vector.load %arg20[%c15, %c0_56] : memref<96x8xbf16, #tpu.memory_space<vmem>>, vector<64x8xbf16>
    %cst_57 = arith.constant 0.000000e+00 : bf16
    %83 = vector.broadcast %cst_57 : bf16 to vector<64x8xbf16>
    %84 = vector.shape_cast %55 : vector<64x1xi1> to vector<64x1xi1>
    %85 = vector.broadcast %84 : vector<64x1xi1> to vector<64x8xi1>
    %86 = arith.select %85, %82, %83 : vector<64x8xi1>, vector<64x8xbf16>
    %c3 = arith.constant 3 : index
    %c0_58 = arith.constant 0 : index
    %c0_59 = arith.constant 0 : index
    %87 = vector.load %arg12[%c3, %c0_58, %c0_59] : memref<9x8x8xbf16, #tpu.memory_space<vmem>>, vector<1x8x8xbf16>
    %88 = vector.shape_cast %87 : vector<1x8x8xbf16> to vector<8x8xbf16>
    %cst_60 = arith.constant dense<0.000000e+00> : vector<64x8xf32>
    %89 = tpu.matmul %86, %88, %cst_60 {dimension_numbers = #tpu.dot_dimension_numbers<[1], [0], [0], [1], [0, 0, 1, 1], [], []>} : vector<64x8xbf16>, vector<8x8xbf16>, vector<64x8xf32> -> vector<64x8xf32>
    %90 = arith.addf %81, %89 : vector<64x8xf32>
    %c16_61 = arith.constant 16 : index
    %c0_62 = arith.constant 0 : index
    %91 = vector.load %arg20[%c16_61, %c0_62] : memref<96x8xbf16, #tpu.memory_space<vmem>>, vector<64x8xbf16>
    %c4 = arith.constant 4 : index
    %c0_63 = arith.constant 0 : index
    %c0_64 = arith.constant 0 : index
    %92 = vector.load %arg12[%c4, %c0_63, %c0_64] : memref<9x8x8xbf16, #tpu.memory_space<vmem>>, vector<1x8x8xbf16>
    %93 = vector.shape_cast %92 : vector<1x8x8xbf16> to vector<8x8xbf16>
    %cst_65 = arith.constant dense<0.000000e+00> : vector<64x8xf32>
    %94 = tpu.matmul %91, %93, %cst_65 {dimension_numbers = #tpu.dot_dimension_numbers<[1], [0], [0], [1], [0, 0, 1, 1], [], []>} : vector<64x8xbf16>, vector<8x8xbf16>, vector<64x8xf32> -> vector<64x8xf32>
    %95 = arith.addf %90, %94 : vector<64x8xf32>
    %c17 = arith.constant 17 : index
    %c0_66 = arith.constant 0 : index
    %96 = vector.load %arg20[%c17, %c0_66] : memref<96x8xbf16, #tpu.memory_space<vmem>>, vector<64x8xbf16>
    %cst_67 = arith.constant 0.000000e+00 : bf16
    %97 = vector.broadcast %cst_67 : bf16 to vector<64x8xbf16>
    %98 = vector.shape_cast %57 : vector<64x1xi1> to vector<64x1xi1>
    %99 = vector.broadcast %98 : vector<64x1xi1> to vector<64x8xi1>
    %100 = arith.select %99, %96, %97 : vector<64x8xi1>, vector<64x8xbf16>
    %c5 = arith.constant 5 : index
    %c0_68 = arith.constant 0 : index
    %c0_69 = arith.constant 0 : index
    %101 = vector.load %arg12[%c5, %c0_68, %c0_69] : memref<9x8x8xbf16, #tpu.memory_space<vmem>>, vector<1x8x8xbf16>
    %102 = vector.shape_cast %101 : vector<1x8x8xbf16> to vector<8x8xbf16>
    %cst_70 = arith.constant dense<0.000000e+00> : vector<64x8xf32>
    %103 = tpu.matmul %100, %102, %cst_70 {dimension_numbers = #tpu.dot_dimension_numbers<[1], [0], [0], [1], [0, 0, 1, 1], [], []>} : vector<64x8xbf16>, vector<8x8xbf16>, vector<64x8xf32> -> vector<64x8xf32>
    %104 = arith.addf %95, %103 : vector<64x8xf32>
    %c23 = arith.constant 23 : index
    %c0_71 = arith.constant 0 : index
    %105 = vector.load %arg20[%c23, %c0_71] : memref<96x8xbf16, #tpu.memory_space<vmem>>, vector<64x8xbf16>
    %cst_72 = arith.constant 0.000000e+00 : bf16
    %106 = vector.broadcast %cst_72 : bf16 to vector<64x8xbf16>
    %107 = vector.shape_cast %55 : vector<64x1xi1> to vector<64x1xi1>
    %108 = vector.broadcast %107 : vector<64x1xi1> to vector<64x8xi1>
    %109 = arith.select %108, %105, %106 : vector<64x8xi1>, vector<64x8xbf16>
    %c6 = arith.constant 6 : index
    %c0_73 = arith.constant 0 : index
    %c0_74 = arith.constant 0 : index
    %110 = vector.load %arg12[%c6, %c0_73, %c0_74] : memref<9x8x8xbf16, #tpu.memory_space<vmem>>, vector<1x8x8xbf16>
    %111 = vector.shape_cast %110 : vector<1x8x8xbf16> to vector<8x8xbf16>
    %cst_75 = arith.constant dense<0.000000e+00> : vector<64x8xf32>
    %112 = tpu.matmul %109, %111, %cst_75 {dimension_numbers = #tpu.dot_dimension_numbers<[1], [0], [0], [1], [0, 0, 1, 1], [], []>} : vector<64x8xbf16>, vector<8x8xbf16>, vector<64x8xf32> -> vector<64x8xf32>
    %113 = arith.addf %104, %112 : vector<64x8xf32>
    %c24 = arith.constant 24 : index
    %c0_76 = arith.constant 0 : index
    %114 = vector.load %arg20[%c24, %c0_76] : memref<96x8xbf16, #tpu.memory_space<vmem>>, vector<64x8xbf16>
    %c7_77 = arith.constant 7 : index
    %c0_78 = arith.constant 0 : index
    %c0_79 = arith.constant 0 : index
    %115 = vector.load %arg12[%c7_77, %c0_78, %c0_79] : memref<9x8x8xbf16, #tpu.memory_space<vmem>>, vector<1x8x8xbf16>
    %116 = vector.shape_cast %115 : vector<1x8x8xbf16> to vector<8x8xbf16>
    %cst_80 = arith.constant dense<0.000000e+00> : vector<64x8xf32>
    %117 = tpu.matmul %114, %116, %cst_80 {dimension_numbers = #tpu.dot_dimension_numbers<[1], [0], [0], [1], [0, 0, 1, 1], [], []>} : vector<64x8xbf16>, vector<8x8xbf16>, vector<64x8xf32> -> vector<64x8xf32>
    %118 = arith.addf %113, %117 : vector<64x8xf32>
    %c25 = arith.constant 25 : index
    %c0_81 = arith.constant 0 : index
    %119 = vector.load %arg20[%c25, %c0_81] : memref<96x8xbf16, #tpu.memory_space<vmem>>, vector<64x8xbf16>
    %cst_82 = arith.constant 0.000000e+00 : bf16
    %120 = vector.broadcast %cst_82 : bf16 to vector<64x8xbf16>
    %121 = vector.shape_cast %57 : vector<64x1xi1> to vector<64x1xi1>
    %122 = vector.broadcast %121 : vector<64x1xi1> to vector<64x8xi1>
    %123 = arith.select %122, %119, %120 : vector<64x8xi1>, vector<64x8xbf16>
    %c8_83 = arith.constant 8 : index
    %c0_84 = arith.constant 0 : index
    %c0_85 = arith.constant 0 : index
    %124 = vector.load %arg12[%c8_83, %c0_84, %c0_85] : memref<9x8x8xbf16, #tpu.memory_space<vmem>>, vector<1x8x8xbf16>
    %125 = vector.shape_cast %124 : vector<1x8x8xbf16> to vector<8x8xbf16>
    %cst_86 = arith.constant dense<0.000000e+00> : vector<64x8xf32>
    %126 = tpu.matmul %123, %125, %cst_86 {dimension_numbers = #tpu.dot_dimension_numbers<[1], [0], [0], [1], [0, 0, 1, 1], [], []>} : vector<64x8xbf16>, vector<8x8xbf16>, vector<64x8xf32> -> vector<64x8xf32>
    %127 = arith.addf %118, %126 : vector<64x8xf32>
    %c0_87 = arith.constant 0 : index
    %c0_88 = arith.constant 0 : index
    %128 = vector.load %arg13[%c0_87, %c0_88] : memref<1x8xf32, #tpu.memory_space<vmem>>, vector<1x8xf32>
    %129 = vector.broadcast %128 : vector<1x8xf32> to vector<64x8xf32>
    %130 = arith.addf %127, %129 : vector<64x8xf32>
    %cst_89 = arith.constant 0.000000e+00 : f32
    %131 = vector.broadcast %cst_89 : f32 to vector<64x8xf32>
    %132 = arith.cmpf oge, %130, %131 : vector<64x8xf32>
    %cst_90 = arith.constant 1.000000e-01 : f32
    %133 = vector.broadcast %cst_90 : f32 to vector<64x8xf32>
    %134 = arith.mulf %133, %130 : vector<64x8xf32>
    %135 = arith.select %132, %130, %134 : vector<64x8xi1>, vector<64x8xf32>
    %c0_91 = arith.constant 0 : index
    %c0_92 = arith.constant 0 : index
    %c0_93 = arith.constant 0 : index
    %136 = vector.load %arg17[%c0_91, %c0_92, %c0_93] : memref<1x64x8xf32, #tpu.memory_space<vmem>>, vector<1x64x8xf32>
    %137 = vector.shape_cast %136 : vector<1x64x8xf32> to vector<64x8xf32>
    %138 = vector.shape_cast %135 : vector<64x8xf32> to vector<1x64x8xf32>
    tpu.vector_store %arg17[%c0_91, %c0_92, %c0_93], %138 {strides = array<i32>} : memref<1x64x8xf32, #tpu.memory_space<vmem>>, vector<1x64x8xf32>,
    %c0_94 = arith.constant 0 : index
    %c0_95 = arith.constant 0 : index
    %139 = vector.load %arg14[%c0_94, %c0_95] : memref<256x64xbf16, #tpu.memory_space<vmem>>, vector<256x64xbf16>
    %140 = arith.truncf %135 : vector<64x8xf32> to vector<64x8xbf16>
    %cst_96 = arith.constant dense<0.000000e+00> : vector<256x8xf32>
    %141 = tpu.matmul %139, %140, %cst_96 {dimension_numbers = #tpu.dot_dimension_numbers<[1], [0], [0], [1], [0, 0, 1, 1], [], []>} : vector<256x64xbf16>, vector<64x8xbf16>, vector<256x8xf32> -> vector<256x8xf32>
    %142 = arith.addf %12, %141 : vector<256x8xf32>
    %cst_97 = arith.constant 0.000000e+00 : bf16
    %143 = vector.broadcast %cst_97 : bf16 to vector<24x8xbf16>
    %c0_98 = arith.constant 0 : index
    %c0_99 = arith.constant 0 : index
    %144 = vector.load %arg19[%c0_98, %c0_99] : memref<304x8xbf16, #tpu.memory_space<vmem>>, vector<24x8xbf16>
    tpu.vector_store %arg19[%c0_98, %c0_99], %143 {strides = array<i32>} : memref<304x8xbf16, #tpu.memory_space<vmem>>, vector<24x8xbf16>,
    %c280 = arith.constant 280 : index
    %c0_100 = arith.constant 0 : index
    %145 = vector.load %arg19[%c280, %c0_100] : memref<304x8xbf16, #tpu.memory_space<vmem>>, vector<24x8xbf16>
    tpu.vector_store %arg19[%c280, %c0_100], %143 {strides = array<i32>} : memref<304x8xbf16, #tpu.memory_space<vmem>>, vector<24x8xbf16>,
    %146 = arith.truncf %142 : vector<256x8xf32> to vector<256x8xbf16>
    %c24_101 = arith.constant 24 : index
    %c0_102 = arith.constant 0 : index
    %147 = vector.load %arg19[%c24_101, %c0_102] : memref<304x8xbf16, #tpu.memory_space<vmem>>, vector<256x8xbf16>
    tpu.vector_store %arg19[%c24_101, %c0_102], %146 {strides = array<i32>} : memref<304x8xbf16, #tpu.memory_space<vmem>>, vector<256x8xbf16>,
    %148 = tpu.iota {dimensions = array<i32: 0>} : vector<256x1xi32>
    %c15_i32 = arith.constant 15 : i32
    %149 = vector.broadcast %c15_i32 : i32 to vector<256x1xi32>
    %150 = arith.andi %148, %149 : vector<256x1xi32>
    %c0_i32_103 = arith.constant 0 : i32
    %151 = vector.broadcast %c0_i32_103 : i32 to vector<256x1xi32>
    %152 = arith.cmpi ne, %150, %151 : vector<256x1xi32>
    %c15_i32_104 = arith.constant 15 : i32
    %153 = vector.broadcast %c15_i32_104 : i32 to vector<256x1xi32>
    %154 = arith.cmpi ne, %150, %153 : vector<256x1xi32>
    %cst_105 = arith.constant 0.000000e+00 : f32
    %155 = vector.broadcast %cst_105 : f32 to vector<256x8xf32>
    %c7_106 = arith.constant 7 : index
    %c0_107 = arith.constant 0 : index
    %156 = vector.load %arg19[%c7_106, %c0_107] : memref<304x8xbf16, #tpu.memory_space<vmem>>, vector<256x8xbf16>
    %cst_108 = arith.constant 0.000000e+00 : bf16
    %157 = vector.broadcast %cst_108 : bf16 to vector<256x8xbf16>
    %158 = vector.shape_cast %152 : vector<256x1xi1> to vector<256x1xi1>
    %159 = vector.broadcast %158 : vector<256x1xi1> to vector<256x8xi1>
    %160 = arith.select %159, %156, %157 : vector<256x8xi1>, vector<256x8xbf16>
    %c0_109 = arith.constant 0 : index
    %c0_110 = arith.constant 0 : index
    %c0_111 = arith.constant 0 : index
    %161 = vector.load %arg10[%c0_109, %c0_110, %c0_111] : memref<9x8x8xbf16, #tpu.memory_space<vmem>>, vector<1x8x8xbf16>
    %162 = vector.shape_cast %161 : vector<1x8x8xbf16> to vector<8x8xbf16>
    %cst_112 = arith.constant dense<0.000000e+00> : vector<256x8xf32>
    %163 = tpu.matmul %160, %162, %cst_112 {dimension_numbers = #tpu.dot_dimension_numbers<[1], [0], [0], [1], [0, 0, 1, 1], [], []>} : vector<256x8xbf16>, vector<8x8xbf16>, vector<256x8xf32> -> vector<256x8xf32>
    %164 = arith.addf %155, %163 : vector<256x8xf32>
    %c8_113 = arith.constant 8 : index
    %c0_114 = arith.constant 0 : index
    %165 = vector.load %arg19[%c8_113, %c0_114] : memref<304x8xbf16, #tpu.memory_space<vmem>>, vector<256x8xbf16>
    %c1_115 = arith.constant 1 : index
    %c0_116 = arith.constant 0 : index
    %c0_117 = arith.constant 0 : index
    %166 = vector.load %arg10[%c1_115, %c0_116, %c0_117] : memref<9x8x8xbf16, #tpu.memory_space<vmem>>, vector<1x8x8xbf16>
    %167 = vector.shape_cast %166 : vector<1x8x8xbf16> to vector<8x8xbf16>
    %cst_118 = arith.constant dense<0.000000e+00> : vector<256x8xf32>
    %168 = tpu.matmul %165, %167, %cst_118 {dimension_numbers = #tpu.dot_dimension_numbers<[1], [0], [0], [1], [0, 0, 1, 1], [], []>} : vector<256x8xbf16>, vector<8x8xbf16>, vector<256x8xf32> -> vector<256x8xf32>
    %169 = arith.addf %164, %168 : vector<256x8xf32>
    %c9_119 = arith.constant 9 : index
    %c0_120 = arith.constant 0 : index
    %170 = vector.load %arg19[%c9_119, %c0_120] : memref<304x8xbf16, #tpu.memory_space<vmem>>, vector<256x8xbf16>
    %cst_121 = arith.constant 0.000000e+00 : bf16
    %171 = vector.broadcast %cst_121 : bf16 to vector<256x8xbf16>
    %172 = vector.shape_cast %154 : vector<256x1xi1> to vector<256x1xi1>
    %173 = vector.broadcast %172 : vector<256x1xi1> to vector<256x8xi1>
    %174 = arith.select %173, %170, %171 : vector<256x8xi1>, vector<256x8xbf16>
    %c2_122 = arith.constant 2 : index
    %c0_123 = arith.constant 0 : index
    %c0_124 = arith.constant 0 : index
    %175 = vector.load %arg10[%c2_122, %c0_123, %c0_124] : memref<9x8x8xbf16, #tpu.memory_space<vmem>>, vector<1x8x8xbf16>
    %176 = vector.shape_cast %175 : vector<1x8x8xbf16> to vector<8x8xbf16>
    %cst_125 = arith.constant dense<0.000000e+00> : vector<256x8xf32>
    %177 = tpu.matmul %174, %176, %cst_125 {dimension_numbers = #tpu.dot_dimension_numbers<[1], [0], [0], [1], [0, 0, 1, 1], [], []>} : vector<256x8xbf16>, vector<8x8xbf16>, vector<256x8xf32> -> vector<256x8xf32>
    %178 = arith.addf %169, %177 : vector<256x8xf32>
    %c23_126 = arith.constant 23 : index
    %c0_127 = arith.constant 0 : index
    %179 = vector.load %arg19[%c23_126, %c0_127] : memref<304x8xbf16, #tpu.memory_space<vmem>>, vector<256x8xbf16>
    %cst_128 = arith.constant 0.000000e+00 : bf16
    %180 = vector.broadcast %cst_128 : bf16 to vector<256x8xbf16>
    %181 = vector.shape_cast %152 : vector<256x1xi1> to vector<256x1xi1>
    %182 = vector.broadcast %181 : vector<256x1xi1> to vector<256x8xi1>
    %183 = arith.select %182, %179, %180 : vector<256x8xi1>, vector<256x8xbf16>
    %c3_129 = arith.constant 3 : index
    %c0_130 = arith.constant 0 : index
    %c0_131 = arith.constant 0 : index
    %184 = vector.load %arg10[%c3_129, %c0_130, %c0_131] : memref<9x8x8xbf16, #tpu.memory_space<vmem>>, vector<1x8x8xbf16>
    %185 = vector.shape_cast %184 : vector<1x8x8xbf16> to vector<8x8xbf16>
    %cst_132 = arith.constant dense<0.000000e+00> : vector<256x8xf32>
    %186 = tpu.matmul %183, %185, %cst_132 {dimension_numbers = #tpu.dot_dimension_numbers<[1], [0], [0], [1], [0, 0, 1, 1], [], []>} : vector<256x8xbf16>, vector<8x8xbf16>, vector<256x8xf32> -> vector<256x8xf32>
    %187 = arith.addf %178, %186 : vector<256x8xf32>
    %c24_133 = arith.constant 24 : index
    %c0_134 = arith.constant 0 : index
    %188 = vector.load %arg19[%c24_133, %c0_134] : memref<304x8xbf16, #tpu.memory_space<vmem>>, vector<256x8xbf16>
    %c4_135 = arith.constant 4 : index
    %c0_136 = arith.constant 0 : index
    %c0_137 = arith.constant 0 : index
    %189 = vector.load %arg10[%c4_135, %c0_136, %c0_137] : memref<9x8x8xbf16, #tpu.memory_space<vmem>>, vector<1x8x8xbf16>
    %190 = vector.shape_cast %189 : vector<1x8x8xbf16> to vector<8x8xbf16>
    %cst_138 = arith.constant dense<0.000000e+00> : vector<256x8xf32>
    %191 = tpu.matmul %188, %190, %cst_138 {dimension_numbers = #tpu.dot_dimension_numbers<[1], [0], [0], [1], [0, 0, 1, 1], [], []>} : vector<256x8xbf16>, vector<8x8xbf16>, vector<256x8xf32> -> vector<256x8xf32>
    %192 = arith.addf %187, %191 : vector<256x8xf32>
    %c25_139 = arith.constant 25 : index
    %c0_140 = arith.constant 0 : index
    %193 = vector.load %arg19[%c25_139, %c0_140] : memref<304x8xbf16, #tpu.memory_space<vmem>>, vector<256x8xbf16>
    %cst_141 = arith.constant 0.000000e+00 : bf16
    %194 = vector.broadcast %cst_141 : bf16 to vector<256x8xbf16>
    %195 = vector.shape_cast %154 : vector<256x1xi1> to vector<256x1xi1>
    %196 = vector.broadcast %195 : vector<256x1xi1> to vector<256x8xi1>
    %197 = arith.select %196, %193, %194 : vector<256x8xi1>, vector<256x8xbf16>
    %c5_142 = arith.constant 5 : index
    %c0_143 = arith.constant 0 : index
    %c0_144 = arith.constant 0 : index
    %198 = vector.load %arg10[%c5_142, %c0_143, %c0_144] : memref<9x8x8xbf16, #tpu.memory_space<vmem>>, vector<1x8x8xbf16>
    %199 = vector.shape_cast %198 : vector<1x8x8xbf16> to vector<8x8xbf16>
    %cst_145 = arith.constant dense<0.000000e+00> : vector<256x8xf32>
    %200 = tpu.matmul %197, %199, %cst_145 {dimension_numbers = #tpu.dot_dimension_numbers<[1], [0], [0], [1], [0, 0, 1, 1], [], []>} : vector<256x8xbf16>, vector<8x8xbf16>, vector<256x8xf32> -> vector<256x8xf32>
    %201 = arith.addf %192, %200 : vector<256x8xf32>
    %c39 = arith.constant 39 : index
    %c0_146 = arith.constant 0 : index
    %202 = vector.load %arg19[%c39, %c0_146] : memref<304x8xbf16, #tpu.memory_space<vmem>>, vector<256x8xbf16>
    %cst_147 = arith.constant 0.000000e+00 : bf16
    %203 = vector.broadcast %cst_147 : bf16 to vector<256x8xbf16>
    %204 = vector.shape_cast %152 : vector<256x1xi1> to vector<256x1xi1>
    %205 = vector.broadcast %204 : vector<256x1xi1> to vector<256x8xi1>
    %206 = arith.select %205, %202, %203 : vector<256x8xi1>, vector<256x8xbf16>
    %c6_148 = arith.constant 6 : index
    %c0_149 = arith.constant 0 : index
    %c0_150 = arith.constant 0 : index
    %207 = vector.load %arg10[%c6_148, %c0_149, %c0_150] : memref<9x8x8xbf16, #tpu.memory_space<vmem>>, vector<1x8x8xbf16>
    %208 = vector.shape_cast %207 : vector<1x8x8xbf16> to vector<8x8xbf16>
    %cst_151 = arith.constant dense<0.000000e+00> : vector<256x8xf32>
    %209 = tpu.matmul %206, %208, %cst_151 {dimension_numbers = #tpu.dot_dimension_numbers<[1], [0], [0], [1], [0, 0, 1, 1], [], []>} : vector<256x8xbf16>, vector<8x8xbf16>, vector<256x8xf32> -> vector<256x8xf32>
    %210 = arith.addf %201, %209 : vector<256x8xf32>
    %c40 = arith.constant 40 : index
    %c0_152 = arith.constant 0 : index
    %211 = vector.load %arg19[%c40, %c0_152] : memref<304x8xbf16, #tpu.memory_space<vmem>>, vector<256x8xbf16>
    %c7_153 = arith.constant 7 : index
    %c0_154 = arith.constant 0 : index
    %c0_155 = arith.constant 0 : index
    %212 = vector.load %arg10[%c7_153, %c0_154, %c0_155] : memref<9x8x8xbf16, #tpu.memory_space<vmem>>, vector<1x8x8xbf16>
    %213 = vector.shape_cast %212 : vector<1x8x8xbf16> to vector<8x8xbf16>
    %cst_156 = arith.constant dense<0.000000e+00> : vector<256x8xf32>
    %214 = tpu.matmul %211, %213, %cst_156 {dimension_numbers = #tpu.dot_dimension_numbers<[1], [0], [0], [1], [0, 0, 1, 1], [], []>} : vector<256x8xbf16>, vector<8x8xbf16>, vector<256x8xf32> -> vector<256x8xf32>
    %215 = arith.addf %210, %214 : vector<256x8xf32>
    %c41 = arith.constant 41 : index
    %c0_157 = arith.constant 0 : index
    %216 = vector.load %arg19[%c41, %c0_157] : memref<304x8xbf16, #tpu.memory_space<vmem>>, vector<256x8xbf16>
    %cst_158 = arith.constant 0.000000e+00 : bf16
    %217 = vector.broadcast %cst_158 : bf16 to vector<256x8xbf16>
    %218 = vector.shape_cast %154 : vector<256x1xi1> to vector<256x1xi1>
    %219 = vector.broadcast %218 : vector<256x1xi1> to vector<256x8xi1>
    %220 = arith.select %219, %216, %217 : vector<256x8xi1>, vector<256x8xbf16>
    %c8_159 = arith.constant 8 : index
    %c0_160 = arith.constant 0 : index
    %c0_161 = arith.constant 0 : index
    %221 = vector.load %arg10[%c8_159, %c0_160, %c0_161] : memref<9x8x8xbf16, #tpu.memory_space<vmem>>, vector<1x8x8xbf16>
    %222 = vector.shape_cast %221 : vector<1x8x8xbf16> to vector<8x8xbf16>
    %cst_162 = arith.constant dense<0.000000e+00> : vector<256x8xf32>
    %223 = tpu.matmul %220, %222, %cst_162 {dimension_numbers = #tpu.dot_dimension_numbers<[1], [0], [0], [1], [0, 0, 1, 1], [], []>} : vector<256x8xbf16>, vector<8x8xbf16>, vector<256x8xf32> -> vector<256x8xf32>
    %224 = arith.addf %215, %223 : vector<256x8xf32>
    %c0_163 = arith.constant 0 : index
    %c0_164 = arith.constant 0 : index
    %225 = vector.load %arg11[%c0_163, %c0_164] : memref<1x8xf32, #tpu.memory_space<vmem>>, vector<1x8xf32>
    %226 = vector.broadcast %225 : vector<1x8xf32> to vector<256x8xf32>
    %227 = arith.addf %224, %226 : vector<256x8xf32>
    %cst_165 = arith.constant 0.000000e+00 : f32
    %228 = vector.broadcast %cst_165 : f32 to vector<256x8xf32>
    %229 = arith.cmpf oge, %227, %228 : vector<256x8xf32>
    %cst_166 = arith.constant 1.000000e-01 : f32
    %230 = vector.broadcast %cst_166 : f32 to vector<256x8xf32>
    %231 = arith.mulf %230, %227 : vector<256x8xf32>
    %232 = arith.select %229, %227, %231 : vector<256x8xi1>, vector<256x8xf32>
    %c0_167 = arith.constant 0 : index
    %c0_168 = arith.constant 0 : index
    %c0_169 = arith.constant 0 : index
    %233 = vector.load %arg16[%c0_167, %c0_168, %c0_169] : memref<1x256x8xf32, #tpu.memory_space<vmem>>, vector<1x256x8xf32>
    %234 = vector.shape_cast %233 : vector<1x256x8xf32> to vector<256x8xf32>
    %235 = vector.shape_cast %232 : vector<256x8xf32> to vector<1x256x8xf32>
    tpu.vector_store %arg16[%c0_167, %c0_168, %c0_169], %235 {strides = array<i32>} : memref<1x256x8xf32, #tpu.memory_space<vmem>>, vector<1x256x8xf32>,
    return
  }
  func.func @transform_0(%arg0: i32) -> (i32, i32, i32) {
    %c0_i32 = arith.constant 0 : i32
    %c0_i32_0 = arith.constant 0 : i32
    %c0_i32_1 = arith.constant 0 : i32
    return %arg0, %c0_i32, %c0_i32_0 : i32, i32, i32
  }
  func.func @transform_1(%arg0: i32) -> (i32, i32, i32) {
    %c0_i32 = arith.constant 0 : i32
    %c0_i32_0 = arith.constant 0 : i32
    %c0_i32_1 = arith.constant 0 : i32
    return %arg0, %c0_i32, %c0_i32_0 : i32, i32, i32
  }
  func.func @transform_2(%arg0: i32) -> (i32, i32, i32) {
    %c0_i32 = arith.constant 0 : i32
    %c0_i32_0 = arith.constant 0 : i32
    %c0_i32_1 = arith.constant 0 : i32
    return %arg0, %c0_i32, %c0_i32_0 : i32, i32, i32
  }
  func.func @transform_3(%arg0: i32) -> (i32, i32) {
    %c0_i32 = arith.constant 0 : i32
    %c0_i32_0 = arith.constant 0 : i32
    %c0_i32_1 = arith.constant 0 : i32
    return %c0_i32, %c0_i32_0 : i32, i32
  }
  func.func @transform_4(%arg0: i32) -> (i32, i32) {
    %c0_i32 = arith.constant 0 : i32
    %c0_i32_0 = arith.constant 0 : i32
    %c0_i32_1 = arith.constant 0 : i32
    return %c0_i32, %c0_i32_0 : i32, i32
  }
  func.func @transform_5(%arg0: i32) -> (i32, i32) {
    %c0_i32 = arith.constant 0 : i32
    %c0_i32_0 = arith.constant 0 : i32
    %c0_i32_1 = arith.constant 0 : i32
    return %c0_i32, %c0_i32_0 : i32, i32
  }
  func.func @transform_6(%arg0: i32) -> (i32, i32) {
    %c0_i32 = arith.constant 0 : i32
    %c0_i32_0 = arith.constant 0 : i32
    %c0_i32_1 = arith.constant 0 : i32
    return %c0_i32, %c0_i32_0 : i32, i32
  }
  func.func @transform_7(%arg0: i32) -> (i32, i32) {
    %c0_i32 = arith.constant 0 : i32
    %c0_i32_0 = arith.constant 0 : i32
    %c0_i32_1 = arith.constant 0 : i32
    return %c0_i32, %c0_i32_0 : i32, i32
  }
  func.func @transform_8(%arg0: i32) -> (i32, i32) {
    %c0_i32 = arith.constant 0 : i32
    %c0_i32_0 = arith.constant 0 : i32
    %c0_i32_1 = arith.constant 0 : i32
    return %c0_i32, %c0_i32_0 : i32, i32
  }
  func.func @transform_9(%arg0: i32) -> (i32, i32, i32) {
    %c0_i32 = arith.constant 0 : i32
    %c0_i32_0 = arith.constant 0 : i32
    %c0_i32_1 = arith.constant 0 : i32
    %c0_i32_2 = arith.constant 0 : i32
    return %c0_i32, %c0_i32_0, %c0_i32_1 : i32, i32, i32
  }
  func.func @transform_10(%arg0: i32) -> (i32, i32) {
    %c0_i32 = arith.constant 0 : i32
    %c0_i32_0 = arith.constant 0 : i32
    %c0_i32_1 = arith.constant 0 : i32
    return %c0_i32, %c0_i32_0 : i32, i32
  }
  func.func @transform_11(%arg0: i32) -> (i32, i32, i32) {
    %c0_i32 = arith.constant 0 : i32
    %c0_i32_0 = arith.constant 0 : i32
    %c0_i32_1 = arith.constant 0 : i32
    %c0_i32_2 = arith.constant 0 : i32
    return %c0_i32, %c0_i32_0, %c0_i32_1 : i32, i32, i32
  }
  func.func @transform_12(%arg0: i32) -> (i32, i32) {
    %c0_i32 = arith.constant 0 : i32
    %c0_i32_0 = arith.constant 0 : i32
    %c0_i32_1 = arith.constant 0 : i32
    return %c0_i32, %c0_i32_0 : i32, i32
  }
  func.func @transform_13(%arg0: i32) -> (i32, i32) {
    %c0_i32 = arith.constant 0 : i32
    %c0_i32_0 = arith.constant 0 : i32
    %c0_i32_1 = arith.constant 0 : i32
    return %c0_i32, %c0_i32_0 : i32, i32
  }
  func.func @transform_14(%arg0: i32) -> (i32, i32) {
    %c0_i32 = arith.constant 0 : i32
    %c0_i32_0 = arith.constant 0 : i32
    %c0_i32_1 = arith.constant 0 : i32
    return %c0_i32, %c0_i32_0 : i32, i32
  }
  func.func @transform_15(%arg0: i32) -> (i32, i32, i32) {
    %c0_i32 = arith.constant 0 : i32
    %c0_i32_0 = arith.constant 0 : i32
    %c0_i32_1 = arith.constant 0 : i32
    return %arg0, %c0_i32, %c0_i32_0 : i32, i32, i32
  }
  func.func @transform_16(%arg0: i32) -> (i32, i32, i32) {
    %c0_i32 = arith.constant 0 : i32
    %c0_i32_0 = arith.constant 0 : i32
    %c0_i32_1 = arith.constant 0 : i32
    return %arg0, %c0_i32, %c0_i32_0 : i32, i32, i32
  }
  func.func @transform_17(%arg0: i32) -> (i32, i32, i32) {
    %c0_i32 = arith.constant 0 : i32
    %c0_i32_0 = arith.constant 0 : i32
    %c0_i32_1 = arith.constant 0 : i32
    return %arg0, %c0_i32, %c0_i32_0 : i32, i32, i32
  }
}

</mosaic_0001>

<bundles_post_ra>
// kernel: tpu_custom_call.1
= control target key start
LH: loop header
LB: loop body
LE: loop exit
PB: predicated region body
PF: predicated region fallthrough
CT: control target
= control target key end

     0   :  { %s9199_s24 = smov 0   ;;  %s12155_s0 = inlined_call_operand.vmem [shape: f32[2,256,4], index: 0, kind: input, shape index: {}]   ;;  %s12156_s1 = inlined_call_operand.vmem [shape: f32[2,64,8], index: 1, kind: input, shape index: {}]   ;;  %s12157_s2 = inlined_call_operand.vmem [shape: f32[2,16,16], index: 2, kind: input, shape index: {}]   ;;  %s12158_s3 = inlined_call_operand.vmem [shape: bf16[4,8], index: 3, kind: input, shape index: {}]   ;;  %s12159_s4 = inlined_call_operand.vmem [shape: f32[1,8], index: 4, kind: input, shape index: {}]   ;;  %s12160_s5 = inlined_call_operand.vmem [shape: bf16[8,8], index: 5, kind: input, shape index: {}]   ;;  %s12161_s6 = inlined_call_operand.vmem [shape: f32[1,8], index: 6, kind: input, shape index: {}]   ;;  %s12162_s7 = inlined_call_operand.vmem [shape: bf16[16,8], index: 7, kind: input, shape index: {}]   ;;  %s12163_s8 = inlined_call_operand.vmem [shape: f32[1,8], index: 8, kind: input, shape index: {}]   ;;  %s12164_s9 = inlined_call_operand.vmem [shape: bf16[9,8,8], index: 9, kind: input, shape index: {}]   ;;  %s12165_s10 = inlined_call_operand.vmem [shape: f32[1,8], index: 10, kind: input, shape index: {}]   ;;  %s12166_s11 = inlined_call_operand.vmem [shape: bf16[9,8,8], index: 11, kind: input, shape index: {}]   ;;  %s12167_s12 = inlined_call_operand.vmem [shape: f32[1,8], index: 12, kind: input, shape index: {}]   ;;  %s12168_s13 = inlined_call_operand.vmem [shape: bf16[256,64], index: 13, kind: input, shape index: {}]   ;;  %s12169_s14 = inlined_call_operand.vmem [shape: bf16[64,16], index: 14, kind: input, shape index: {}]   ;;  %s12170_s15 = inlined_call_operand.vmem [shape: f32[2,256,8], index: 15, kind: output, shape index: {0}]   ;;  %s12171_s16 = inlined_call_operand.vmem [shape: f32[2,64,8], index: 16, kind: output, shape index: {1}]   ;;  %s12172_s17 = inlined_call_operand.vmem [shape: f32[2,16,8], index: 17, kind: output, shape index: {2}]  }
   0x1   :  { %12283 = sst [smem:[#allocation44_spill]] %s12155_s0 }
   0x2   :  { %12284 = sst [smem:[#allocation45_spill]] %s12156_s1 }
   0x3 LB: > { %s7641_s25 = sadd.s32 4294967295, %s9103_s24   ;;  %p7645_p0 = scmp.ge.s32.totalorder %s9103_s24, 1  ;;  %s9103_s24 = sphi %s9199_s24, %s28_s24  }
   0x4   : > { %p512_p1 = scmp.lt.s32.totalorder %s9103_s24, 3 }
   0x6   : > { %p513_p2 = pnand %p7645_p0, %p512_p1 }
   0x8   : > { %516 = sbr.rel (%p513_p2) target bundleno = 1838 (0x72e), region = 80 }
   0xf   : > { %v665_v0 = vld [vmem:[%s12158_s3] sm:$0x3]  ;;  %vm722_vm0 = vcmask 1041408   ;;  %p584_p3 = scmp.lt.s32.totalorder %s7641_s25, 1  ;;  %vm12177_vm1 = vcmask 1043456   ;;  %s12285_s19 = sld [smem:[#allocation44_spill]] }
  0x10   : > { %9032 = vmatprep.subr.msk.bf16.mxu1 %vm722_vm0, %v665_v0  ;;  %v724_v1 = vsel %vm722_vm0, %v665_v0, 0  ;;  %v995_v2 = vld [vmem:[%s12160_s5] sm:$0xf]  ;;  %vm673_vm2 = vcmask 31744   ;;  %v9105_v17 = vmov 0.0   ;;  %s12286_s23 = sld [smem:[#allocation45_spill]] }
  0x11   : > { %8217 = vmatpush3.bf16.msra.mxu1 %v724_v1  ;;  %s12937_s25 = smov (!%p584_p3, %s7641_s25), 1  ;;  %v1018_v11 = vsel %vm12177_vm1, %v995_v2, 0  ;;  %vm12178_vm3 = vcmask 64512   ;;  %v9064_v61 = vld [vmem:[%s12162_s7] sm:$0xff]   ;;  %vm9106_vm4 = vmmov 0   ;;  %vm1127_vm5 = vcmask 130048  }
  0x12   : > { %9033 = vmatprep.subr.msk.bf16.mxu1 %vm12177_vm1, %v995_v2  ;;  %s7963_s0 = sshll.u32 %s12937_s25, 8  ;;  %s7964_s20 = sshll.u32 %s12937_s25, 6 }
  0x13   : > { %s7965_s29 = sshll.u32 %s12937_s25, 4  ;;  %s12028_s21 = scalar_lea.vmem %s12170_s15, %s7963_s0 }
  0x14   : > { %s613_s28 = scalar_lea.vmem %s12172_s17, %s7965_s29 }
  0x15   : > { %s9222_s1 = scalar_lea.vmem %s12285_s19, %s7963_s0  ;;  %s598_s19 = scalar_lea.vmem %s12157_s2, %s7965_s29 }
  0x16   : > { %v617_v3 = vld [vmem:[%s9222_s1] sm:$0xff]  ;;  %v618_v4 = vld [vmem:[%s9222_s1 + $0x8] sm:$0xff]  ;;  %v619_v5 = vld [vmem:[%s9222_s1 + $0x10] sm:$0xff]  ;;  %s593_s26 = scalar_lea.vmem %s12286_s23, %s7964_s20 }
  0x17   : > { %v649_v6 = vpack.c.bf16 %v618_v4, %v617_v3  ;;  %v620_v7 = vld [vmem:[%s9222_s1 + $0x18] sm:$0xff]  ;;  %v621_v8 = vld [vmem:[%s9222_s1 + $0x20] sm:$0xff]  ;;  %v622_v9 = vld [vmem:[%s9222_s1 + $0x28] sm:$0xff] }
  0x18   : > { %v650_v10 = vpack.c.bf16 %v620_v7, %v619_v5  ;;  %v651_v12 = vpack.c.bf16 %v622_v9, %v621_v8  ;;  %v623_v13 = vld [vmem:[%s9222_s1 + $0x30] sm:$0xff]  ;;  %v624_v14 = vld [vmem:[%s9222_s1 + $0x38] sm:$0xff]  ;;  %v625_v15 = vld [vmem:[%s9222_s1 + $0x40] sm:$0xff] }
  0x19   : > { %8218 = vmatprep.mubr.msk.bf16.mxu1 %vm673_vm2, %v649_v6  ;;  %v626_v16 = vld [vmem:[%s9222_s1 + $0x48] sm:$0xff]  ;;  %v652_v18 = vpack.c.bf16 %v624_v14, %v623_v13  ;;  %v627_v20 = vld [vmem:[%s9222_s1 + $0x50] sm:$0xff]  ;;  %v628_v21 = vld [vmem:[%s9222_s1 + $0x58] sm:$0xff] }
  0x1a   : > { %8219 = vmatmul.mubr.msk.bf16.vlgmr.msra.gmra.mrb[0].mxu1 %vm673_vm2, %v650_v10  ;;  %v653_v19 = vpack.c.bf16 %v626_v16, %v625_v15  ;;  %v629_v22 = vld [vmem:[%s9222_s1 + $0x60] sm:$0xff]  ;;  %v630_v23 = vld [vmem:[%s9222_s1 + $0x68] sm:$0xff]  ;;  %v654_v24 = vpack.c.bf16 %v628_v21, %v627_v20  ;;  %v631_v26 = vld [vmem:[%s9222_s1 + $0x70] sm:$0xff] }
  0x1b   : > { %8251 = vmatpush3.bf16.msra.mxu1 %v1018_v11  ;;  %8222 = vmatprep.mubr.msk.bf16.mxu1 %vm673_vm2, %v651_v12  ;;  %v655_v25 = vpack.c.bf16 %v630_v23, %v629_v22  ;;  %v632_v27 = vld [vmem:[%s9222_s1 + $0x78] sm:$0xff]  ;;  %v633_v28 = vld [vmem:[%s9222_s1 + $0x80] sm:$0xff]  ;;  %v634_v29 = vld [vmem:[%s9222_s1 + $0x88] sm:$0xff] }
  0x1c   : > { %8260 = vmatprep.subr.bf16.mxu1 %v9105_v17  ;;  %v656_v30 = vpack.c.bf16 %v632_v27, %v631_v26  ;;  %v657_v31 = vpack.c.bf16 %v634_v29, %v633_v28  ;;  %v635_v32 = vld [vmem:[%s9222_s1 + $0x90] sm:$0xff]  ;;  %v636_v33 = vld [vmem:[%s9222_s1 + $0x98] sm:$0xff]  ;;  %v637_v34 = vld [vmem:[%s9222_s1 + $0xa0] sm:$0xff] }
  0x1d   : > { %v638_v35 = vld [vmem:[%s9222_s1 + $0xa8] sm:$0xff]  ;;  %v658_v36 = vpack.c.bf16 %v636_v33, %v635_v32  ;;  %v639_v38 = vld [vmem:[%s9222_s1 + $0xb0] sm:$0xff]  ;;  %v640_v39 = vld [vmem:[%s9222_s1 + $0xb8] sm:$0xff] }
  0x1e   : > { %v659_v37 = vpack.c.bf16 %v638_v35, %v637_v34  ;;  %v641_v40 = vld [vmem:[%s9222_s1 + $0xc0] sm:$0xff]  ;;  %v642_v41 = vld [vmem:[%s9222_s1 + $0xc8] sm:$0xff]  ;;  %v660_v42 = vpack.c.bf16 %v640_v39, %v639_v38  ;;  %v643_v44 = vld [vmem:[%s9222_s1 + $0xd0] sm:$0xff] }
  0x1f   : > { %v661_v43 = vpack.c.bf16 %v642_v41, %v641_v40  ;;  %v644_v45 = vld [vmem:[%s9222_s1 + $0xd8] sm:$0xff]  ;;  %v645_v46 = vld [vmem:[%s9222_s1 + $0xe0] sm:$0xff]  ;;  %v646_v47 = vld [vmem:[%s9222_s1 + $0xe8] sm:$0xff] }
  0x20   : > { %v662_v48 = vpack.c.bf16 %v644_v45, %v643_v44  ;;  %v663_v49 = vpack.c.bf16 %v646_v47, %v645_v46  ;;  %v647_v50 = vld [vmem:[%s9222_s1 + $0xf0] sm:$0xff]  ;;  %v648_v51 = vld [vmem:[%s9222_s1 + $0xf8] sm:$0xff]  ;;  %v983_v52 = vld [vmem:[%s593_s26] sm:$0xff] }
  0x21   : > { %v984_v53 = vld [vmem:[%s593_s26 + $0x8] sm:$0xff]  ;;  %v664_v54 = vpack.c.bf16 %v648_v51, %v647_v50  ;;  %v985_v56 = vld [vmem:[%s593_s26 + $0x10] sm:$0xff]  ;;  %v986_v57 = vld [vmem:[%s593_s26 + $0x18] sm:$0xff] }
  0x22   : > { %8223 = vmatmul.mubr.msk.bf16.gmra.mrb[4].mxu1 %vm673_vm2, %v652_v18  ;;  %v991_v55 = vpack.c.bf16 %v984_v53, %v983_v52  ;;  %v987_v58 = vld [vmem:[%s593_s26 + $0x20] sm:$0xff]  ;;  %v988_v59 = vld [vmem:[%s593_s26 + $0x28] sm:$0xff]  ;;  %v992_v60 = vpack.c.bf16 %v986_v57, %v985_v56  ;;  %v989_v63 = vld [vmem:[%s593_s26 + $0x30] sm:$0xff] }
  0x23   : > { %8226 = vmatprep.mubr.msk.bf16.mxu1 %vm673_vm2, %v653_v19  ;;  %v993_v62 = vpack.c.bf16 %v988_v59, %v987_v58  ;;  %v990_v0 = vld [vmem:[%s593_s26 + $0x38] sm:$0xff]  ;;  %v1109_v2 = vld [vmem:[%s598_s19] sm:$0xff]  ;;  %v1110_v3 = vld [vmem:[%s598_s19 + $0x8] sm:$0xff] }
  0x24   : > { %v994_v1 = vpack.c.bf16 %v990_v0, %v989_v63  ;;  %v1111_v4 = vpack.c.bf16 %v1110_v3, %v1109_v2  ;;  %v9065_v5 = vld [vmem:[%s12169_s14] sm:$0xff]   ;;  %v9066_v58 = vld [vmem:[%s12169_s14 + $0x8] sm:$0xff]   ;;  %v9067_v59 = vld [vmem:[%s12169_s14 + $0x10] sm:$0xff]  }
  0x25   : > { %v7680_v46 = vld [vmem:[%s12163_s8] ss:$0 sm:$0xff] }
  0x26   : > { %v9409_v0 = vld [vmem:[%s12166_s11] sm:$0xf] }
  0x2a   : > { %8227 = vmatmul.mubr.msk.bf16.gmra.mrb[8].mxu1 %vm673_vm2, %v654_v24 }
  0x2b   : > { %8230 = vmatprep.mubr.msk.bf16.mxu1 %vm673_vm2, %v655_v25 }
  0x32   : > { %8231 = vmatmul.mubr.msk.bf16.gmra.mrb[12].mxu1 %vm673_vm2, %v656_v30 }
  0x33   : > { %8234 = vmatprep.mubr.msk.bf16.mxu1 %vm673_vm2, %v657_v31 }
  0x3a   : > { %8235 = vmatmul.mubr.msk.bf16.gmra.mrb[16].mxu1 %vm673_vm2, %v658_v36 }
  0x3b   : > { %8238 = vmatprep.mubr.msk.bf16.mxu1 %vm673_vm2, %v659_v37 }
  0x42   : > { %8239 = vmatmul.mubr.msk.bf16.gmra.mrb[20].mxu1 %vm673_vm2, %v660_v42 }
  0x43   : > { %8242 = vmatprep.mubr.msk.bf16.mxu1 %vm673_vm2, %v661_v43 }
  0x4a   : > { %8243 = vmatmul.mubr.msk.bf16.gmra.mrb[24].mxu1 %vm673_vm2, %v662_v48 }
  0x4b   : > { %8246 = vmatprep.mubr.msk.bf16.mxu1 %vm673_vm2, %v663_v49 }
  0x52   : > { %8247 = vmatmul.mubr.msk.bf16.gmra.mrb[28].mxu1 %vm673_vm2, %v664_v54 }
  0x53   : > { %8252 = vmatprep.mubr.msk.bf16.mxu1 %vm12178_vm3, %v991_v55 }
  0x5a   : > { %8253 = vmatmul.mubr.msk.bf16.vlgmr.msra.gmra.mrb[32].mxu1 %vm12178_vm3, %v992_v60  ;;  %v9068_v60 = vld [vmem:[%s12169_s14 + $0x18] sm:$0xff]  }
  0x5b   : > { %8261 = vmatpush3.bf16.msra.mxu1 %v9064_v61  ;;  %8256 = vmatprep.mubr.msk.bf16.mxu1 %vm12178_vm3, %v993_v62  ;;  %v12175_v61 = vmov 0   ;;  %v7695_v62 = vld [vmem:[%s12166_s11 + $0x4] sm:$0xf] }
  0x5c   : > { %1294 = vst.msk [vmem:[#allocation3] sm:$0xff] %vm12178_vm3, %v12175_v61  ;;  %1295 = vst.msk [vmem:[#allocation3 + $0x28] sm:$0xff] %vm12178_vm3, %v12175_v61  ;;  %v1464_v63 = vsel %vm12177_vm1, %v7695_v62, 0 }
  0x5d   : > { %3064 = vst.msk [vmem:[#allocation2] sm:$0xff] %vm12178_vm3, %v12175_v61  ;;  %3069 = vst.msk [vmem:[#allocation2 + $0x90] sm:$0xff] %vm12178_vm3, %v12175_v61 }
  0x62   : > { %8257 = vmatmul.mubr.msk.bf16.gmra.mrb[36].mxu1 %vm12178_vm3, %v994_v1  ;;  %v1304_v1 = vlaneseq }
  0x63   : > { %8262 = vmatprep.mubr.msk.bf16.mxu1 %vm9106_vm4, %v9105_v17 }
  0x64   : > { %v9413_v2 = vshrl.u32 %v1304_v1, 7 }
  0x66   : > { %12307 = vst [vmem:[#allocation24_spill] sm:$0xff] %v9413_v2  ;;  %v9416_v3 = vadd.s32 8, %v9413_v2 }
  0x68   : > { %12308 = vst [vmem:[#allocation25_spill] sm:$0xff] %v9416_v3 }
  0x6a   : > { %8263 = vmatmul.mubr.msk.bf16.vlgmr.msra.gmra.mrb[40].mxu1 %vm1127_vm5, %v1111_v4  ;;  %v9419_v4 = vadd.s32 16, %v9413_v2 }
  0x6b   : > { %8268 = vmatprep.mubr.msk.bf16.mxu1 %vm1127_vm5, %v9065_v5  ;;  %v9422_v5 = vadd.s32 24, %v9413_v2 }
  0x6c   : > { %12309 = vst [vmem:[#allocation26_spill] sm:$0xff] %v9419_v4 }
  0x6d   : > { %12310 = vst [vmem:[#allocation27_spill] sm:$0xff] %v9422_v5 }
  0xed   : > { %v9299_v6 = vpop.f32.mrb[0].mxu1 }
  0xee   : > { %v9301_v7 = vpop.f32.mrb[1].mxu1 }
  0xef   : > { %v9303_v8 = vpop.f32.mrb[2].mxu1 }
  0xf0   : > { %v9305_v9 = vpop.f32.mrb[3].mxu1 }
  0xf5   : > { %v9307_v10 = vpop.f32.mrb[4].mxu1 }
  0xf6   : > { %v9309_v11 = vpop.f32.mrb[5].mxu1 }
  0xf7   : > { %v9311_v12 = vpop.f32.mrb[6].mxu1 }
  0xf8   : > { %v9313_v13 = vpop.f32.mrb[7].mxu1 }
  0xfd   : > { %v9315_v14 = vpop.f32.mrb[8].mxu1 }
  0xfe   : > { %v9317_v15 = vpop.f32.mrb[9].mxu1 }
  0xff   : > { %v9319_v16 = vpop.f32.mrb[10].mxu1 }
 0x100   : > { %v9321_v17 = vpop.f32.mrb[11].mxu1 }
 0x105   : > { %v9323_v18 = vpop.f32.mrb[12].mxu1 }
 0x106   : > { %12287 = vst [vmem:[#allocation4_spill] sm:$0xff] %v9323_v18  ;;  %v9325_v19 = vpop.f32.mrb[13].mxu1 }
 0x107   : > { %12288 = vst [vmem:[#allocation5_spill] sm:$0xff] %v9325_v19  ;;  %v9327_v20 = vpop.f32.mrb[14].mxu1 }
 0x108   : > { %12289 = vst [vmem:[#allocation6_spill] sm:$0xff] %v9327_v20  ;;  %v9329_v21 = vpop.f32.mrb[15].mxu1 }
 0x109   : > { %12290 = vst [vmem:[#allocation7_spill] sm:$0xff] %v9329_v21 }
 0x10d   : > { %v9331_v22 = vpop.f32.mrb[16].mxu1 }
 0x10e   : > { %12291 = vst [vmem:[#allocation8_spill] sm:$0xff] %v9331_v22  ;;  %v9333_v23 = vpop.f32.mrb[17].mxu1 }
 0x10f   : > { %12292 = vst [vmem:[#allocation9_spill] sm:$0xff] %v9333_v23  ;;  %v9335_v24 = vpop.f32.mrb[18].mxu1 }
 0x110   : > { %12293 = vst [vmem:[#allocation10_spill] sm:$0xff] %v9335_v24  ;;  %v9337_v25 = vpop.f32.mrb[19].mxu1 }
 0x111   : > { %12294 = vst [vmem:[#allocation11_spill] sm:$0xff] %v9337_v25 }
 0x115   : > { %v9339_v26 = vpop.f32.mrb[20].mxu1 }
 0x116   : > { %12295 = vst [vmem:[#allocation12_spill] sm:$0xff] %v9339_v26  ;;  %v9341_v27 = vpop.f32.mrb[21].mxu1 }
 0x117   : > { %12296 = vst [vmem:[#allocation13_spill] sm:$0xff] %v9341_v27  ;;  %v9343_v28 = vpop.f32.mrb[22].mxu1 }
 0x118   : > { %12297 = vst [vmem:[#allocation14_spill] sm:$0xff] %v9343_v28  ;;  %v9345_v29 = vpop.f32.mrb[23].mxu1 }
 0x119   : > { %12298 = vst [vmem:[#allocation15_spill] sm:$0xff] %v9345_v29 }
 0x11d   : > { %v9347_v30 = vpop.f32.mrb[24].mxu1 }
 0x11e   : > { %12299 = vst [vmem:[#allocation16_spill] sm:$0xff] %v9347_v30  ;;  %v9349_v31 = vpop.f32.mrb[25].mxu1 }
 0x11f   : > { %12300 = vst [vmem:[#allocation17_spill] sm:$0xff] %v9349_v31  ;;  %v9351_v32 = vpop.f32.mrb[26].mxu1 }
 0x120   : > { %12301 = vst [vmem:[#allocation18_spill] sm:$0xff] %v9351_v32  ;;  %v9353_v33 = vpop.f32.mrb[27].mxu1 }
 0x121   : > { %12302 = vst [vmem:[#allocation19_spill] sm:$0xff] %v9353_v33 }
 0x125   : > { %v9355_v34 = vpop.f32.mrb[28].mxu1 }
 0x126   : > { %12303 = vst [vmem:[#allocation20_spill] sm:$0xff] %v9355_v34  ;;  %v9357_v35 = vpop.f32.mrb[29].mxu1 }
 0x127   : > { %12304 = vst [vmem:[#allocation21_spill] sm:$0xff] %v9357_v35  ;;  %v9359_v36 = vpop.f32.mrb[30].mxu1 }
 0x128   : > { %12305 = vst [vmem:[#allocation22_spill] sm:$0xff] %v9359_v36  ;;  %v9361_v37 = vpop.f32.mrb[31].mxu1 }
 0x129   : > { %12306 = vst [vmem:[#allocation23_spill] sm:$0xff] %v9361_v37 }
 0x12d   : > { %v8254_v38 = vpop.f32.mrb[32].mxu1 }
 0x12e   : > { %v1054_v39 = vpop.f32.mrb[33].mxu1 }
 0x12f   : > { %v8255_v40 = vpop.f32.mrb[34].mxu1 }
 0x130   : > { %v1057_v41 = vpop.f32.mrb[35].mxu1 }
 0x135   : > { %v9363_v42 = vpop.f32.mrb[36].mxu1 }
 0x136   : > { %v9365_v43 = vpop.f32.mrb[37].mxu1 }
 0x137   : > { %v9367_v44 = vpop.f32.mrb[38].mxu1 }
 0x138   : > { %v9369_v45 = vpop.f32.mrb[39].mxu1 }
 0x13d   : > { %v1165_v47 = vpop.f32.mrb[40].mxu1 }
 0x13e   : > { %v1166_v48 = vadd.f32 %v7680_v46, %v1165_v47  ;;  %v8264_v49 = vpop.f32.mrb[41].mxu1  ;;  %v1314_v47 = vand.u32 7, %v9416_v3 }
 0x13f   : > { %v1168_v50 = vpop.f32.mrb[42].mxu1  ;;  %v12174_v49 = vand.u32 7, %v9419_v4 }
 0x140   : > { %vm1172_vm6 = vcmp.ge.f32.partialorder %v1166_v48, 0.0  ;;  %v1174_v51 = vmul.f32 0.1, %v1166_v48  ;;  %v1169_v52 = vadd.f32 %v7680_v46, %v1168_v50  ;;  %v8265_v53 = vpop.f32.mrb[43].mxu1  ;;  %v1313_v46 = vand.u32 7, %v9413_v2 }
 0x141   : > { %v12173_v50 = vand.u32 7, %v9422_v5  ;;  %v9439_v53 = vadd.s32 40, %v9413_v2  ;;  %vm9444_vm9 = vcmp.ne.s32.totalorder %v1314_v47, 0  ;;  %vm9453_vm10 = vcmp.ne.s32.totalorder %v12174_v49, 0 }
 0x142   : > { %vm1173_vm7 = vcmp.ge.f32.partialorder %v1169_v52, 0.0  ;;  %v1175_v54 = vmul.f32 0.1, %v1169_v52  ;;  %v1176_v55 = vsel %vm1172_vm6, %v1166_v48, %v1174_v51  ;;  %v7675_v48 = vld [vmem:[%s12161_s6] ss:$0 sm:$0xff]  ;;  %v9432_v51 = vadd.s32 32, %v9413_v2  ;;  %vm1359_vm13 = vmpackc.low %vm9444_vm9, %vm9444_vm9 }
 0x143   : > { %1178 = vst.msk [vmem:[%s613_s28] sm:$0xff] %vm12178_vm3, %v1176_v55  ;;  %vm9434_vm8 = vcmp.ne.s32.totalorder %v1313_v46, 0  ;;  %12314 = vst [vmem:[#allocation29_spill] sm:$0xff] %v9439_v53  ;;  %vm9459_vm11 = vcmp.ne.s32.totalorder %v12173_v50, 0  ;;  %vm9471_vm15 = vcmp.ne.s32.totalorder %v1313_v46, 7  ;;  %vm9479_vm4 = vcmp.ne.s32.totalorder %v1314_v47, 7 }
 0x144   : > { %v1177_v56 = vsel %vm1173_vm7, %v1169_v52, %v1175_v54  ;;  %12311 = vst [vmem:[#allocation28_spill] sm:$0xff] %v9432_v51  ;;  %v1063_v54 = vadd.f32 %v8254_v38, %v7675_v48  ;;  %vm1358_vm12 = vmpackc.low %vm9434_vm8, %vm9434_vm8  ;;  %v12329_v47 = vmov 0   ;;  %v1079_v36 = vadd.f32 %v9363_v42, %v7675_v48 }
 0x145   : > { %1179 = vst.msk [vmem:[%s613_s28 + $0x8] sm:$0xff] %vm12178_vm3, %v1177_v56  ;;  %v1188_v57 = vpack.c.bf16 %v1177_v56, %v1176_v55  ;;  %v9442_v55 = vadd.s32 48, %v9413_v2  ;;  %vm1360_vm0 = vmpackc.low %vm9453_vm10, %vm9453_vm10  ;;  %v1366_v38 = vsel %vm1358_vm12, 65537, %v12329_v47  ;;  %v9561_v37 = vadd.f32 %v7675_v48, %v9369_v45  ;;  %s10084_s28 = scalar_lea.vmem %s12171_s16, %s7964_s20 }
 0x146   : > { %vm1087_vm14 = vcmp.ge.f32.partialorder %v1063_v54, 0.0  ;;  %vm1673_vm3 = vmpackc.low %vm9471_vm15, %vm9471_vm15  ;;  %v1368_v56 = vsel %vm1360_vm0, 65537, %v12329_v47  ;;  %v12342_v49 = vand.u32 7, %v9422_v5 }
 0x147   : > { %8266 = vmatprep.subr.bf16.mxu1 %v1188_v57  ;;  %12315 = vst [vmem:[#allocation30_spill] sm:$0xff] %v9442_v55  ;;  %vm1674_vm8 = vmpackc.low %vm9479_vm4, %vm9479_vm4  ;;  %v12333_v52 = vand.u32 7, %v9442_v55  ;;  %v1681_v35 = vsel %vm1673_vm3, 65537, %v12329_v47 }
 0x148   : > { %8267 = vmatpush3.bf16.msra.mxu1 %v1188_v57  ;;  %v1055_v57 = vadd.f32 %v7675_v48, %v1054_v39  ;;  %v12179_v39 = vand.u32 7, %v9432_v51  ;;  %vm9595_vm3 = vcmp.ne.s32.totalorder %v12342_v49, 7 }
 0x149   : > { %9034 = vmatprep.subr.msk.bf16.mxu1 %vm12177_vm1, %v7695_v62  ;;  %v1058_v62 = vadd.f32 %v7675_v48, %v1057_v41  ;;  %vm9520_vm12 = vcmp.ne.s32.totalorder %v12333_v52, 0 }
 0x14a   : > { %v1093_v50 = vmul.f32 0.1, %v1055_v57  ;;  %vm1085_vm2 = vcmp.ge.f32.partialorder %v1055_v57, 0.0  ;;  %vm9489_vm7 = vcmp.ne.s32.totalorder %v12179_v39, 0  ;;  %v1367_v39 = vsel %vm1359_vm13, 65537, %v12329_v47  ;;  %vm1364_vm0 = vmpackc.low %vm9520_vm12, %vm9520_vm12 }
 0x14b   : > { %8269 = vmatmul.mubr.msk.bf16.vlgmr.msra.gmra.mrb[44].mxu1 %vm1127_vm5, %v9066_v58  ;;  %v9449_v58 = vadd.s32 56, %v9413_v2  ;;  %v1094_v61 = vmul.f32 0.1, %v1058_v62  ;;  %vm1362_vm13 = vmpackc.low %vm9489_vm7, %vm9489_vm7  ;;  %v9542_v32 = vcombine.low %v1366_v38, %v1367_v39  ;;  %v1372_v45 = vsel %vm1364_vm0, 65537, %v12329_v47 }
 0x14c   : > { %8272 = vmatprep.mubr.msk.bf16.mxu1 %vm1127_vm5, %v9067_v59  ;;  %8277 = vmatpush3.bf16.msra.mxu1 %v1464_v63  ;;  %v12330_v63 = vand.u32 7, %v9439_v53  ;;  %v1101_v33 = vsel %vm1085_vm2, %v1055_v57, %v1093_v50  ;;  %v9548_v59 = vadd.f32 %v7675_v48, %v9365_v43  ;;  %v1099_v50 = vmul.f32 0.1, %v1079_v36  ;;  %vm1676_vm7 = vmpackc.low %vm9595_vm3, %vm9595_vm3 }
 0x14d   : > { %9035 = vmatprep.subr.msk.bf16.mxu1 %vm12177_vm1, %v9409_v0  ;;  %12318 = vst [vmem:[#allocation31_spill] sm:$0xff] %v9449_v58  ;;  %vm1086_vm1 = vcmp.ge.f32.partialorder %v1058_v62, 0.0  ;;  %v12336_v42 = vand.u32 7, %v9449_v58  ;;  %v9558_v57 = vadd.f32 %v9367_v44, %v7675_v48  ;;  %v1682_v43 = vsel %vm1674_vm8, 65537, %v12329_v47 }
 0x14e   : > { %v1102_v31 = vsel %vm1086_vm1, %v1058_v62, %v1094_v61  ;;  %v1370_v34 = vsel %vm1362_vm13, 65537, %v12329_v47  ;;  %v12186_v61 = vshrl.u32 %v9542_v32, 16  ;;  %vm1089_vm15 = vcmp.ge.f32.partialorder %v9548_v59, 0.0 }
 0x14f   : > { %vm9533_vm9 = vcmp.ne.s32.totalorder %v12336_v42, 0  ;;  %v9605_v38 = vcombine.low %v1681_v35, %v1682_v43  ;;  %vm1092_vm4 = vcmp.ge.f32.partialorder %v9558_v57, 0.0  ;;  %v12345_v35 = vand.u32 7, %v9432_v51 }
 0x150   : > { %vm1365_vm2 = vmpackc.low %vm9533_vm9, %vm9533_vm9  ;;  %vm1386_vm0 = vsmask.f32 3328 }
 0x151   : > { %v1373_v39 = vsel %vm1365_vm2, 65537, %v12329_v47  ;;  %vm12359_vm2 = vcmask 64512  }
 0x152   : > { %v9617_v1 = vcombine.low %v1372_v45, %v1373_v39  ;;  %vm12362_vm3 = vmmov %vm12359_vm2 }
 0x153   : > { %8273 = vmatmul.mubr.msk.bf16.gmra.mrb[48].mxu1 %vm1127_vm5, %v9068_v60  ;;  %v1066_v60 = vadd.f32 %v8255_v40, %v7675_v48  ;;  %v1095_v40 = vmul.f32 0.1, %v1063_v54  ;;  %vm1361_vm5 = vmpackc.low %vm9459_vm11, %vm9459_vm11  ;;  %vm9510_vm11 = vcmp.ne.s32.totalorder %v12330_v63, 0  ;;  %v12339_v48 = vand.u32 7, %v9419_v4 }
 0x154   : > { %v1369_v63 = vsel %vm1361_vm5, 65537, %v12329_v47  ;;  %vm1363_vm10 = vmpackc.low %vm9510_vm11, %vm9510_vm11  ;;  %vm9624_vm11 = vcmp.ne.s32.totalorder %v12345_v35, 7  ;;  %v12197_v62 = vshll.u32 %v9617_v1, 16 }
 0x155   : > { %v1096_v46 = vmul.f32 0.1, %v1066_v60  ;;  %vm1088_vm6 = vcmp.ge.f32.partialorder %v1066_v60, 0.0  ;;  %v1103_v52 = vsel %vm1087_vm14, %v1063_v54, %v1095_v40  ;;  %v9555_v54 = vcombine.low %v1368_v56, %v1369_v63  ;;  %vm1677_vm13 = vmpackc.low %vm9624_vm11, %vm9624_vm11 }
 0x156   : > { %vm1091_vm14 = vcmp.ge.f32.partialorder %v1079_v36, 0.0  ;;  %v1371_v44 = vsel %vm1363_vm10, 65537, %v12329_v47  ;;  %vm9589_vm1 = vcmp.ne.s32.totalorder %v12339_v48, 7  ;;  %v12188_v40 = vshll.u32 %v9542_v32, 16  ;;  %vm12365_vm11 = vmmov %vm12359_vm2 }
 0x157   : > { %v1104_v42 = vsel %vm1088_vm6, %v1066_v60, %v1096_v46  ;;  %v12187_v41 = vshrl.u32 %v9555_v54, 16  ;;  %v1097_v46 = vmul.f32 0.1, %v9548_v59  ;;  %v9607_v56 = vcombine.low %v1370_v34, %v1371_v44  ;;  %vm1675_vm5 = vmpackc.low %vm9589_vm1, %vm9589_vm1 }
 0x158   : > { %v1100_v63 = vmul.f32 0.1, %v9558_v57  ;;  %v1098_v48 = vmul.f32 0.1, %v9561_v37  ;;  %v1107_v49 = vsel %vm1091_vm14, %v1079_v36, %v1099_v50  ;;  %vm1090_vm6 = vcmp.ge.f32.partialorder %v9561_v37, 0.0 }
 0x159   : > { %v12348_v36 = vand.u32 7, %v9439_v53  ;;  %v1390_v44 = vrot.slane %v12186_v61, 4  ;;  %v1393_v45 = vrot.slane %v12188_v40, 5  ;;  %v1398_v39 = vrot.slane %v12187_v41, 4 }
 0x15a   : > { %v12351_v35 = vshll.u32 %v9555_v54, 16  ;;  %v12192_v53 = vshrl.u32 %v9607_v56, 16  ;;  %v1683_v41 = vsel %vm1675_vm5, 65537, %v12329_v47  ;;  %v12355_v40 = vand.u32 7, %v9449_v58 }
 0x15b   : > { %vm9630_vm8 = vcmp.ne.s32.totalorder %v12348_v36, 7  ;;  %v12191_v61 = vshrl.u32 %v9617_v1, 16  ;;  %v9672_v30 = vor.u32 %v1393_v45, %v1390_v44  ;;  %v1419_v45 = vrot.slane %v12197_v62, 5 }
 0x15c   : > { %v1401_v51 = vrot.slane %v12351_v35, 5  ;;  %vm9666_vm9 = vcmp.ne.s32.totalorder %v12355_v40, 7  ;;  %v12358_v40 = vshll.u32 %v9607_v56, 16  ;;  %vm1678_vm10 = vmpackc.low %vm9630_vm8, %vm9630_vm8  ;;  %v12379_v21 = vshrl.u32 %v9555_v54, 16 }
 0x15d   : > { %vm1680_vm1 = vmpackc.low %vm9666_vm9, %vm9666_vm9 }
 0x21e   : > { %v8270_v34 = vpop.f32.mrb[44].mxu1 }
 0x21f   : > { %v1288_v4 = vadd.f32 %v8270_v34, %v1103_v52  ;;  %v1255_v2 = vpop.f32.mrb[45].mxu1  ;;  %v1684_v52 = vsel %vm1676_vm7, 65537, %v12329_v47  ;;  %vm12364_vm7 = vmmov %vm12359_vm2 }
 0x220   : > { %v1286_v5 = vadd.f32 %v1255_v2, %v1101_v33  ;;  %v8271_v29 = vpop.f32.mrb[46].mxu1  ;;  %v12352_v33 = vand.u32 7, %v9442_v55  ;;  %v1410_v55 = vrot.slane %v12358_v40, 5  ;;  %v9681_v58 = vcombine.low %v1683_v41, %v1684_v52  ;;  %v1433_v52 = vld [vmem:[#allocation3] sm:$0xf0] }
 0x221   : > { %v1289_v34 = vadd.f32 %v8271_v29, %v1104_v42  ;;  %v1258_v35 = vpop.f32.mrb[47].mxu1  ;;  %v1402_v29 = vor.u32 %v1401_v51, %v1398_v39  ;;  %v1105_v51 = vsel %vm1089_vm15, %v9548_v59, %v1097_v46  ;;  %v1106_v41 = vsel %vm1090_vm6, %v9561_v37, %v1098_v48 }
 0x222   : > { %vm9660_vm12 = vcmp.ne.s32.totalorder %v12352_v33, 7  ;;  %v1287_v36 = vadd.f32 %v1258_v35, %v1102_v31  ;;  %v1407_v33 = vrot.slane %v12192_v53, 4  ;;  %v12361_v59 = vshll.u32 %v9605_v38, 16 }
 0x223   : > { %v1297_v42 = vpack.c.bf16 %v1289_v34, %v1288_v4  ;;  %v1108_v4 = vsel %vm1092_vm4, %v9558_v57, %v1100_v63  ;;  %vm1679_vm14 = vmpackc.low %vm9660_vm12, %vm9660_vm12  ;;  %v1416_v57 = vrot.slane %v12191_v61, 4  ;;  %vm1422_vm15 = vcmp.ne.s16.totalorder %v9672_v30, 0  ;;  %v1337_v34 = vld [vmem:[#allocation3] sm:$0xf8] }
 0x224   : > { %v1296_v31 = vpack.c.bf16 %v1287_v36, %v1286_v5  ;;  %v12360_v5 = vshrl.u32 %v9605_v38, 16  ;;  %v1707_v46 = vrot.slane %v12361_v59, 4  ;;  %v1685_v37 = vsel %vm1677_vm13, 65537, %v12329_v47  ;;  %vm12368_vm13 = vmmov %vm12359_vm2 }
 0x225   : > { %1301 = vst.msk [vmem:[#allocation3 + $0x10] sm:$0xff] %vm12359_vm2, %v1297_v42  ;;  %v1686_v48 = vsel %vm1678_vm10, 65537, %v12329_v47  ;;  %v9726_v35 = vsel %vm1386_vm0, %v9672_v30, %v1402_v29  ;;  %v1411_v42 = vor.u32 %v1410_v55, %v1407_v33  ;;  %v12194_v43 = vshrl.u32 %v9681_v58, 16 }
 0x226   : > { %v1704_v44 = vrot.slane %v12360_v5, 3  ;;  %1300 = vst.msk [vmem:[#allocation3 + $0x8] sm:$0xff] %vm12362_vm3, %v1296_v31  ;;  %v8274_v63 = vpop.f32.mrb[48].mxu1  ;;  %v12193_v5 = vshll.u32 %v9681_v58, 16  ;;  %v1688_v55 = vsel %vm1680_vm1, 65537, %v12329_v47  ;;  %v9744_v59 = vcombine.low %v1685_v37, %v1686_v48 }
 0x227   : > { %v1292_v39 = vadd.f32 %v8274_v63, %v1107_v49  ;;  %v1271_v36 = vpop.f32.mrb[49].mxu1  ;;  %v1687_v49 = vsel %vm1679_vm14, 65537, %v12329_v47  ;;  %vm1531_vm4 = vsmask.f32 4352  ;;  %v9746_v61 = vor.u32 %v1419_v45, %v1416_v57  ;;  %vm12369_vm14 = vmmov %vm12359_vm2 }
 0x228   : > { %v1290_v40 = vadd.f32 %v1271_v36, %v1105_v51  ;;  %v8275_v31 = vpop.f32.mrb[50].mxu1  ;;  %v9742_v51 = vor.u32 %v1707_v46, %v1704_v44  ;;  %v1442_v36 = vrot.slane %v1433_v52, 4  ;;  %v1427_v2 = vsel %vm1422_vm15, %v1337_v34, 0 }
 0x229   : > { %v1293_v50 = vadd.f32 %v8275_v31, %v1108_v4  ;;  %v1274_v33 = vpop.f32.mrb[51].mxu1  ;;  %vm1423_vm5 = vcmp.ne.s16.totalorder %v9726_v35, 0  ;;  %v9752_v60 = vsel %vm1386_vm0, %v1402_v29, %v1411_v42  ;;  %v9754_v4 = vcombine.low %v1687_v49, %v1688_v55 }
 0x22a   : > { %v1291_v63 = vadd.f32 %v1274_v33, %v1106_v41  ;;  %vm12363_vm6 = vcmask 1043456   ;;  %v1712_v57 = vrot.slane %v12194_v43, 3  ;;  %v1715_v45 = vrot.slane %v12193_v5, 4 }
 0x22b   : > { %v1299_v53 = vpack.c.bf16 %v1293_v50, %v1292_v39  ;;  %v1589_v41 = vsel %vm12363_vm6, %v9409_v0, 0  ;;  %v1533_v48 = vshrl.u32 %v1427_v2, 16  ;;  %v12196_v39 = vshrl.u32 %v9744_v59, 16  ;;  %vm12366_vm12 = vmmov %vm12363_vm6 }
 0x22c   : > { %v1298_v44 = vpack.c.bf16 %v1291_v63, %v1290_v40  ;;  %v9756_v46 = vld [vmem:[#allocation3 + $0x10] sm:$0xff]  ;;  %v12195_v34 = vshll.u32 %v9744_v59, 16  ;;  %v1536_v31 = vshll.u32 %v1427_v2, 16  ;;  %vm1424_vm8 = vcmp.ne.s16.totalorder %v9752_v60, 0  ;;  %vm12367_vm9 = vmmov %vm12363_vm6 }
 0x22d   : > { %1303 = vst.msk [vmem:[#allocation3 + $0x20] sm:$0xff] %vm12364_vm7, %v1299_v53  ;;  %v9765_v37 = vld [vmem:[#allocation3 + $0x8] sm:$0xff]  ;;  %v9768_v29 = vrot.slane %v9756_v46, 4  ;;  %v12198_v55 = vshrl.u32 %v9754_v4, 16  ;;  %v12199_v50 = vshll.u32 %v9754_v4, 16  ;;  %v1716_v5 = vor.u32 %v1715_v45, %v1712_v57  ;;  %vm12370_vm1 = vmmov %vm12363_vm6 }
 0x22e   : > { %1302 = vst.msk [vmem:[#allocation3 + $0x18] sm:$0xff] %vm12365_vm11, %v1298_v44  ;;  %v1443_v0 = vrot.slane %v9765_v37, 4  ;;  %v1428_v40 = vsel %vm1423_vm5, %v9765_v37, 0  ;;  %v9785_v44 = vsel %vm1386_vm0, %v1411_v42, %v9746_v61  ;;  %vm12201_vm10 = vcmp.ne.s16.totalorder %v9742_v51, 0  ;;  %vm12371_vm6 = vmmov %vm12370_vm1 }
 0x22f   : > { %v1541_v53 = vshrl.u32 %v1428_v40, 16  ;;  %v1544_v49 = vshll.u32 %v1428_v40, 16  ;;  %v1535_v2 = vrot.slane %v1533_v48, 3  ;;  %v7708_v40 = vld [vmem:[%s12166_s11 + $0x8] sm:$0xf]  ;;  %v1538_v42 = vrot.slane %v1536_v31, 4  ;;  %vm12372_vm7 = vmmov %vm12370_vm1 }
 0x230   : > { %v1444_v33 = vsel %vm12366_vm12, %v1442_v36, %v1443_v0  ;;  %v1446_v63 = vsel %vm12367_vm9, %v1443_v0, %v9768_v29  ;;  %v1721_v36 = vrot.slane %v12196_v39, 3  ;;  %v1724_v0 = vrot.slane %v12195_v34, 4  ;;  %vm12374_vm12 = vmmov %vm12368_vm13 }
 0x231   : > { %8278 = vmatprep.mubr.msk.bf16.mxu1 %vm12368_vm13, %v1444_v33  ;;  %v1543_v43 = vrot.slane %v1541_v53, 3  ;;  %v1546_v57 = vrot.slane %v1544_v49, 4  ;;  %v1429_v45 = vsel %vm1424_vm8, %v9756_v46, 0  ;;  %vm1425_vm2 = vcmp.ne.s16.totalorder %v9785_v44, 0  ;;  %vm12375_vm9 = vmmov %vm12374_vm12 }
 0x232   : > { %8279 = vmatmul.mubr.msk.bf16.vlgmr.msra.gmra.mrb[52].mxu1 %vm12369_vm14, %v1446_v63  ;;  %v1730_v48 = vrot.slane %v12198_v55, 3  ;;  %v1733_v33 = vrot.slane %v12199_v50, 4  ;;  %v1741_v34 = vsel %vm12201_vm10, %v1433_v52, 0  ;;  %v9810_v31 = vsel %vm1531_vm4, %v9742_v51, %v1716_v5  ;;  %vm12376_vm13 = vmmov %vm12375_vm9 }
 0x233   : > { %8287 = vmatpush3.bf16.msra.mxu1 %v1589_v41  ;;  %v1550_v49 = vshrl.u32 %v1429_v45, 16  ;;  %v1553_v39 = vshll.u32 %v1429_v45, 16  ;;  %v1725_v62 = vor.u32 %v1724_v0, %v1721_v36  ;;  %v1539_v50 = vor.u32 %v1538_v42, %v1535_v2 }
 0x234   : > { %v1341_v63 = vld [vmem:[#allocation3 + $0x20] sm:$0xf]  ;;  %9036 = vmatprep.subr.msk.bf16.mxu1 %vm12370_vm1, %v7708_v40  ;;  %v1547_v28 = vor.u32 %v1546_v57, %v1543_v43  ;;  %vm1426_vm3 = vcmp.ne.s16.totalorder %v9746_v61, 0  ;;  %v9821_v25 = vor.u32 %v1733_v33, %v1730_v48  ;;  %vm1737_vm11 = vcmp.ne.s16.totalorder %v9810_v31, 0  ;;  %v2414_v61 = vld [vmem:[#allocation3 + $0x8] sm:$0xf0] }
 0x235   : > { %v9812_v53 = vld [vmem:[#allocation3 + $0x18] sm:$0xff]  ;;  %v1449_v41 = vrot.slane %v1341_v63, 4  ;;  %v12373_v43 = vshll.u32 %v9542_v32, 16  ;;  %v1552_v0 = vrot.slane %v1550_v49, 3  ;;  %v1555_v42 = vrot.slane %v1553_v39, 4 }
 0x236   : > { %v9815_v55 = vrot.slane %v9812_v53, 4  ;;  %v1430_v52 = vsel %vm1425_vm2, %v9812_v53, 0  ;;  %v1749_v57 = vshrl.u32 %v1741_v34, 16  ;;  %v9836_v48 = vsel %vm1531_vm4, %v1716_v5, %v1725_v62 }
 0x237   : > { %v1559_v27 = vshrl.u32 %v1430_v52, 16  ;;  %v1562_v26 = vshll.u32 %v1430_v52, 16  ;;  %v1883_v2 = vrot.slane %v12373_v43, 1  ;;  %v1431_v33 = vsel %vm1426_vm3, %v1341_v63, 0 }
 0x238   : > { %v9826_v45 = vsel %vm12371_vm6, %v9768_v29, %v9815_v55  ;;  %v1450_v36 = vsel %vm12372_vm7, %v9815_v55, %v1449_v41  ;;  %v1548_v41 = vsel %vm1531_vm4, %v1539_v50, %v1547_v28  ;;  %v1742_v49 = vsel %vm1737_vm11, %v9765_v37, 0 }
 0x239   : > { %8282 = vmatprep.mubr.msk.bf16.mxu1 %vm12374_vm12, %v9826_v45  ;;  %v1561_v52 = vrot.slane %v1559_v27, 3  ;;  %v1564_v3 = vrot.slane %v1562_v26, 4  ;;  %v1752_v39 = vshll.u32 %v1741_v34, 16  ;;  %v9848_v5 = vsel %vm1531_vm4, %v1725_v62, %v9821_v25 }
 0x23a   : > { %8283 = vmatmul.mubr.msk.bf16.gmra.mrb[56].mxu1 %vm12375_vm9, %v1450_v36  ;;  %v12377_v43 = vshll.u32 %v9555_v54, 16  ;;  %vm1882_vm14 = vsmask.f32 7424  ;;  %v12378_v36 = vshrl.u32 %v9542_v32, 16  ;;  %v1556_v27 = vor.u32 %v1555_v42, %v1552_v0  ;;  %v1880_v0 = vld [vmem:[#allocation3] sm:$0x80] }
 0x23b   : > { %8288 = vmatprep.mubr.msk.bf16.mxu1 %vm12376_vm13, %v1548_v41  ;;  %v1568_v26 = vshrl.u32 %v1431_v33, 16  ;;  %v1571_v24 = vshll.u32 %v1431_v33, 16  ;;  %vm1738_vm1 = vcmp.ne.s16.totalorder %v9836_v48, 0  ;;  %v1565_v41 = vor.u32 %v1564_v3, %v1561_v52  ;;  %vm12381_vm13 = vmmov %vm12375_vm9 }
 0x23c   : > { %v1885_v63 = vrot.slane %v12377_v43, 1  ;;  %v1884_v50 = vor.u32 %v1883_v2, %v12378_v36  ;;  %v1757_v23 = vshrl.u32 %v1742_v49, 16  ;;  %v1760_v22 = vshll.u32 %v1742_v49, 16 }
 0x23d   : > { %vm1739_vm6 = vcmp.ne.s16.totalorder %v9848_v5, 0  ;;  %v1751_v34 = vrot.slane %v1749_v57, 4  ;;  %v1754_v62 = vrot.slane %v1752_v39, 5  ;;  %v1805_v43 = vsel %vm12372_vm7, %v7708_v40, 0 }
 0x23e   : > { %v1887_v20 = vor.u32 %v1885_v63, %v12379_v21  ;;  %v1743_v32 = vsel %vm1738_vm1, %v9756_v46, 0  ;;  %v1886_v42 = vsel %vm1882_vm14, %v1884_v50, %v1885_v63  ;;  %vm1894_vm12 = vcmp.ne.s16.totalorder %v1883_v2, 0  ;;  %v7713_v21 = vld [vmem:[%s12166_s11 + $0xc] sm:$0xf] }
 0x23f   : > { %v1557_v3 = vsel %vm1531_vm4, %v1547_v28, %v1556_v27  ;;  %v1570_v33 = vrot.slane %v1568_v26, 3  ;;  %v1573_v52 = vrot.slane %v1571_v24, 4  ;;  %v1744_v57 = vsel %vm1739_vm6, %v9812_v53, 0 }
 0x240   : > { %v1566_v54 = vsel %vm1531_vm4, %v1556_v27, %v1565_v41  ;;  %v1759_v40 = vrot.slane %v1757_v23, 4  ;;  %v1762_v49 = vrot.slane %v1760_v22, 5  ;;  %v12380_v39 = vshll.u32 %v9607_v56, 16  ;;  %v1656_v27 = vld [vmem:[#allocation3 + $0x20] sm:$0x1f] }
 0x241   : > { %v1766_v24 = vshrl.u32 %v1743_v32, 16  ;;  %v1769_v28 = vshll.u32 %v1743_v32, 16  ;;  %v1775_v36 = vshrl.u32 %v1744_v57, 16  ;;  %v1778_v50 = vshll.u32 %v1744_v57, 16 }
 0x242   : > { %8289 = vmatmul.mubr.msk.bf16.vlgmr.msra.gmra.mrb[52].mxu1 %vm12375_vm9, %v1557_v3  ;;  %v1888_v63 = vrot.slane %v12380_v39, 1  ;;  %vm1895_vm10 = vcmp.ne.s16.totalorder %v1886_v42, 0  ;;  %v9877_v26 = vsel %vm1894_vm12, %v1880_v0, 0  ;;  %v1574_v3 = vor.u32 %v1573_v52, %v1570_v33 }
 0x243   : > { %8292 = vmatprep.mubr.msk.bf16.mxu1 %vm12381_vm13, %v1566_v54  ;;  %8297 = vmatpush3.bf16.msra.mxu1 %v1805_v43  ;;  %vm1740_vm9 = vcmp.ne.s16.totalorder %v9821_v25, 0  ;;  %v12382_v22 = vshll.u32 %v9617_v1, 16  ;;  %v1755_v39 = vor.u32 %v1754_v62, %v1751_v34  ;;  %v1763_v54 = vor.u32 %v1762_v49, %v1759_v40  ;;  %v9069_v25 = vld [vmem:[%s12168_s13] sm:$0xff]  }
 0x244   : > { %9037 = vmatprep.subr.msk.bf16.mxu1 %vm12372_vm7, %v7713_v21  ;;  %v1889_v43 = vsel %vm1882_vm14, %v1887_v20, %v1888_v63  ;;  %v12383_v32 = vshrl.u32 %v9607_v56, 16  ;;  %v1768_v19 = vrot.slane %v1766_v24, 4  ;;  %v1771_v18 = vrot.slane %v1769_v28, 5 }
 0x245   : > { %v1891_v23 = vrot.slane %v12382_v22, 1  ;;  %v9886_v2 = vsel %vm1895_vm10, %v9765_v37, 0  ;;  %v1908_v0 = vshrl.u32 %v9877_v26, 16  ;;  %v1777_v42 = vrot.slane %v1775_v36, 4  ;;  %v9891_v22 = vld [vmem:[#allocation3 + $0x20] sm:$0xff]  ;;  %vm12385_vm10 = vmmov %vm12381_vm13 }
 0x246   : > { %v1890_v57 = vor.u32 %v1888_v63, %v12383_v32  ;;  %v1780_v33 = vrot.slane %v1778_v50, 5  ;;  %v1745_v52 = vsel %vm1740_vm9, %v1656_v27, 0  ;;  %v2276_v20 = vsel %vm1423_vm5, %v9756_v46, 0  ;;  %vm12386_vm13 = vmmov %vm12385_vm10 }
 0x247   : > { %v1575_v56 = vsel %vm1531_vm4, %v1565_v41, %v1574_v3  ;;  %vm1896_vm12 = vcmp.ne.s16.totalorder %v1889_v43, 0  ;;  %v12384_v34 = vshrl.u32 %v9617_v1, 16  ;;  %v2291_v40 = vshrl.u32 %v2276_v20, 16  ;;  %vm12387_vm5 = vmmov %vm12372_vm7 }
 0x248   : > { %v1764_v49 = vsel %vm1386_vm0, %v1755_v39, %v1763_v54  ;;  %v1912_v63 = vshrl.u32 %v9886_v2, 16  ;;  %v1892_v24 = vsel %vm1882_vm14, %v1890_v57, %v1891_v23  ;;  %v2294_v28 = vshll.u32 %v2276_v20, 16 }
 0x249   : > { %v9899_v62 = vor.u32 %v1891_v23, %v12384_v34  ;;  %v1772_v35 = vor.u32 %v1771_v18, %v1768_v19  ;;  %v1784_v36 = vshrl.u32 %v1745_v52, 16  ;;  %v2277_v1 = vsel %vm1424_vm8, %v9812_v53, 0  ;;  %vm12388_vm8 = vmmov %vm12385_vm10 }
 0x24a   : > { %8293 = vmatmul.mubr.msk.bf16.gmra.mrb[56].mxu1 %vm12385_vm10, %v1575_v56  ;;  %v2278_v41 = vsel %vm1425_vm2, %v9891_v22, 0  ;;  %v1781_v50 = vor.u32 %v1780_v33, %v1777_v42  ;;  %v1787_v3 = vshll.u32 %v1745_v52, 16  ;;  %v2293_v27 = vrot.slane %v2291_v40, 3  ;;  %vm12389_vm2 = vmmov %vm12388_vm8 }
 0x24b   : > { %8298 = vmatprep.mubr.msk.bf16.mxu1 %vm12386_vm13, %v1764_v49  ;;  %v2300_v39 = vshrl.u32 %v2277_v1, 16  ;;  %v2296_v32 = vrot.slane %v2294_v28, 4  ;;  %v2303_v56 = vshll.u32 %v2277_v1, 16  ;;  %v2309_v23 = vshrl.u32 %v2278_v41, 16  ;;  %vm12392_vm10 = vmmov %vm12389_vm2 }
 0x24c   : > { %v2312_v57 = vshll.u32 %v2278_v41, 16  ;;  %v1956_v20 = vsel %vm12387_vm5, %v7713_v21, 0  ;;  %v1901_v18 = vsel %vm1896_vm12, %v9756_v46, 0  ;;  %vm1897_vm7 = vcmp.ne.s16.totalorder %v1892_v24, 0  ;;  %v7718_v21 = vld [vmem:[%s12166_s11 + $0x10] sm:$0xf]  ;;  %vm12391_vm12 = vmmov %vm12389_vm2 }
 0x24d   : > { %v2302_v19 = vrot.slane %v2300_v39, 3  ;;  %v1773_v60 = vsel %vm1386_vm0, %v1763_v54, %v1772_v35  ;;  %v2305_v34 = vrot.slane %v2303_v56, 4  ;;  %v2311_v44 = vrot.slane %v2309_v23, 3  ;;  %vm12393_vm13 = vmmov %vm12387_vm5 }
 0x24e   : > { %v2314_v49 = vrot.slane %v2312_v57, 4  ;;  %v1786_v42 = vrot.slane %v1784_v36, 4  ;;  %v1789_v33 = vrot.slane %v1787_v3, 5  ;;  %v1914_v52 = vrot.slane %v1912_v63, 7 }
 0x24f   : > { %v2521_v40 = vsel %vm1737_vm11, %v9756_v46, 0  ;;  %v1782_v28 = vsel %vm1386_vm0, %v1772_v35, %v1781_v50  ;;  %v9923_v43 = vor.u32 %v2296_v32, %v2293_v27  ;;  %v2306_v1 = vor.u32 %v2305_v34, %v2302_v19  ;;  %vm12390_vm11 = vmmov %vm12387_vm5 }
 0x250   : > { %v9925_v54 = vor.u32 %v2314_v49, %v2311_v44  ;;  %v2536_v36 = vshrl.u32 %v2521_v40, 16  ;;  %v2539_v41 = vshll.u32 %v2521_v40, 16  ;;  %v2522_v31 = vsel %vm1738_vm1, %v9812_v53, 0  ;;  %vm12395_vm5 = vmmov %vm12389_vm2 }
 0x251   : > { %v2523_v63 = vsel %vm1739_vm6, %v9891_v22, 0  ;;  %v1915_v35 = vshll.u32 %v9886_v2, 16  ;;  %v1902_v3 = vsel %vm1897_vm7, %v9812_v53, 0  ;;  %v9940_v27 = vsel %vm1531_vm4, %v9923_v43, %v2306_v1  ;;  %vm12396_vm7 = vmmov %vm12389_vm2 }
 0x252   : > { %8299 = vmatmul.mubr.msk.bf16.vlgmr.msra.gmra.mrb[52].mxu1 %vm12388_vm8, %v1773_v60  ;;  %v9944_v48 = vsel %vm1531_vm4, %v2306_v1, %v9925_v54  ;;  %v1790_v39 = vor.u32 %v1789_v33, %v1786_v42  ;;  %v1920_v32 = vshrl.u32 %v1901_v18, 16  ;;  %v2538_v5 = vrot.slane %v2536_v36, 4  ;;  %vm12398_vm8 = vmmov %vm12390_vm11 }
 0x253   : > { %8302 = vmatprep.mubr.msk.bf16.mxu1 %vm12389_vm2, %v1782_v28  ;;  %8307 = vmatpush3.bf16.msra.mxu1 %v1956_v20  ;;  %v2545_v56 = vshrl.u32 %v2522_v31, 16  ;;  %v2541_v23 = vrot.slane %v2539_v41, 5  ;;  %v2548_v57 = vshll.u32 %v2522_v31, 16  ;;  %v2554_v2 = vshrl.u32 %v2523_v63, 16 }
 0x254   : > { %9038 = vmatprep.subr.msk.bf16.mxu1 %vm12390_vm11, %v7718_v21  ;;  %v2557_v20 = vshll.u32 %v2523_v63, 16  ;;  %v1910_v24 = vrot.slane %v1908_v0, 7  ;;  %v1917_v19 = vor.u32 %v1915_v35, %v1914_v52  ;;  %v1928_v60 = vshrl.u32 %v1902_v3, 16  ;;  %vm12403_vm11 = vmmov %vm12395_vm5 }
 0x255   : > { %v2547_v34 = vrot.slane %v2545_v56, 4  ;;  %vm1898_vm1 = vcmp.ne.s16.totalorder %v9899_v62, 0  ;;  %v2550_v44 = vrot.slane %v2548_v57, 5  ;;  %v2556_v49 = vrot.slane %v2554_v2, 4  ;;  %v7723_v2 = vld [vmem:[%s12166_s11 + $0x14] sm:$0xf] }
 0x256   : > { %v2559_v42 = vrot.slane %v2557_v20, 5  ;;  %vm1906_vm6 = vsmask.f32 256  ;;  %v1922_v33 = vrot.slane %v1920_v32, 7  ;;  %v1791_v40 = vsel %vm1386_vm0, %v1781_v50, %v1790_v39 }
 0x257   : > { %v9951_v28 = vor.u32 %v2541_v23, %v2538_v5  ;;  %v2551_v1 = vor.u32 %v2550_v44, %v2547_v34  ;;  %v1918_v26 = vsel %vm1906_vm6, %v1910_v24, %v1917_v19  ;;  %v1930_v0 = vrot.slane %v1928_v60, 7 }
 0x258   : > { %v9953_v36 = vor.u32 %v2559_v42, %v2556_v49  ;;  %v1903_v41 = vsel %vm1898_vm1, %v9891_v22, 0  ;;  %v1923_v62 = vshll.u32 %v1901_v18, 16  ;;  %v1931_v63 = vshll.u32 %v1902_v3, 16  ;;  %vm12404_vm1 = vmmov %vm12395_vm5 }
 0x259   : > { %v9961_v31 = vsel %vm1386_vm0, %v9951_v28, %v2551_v1  ;;  %v1936_v39 = vshrl.u32 %v1903_v41, 16  ;;  %v2046_v5 = vsel %vm12393_vm13, %v7718_v21, 0  ;;  %v12394_v56 = vshrl.u32 %v9605_v38, 16 }
 0x25a   : > { %8303 = vmatmul.mubr.msk.bf16.gmra.mrb[56].mxu1 %vm12391_vm12, %v1791_v40  ;;  %v9965_v50 = vsel %vm1386_vm0, %v2551_v1, %v9953_v36  ;;  %v1925_v35 = vor.u32 %v1923_v62, %v1922_v33  ;;  %v1933_v32 = vor.u32 %v1931_v63, %v1930_v0  ;;  %v1939_v3 = vshll.u32 %v1903_v41, 16 }
 0x25b   : > { %8308 = vmatprep.mubr.msk.bf16.mxu1 %vm12392_vm10, %v1918_v26  ;;  %v2126_v23 = vrot.slane %v12394_v56, 7  ;;  %v1938_v18 = vrot.slane %v1936_v39, 7  ;;  %v12397_v21 = vshrl.u32 %v9681_v58, 16  ;;  %v12400_v34 = vshrl.u32 %v9744_v59, 16  ;;  %vm12407_vm10 = vmmov %vm12398_vm8 }
 0x25c   : > { %v1926_v57 = vsel %vm1906_vm6, %v1914_v52, %v1925_v35  ;;  %v1934_v20 = vsel %vm1906_vm6, %v1922_v33, %v1933_v32  ;;  %v12399_v52 = vshll.u32 %v9605_v38, 16  ;;  %v12401_v49 = vshll.u32 %v9681_v58, 16  ;;  %v7728_v32 = vld [vmem:[%s12166_s11 + $0x18] sm:$0xf] }
 0x25d   : > { %v2128_v24 = vrot.slane %v12397_v21, 7  ;;  %v1941_v60 = vor.u32 %v1939_v3, %v1938_v18  ;;  %v2131_v44 = vrot.slane %v12400_v34, 7  ;;  %v12402_v40 = vshll.u32 %v9744_v59, 16 }
 0x25e   : > { %v2127_v19 = vor.u32 %v2126_v23, %v12399_v52  ;;  %v12405_v41 = vshrl.u32 %v9754_v4, 16  ;;  %v2198_v35 = vsel %vm12407_vm10, %v7723_v2, 0  ;;  %vm12412_vm10 = vmmov %vm12404_vm1 }
 0x25f   : > { %v2129_v42 = vor.u32 %v2128_v24, %v12401_v49  ;;  %v1942_v33 = vsel %vm1906_vm6, %v1930_v0, %v1941_v60  ;;  %v2132_v1 = vor.u32 %v2131_v44, %v12402_v40  ;;  %v12406_v0 = vshll.u32 %v9754_v4, 16 }
 0x260   : > { %vm2137_vm2 = vcmp.ne.s16.totalorder %v2127_v19, 0  ;;  %v2134_v62 = vrot.slane %v12405_v41, 7  ;;  %v7733_v41 = vld [vmem:[%s12166_s11 + $0x1c] sm:$0xf] }
 0x261   : > { %v2130_v38 = vsel %vm1906_vm6, %v2126_v23, %v2129_v42  ;;  %v2142_v26 = vsel %vm2137_vm2, %v9765_v37, 0  ;;  %v2133_v58 = vsel %vm1906_vm6, %v2128_v24, %v2132_v1 }
 0x262   : > { %8309 = vmatmul.mubr.msk.bf16.vlgmr.msra.gmra.mrb[52].mxu1 %vm12395_vm5, %v1926_v57  ;;  %vm2138_vm12 = vcmp.ne.s16.totalorder %v2130_v38, 0  ;;  %v2152_v63 = vshll.u32 %v2142_v26, 16  ;;  %v2135_v59 = vor.u32 %v2134_v62, %v12406_v0  ;;  %vm2139_vm13 = vcmp.ne.s16.totalorder %v2133_v58, 0  ;;  %vm12408_vm5 = vmmov %vm12404_vm1 }
 0x263   : > { %8312 = vmatprep.mubr.msk.bf16.mxu1 %vm12396_vm7, %v1934_v20  ;;  %8317 = vmatpush3.bf16.msra.mxu1 %v2046_v5  ;;  %v2143_v39 = vsel %vm2138_vm12, %v9756_v46, 0  ;;  %vm12409_vm7 = vmmov %vm12404_vm1  ;;  %v2144_v4 = vsel %vm2139_vm13, %v9812_v53, 0  ;;  %v2150_v56 = vshrl.u32 %v2142_v26, 16  ;;  %v2273_v20 = vld [vmem:[#allocation3 + $0x8] sm:$0xf8] }
 0x264   : > { %9039 = vmatprep.subr.msk.bf16.mxu1 %vm12398_vm8, %v7723_v2  ;;  %v2136_v5 = vsel %vm1906_vm6, %v2131_v44, %v2135_v59  ;;  %v2157_v23 = vshll.u32 %v2143_v39, 16  ;;  %v2165_v18 = vshll.u32 %v2144_v4, 16  ;;  %vm2141_vm6 = vcmp.ne.s16.totalorder %v2134_v62, 0  ;;  %vm12411_vm12 = vmmov %vm12398_vm8 }
 0x265   : > { %vm2140_vm2 = vcmp.ne.s16.totalorder %v2136_v5, 0  ;;  %v2275_v24 = vsel %vm1422_vm15, %v2273_v20, 0  ;;  %v2169_v52 = vshrl.u32 %v2144_v4, 16  ;;  %v2161_v60 = vshrl.u32 %v2143_v39, 16  ;;  %vm12413_vm15 = vmmov %vm12404_vm1  ;;  %v2274_v39 = vld [vmem:[#allocation3 + $0x28] sm:$0xf] }
 0x266   : > { %v2159_v2 = vrot.slane %v2157_v23, 1  ;;  %v2167_v21 = vrot.slane %v2165_v18, 1  ;;  %v2283_v49 = vshrl.u32 %v2275_v24, 16  ;;  %v2286_v42 = vshll.u32 %v2275_v24, 16  ;;  %vm12414_vm13 = vmmov %vm12398_vm8 }
 0x267   : > { %v2339_v1 = vsel %vm12411_vm12, %v7728_v32, 0  ;;  %v2279_v4 = vsel %vm1426_vm3, %v2274_v39, 0  ;;  %v2444_v23 = vsel %vm12398_vm8, %v7733_v41, 0  ;;  %vm12419_vm3 = vmmov %vm12398_vm8  ;;  %v2422_v20 = vrot.slane %v2414_v61, 4 }
 0x268   : > { %v2171_v34 = vor.u32 %v2169_v52, %v2167_v21  ;;  %v2285_v62 = vrot.slane %v2283_v49, 3  ;;  %v2288_v58 = vrot.slane %v2286_v42, 4  ;;  %v2318_v5 = vshrl.u32 %v2279_v4, 16 }
 0x269   : > { %vm12423_vm12 = vcmp.ne.s16.totalorder %v9742_v51, 0 }
 0x26a   : > { %8313 = vmatmul.mubr.msk.bf16.gmra.mrb[56].mxu1 %vm12403_vm11, %v1942_v33  ;;  %vm12410_vm11 = vmmov %vm12404_vm1  ;;  %v2163_v33 = vor.u32 %v2161_v60, %v2159_v2  ;;  %v2519_v60 = vld [vmem:[#allocation3 + $0x28] sm:$0x1f] }
 0x26b   : > { %8318 = vmatprep.mubr.msk.bf16.mxu1 %vm12404_vm1, %v9765_v37  ;;  %v2154_v37 = vrot.slane %v2152_v63, 1 }
 0x26c   : > { %v2168_v38 = vsel %vm1882_vm14, %v2163_v33, %v2167_v21 }
 0x26d   : > { %v2155_v57 = vor.u32 %v2154_v37, %v2150_v56  ;;  %v2321_v56 = vshll.u32 %v2279_v4, 16 }
 0x26f   : > { %v2160_v3 = vsel %vm1882_vm14, %v2155_v57, %v2159_v2  ;;  %v2320_v57 = vrot.slane %v2318_v5, 3  ;;  %v2323_v18 = vrot.slane %v2321_v56, 4  ;;  %v7738_v2 = vld [vmem:[%s12166_s11 + $0x20] sm:$0xf] }
 0x272   : > { %8319 = vmatmul.mubr.msk.bf16.vlgmr.msra.gmra.mrb[52].mxu1 %vm12408_vm5, %v9756_v46  ;;  %v2145_v46 = vsel %vm2140_vm2, %v9891_v22, 0  ;;  %vm12415_vm5 = vmmov %vm12404_vm1 }
 0x273   : > { %8322 = vmatprep.mubr.msk.bf16.mxu1 %vm12409_vm7, %v9812_v53  ;;  %8327 = vmatpush3.bf16.msra.mxu1 %v2198_v35  ;;  %v2125_v53 = vld [vmem:[#allocation3 + $0x28] sm:$0x1]  ;;  %v2173_v19 = vshll.u32 %v2145_v46, 16  ;;  %v2177_v63 = vshrl.u32 %v2145_v46, 16  ;;  %v2289_v35 = vor.u32 %v2288_v58, %v2285_v62  ;;  %vm12416_vm7 = vmmov %vm12404_vm1 }
 0x274   : > { %9040 = vmatprep.subr.msk.bf16.mxu1 %vm12398_vm8, %v7728_v32  ;;  %v2146_v44 = vsel %vm2141_vm6, %v2125_v53, 0  ;;  %vm12418_vm2 = vmmov %vm12404_vm1 }
 0x275   : > { %v2175_v40 = vrot.slane %v2173_v19, 1  ;;  %v2181_v26 = vshll.u32 %v2146_v44, 16  ;;  %v2298_v37 = vsel %vm1531_vm4, %v2289_v35, %v9923_v43  ;;  %v2324_v43 = vor.u32 %v2323_v18, %v2320_v57  ;;  %vm12422_vm6 = vmmov %vm12418_vm2 }
 0x276   : > { %vm12429_vm8 = vmmov %vm12418_vm2 }
 0x277   : > { %v2176_v30 = vsel %vm1882_vm14, %v2171_v34, %v2175_v40  ;;  %v2179_v0 = vor.u32 %v2177_v63, %v2175_v40  ;;  %v2183_v59 = vrot.slane %v2181_v26, 1  ;;  %v2325_v46 = vsel %vm1531_vm4, %v9925_v54, %v2324_v43 }
 0x279   : > { %v2184_v32 = vsel %vm1882_vm14, %v2179_v0, %v2183_v59  ;;  %vm12417_vm14 = vmmov %vm12404_vm1 }
 0x27a   : > { %8323 = vmatmul.mubr.msk.bf16.gmra.mrb[56].mxu1 %vm12410_vm11, %v9891_v22  ;;  %vm12420_vm11 = vmmov %vm12404_vm1 }
 0x27b   : > { %8328 = vmatprep.mubr.msk.bf16.mxu1 %vm12404_vm1, %v2160_v3  ;;  %vm12421_vm1 = vmmov %vm12419_vm3 }
 0x27c   : > { %v2424_v3 = vsel %vm12421_vm1, %v2422_v20, %v9768_v29  ;;  %v2429_v29 = vrot.slane %v2274_v39, 4 }
 0x282   : > { %8329 = vmatmul.mubr.msk.bf16.vlgmr.msra.gmra.mrb[52].mxu1 %vm12412_vm10, %v2168_v38  ;;  %vm12424_vm10 = vmmov %vm12421_vm1 }
 0x283   : > { %8332 = vmatprep.mubr.msk.bf16.mxu1 %vm12413_vm15, %v2176_v30  ;;  %8337 = vmatpush3.bf16.msra.mxu1 %v2339_v1  ;;  %v2584_v24 = vsel %vm12424_vm10, %v7738_v2, 0  ;;  %vm12425_vm15 = vmmov %vm12418_vm2 }
 0x284   : > { %9041 = vmatprep.subr.msk.bf16.mxu1 %vm12414_vm13, %v7733_v41  ;;  %vm12426_vm13 = vmmov %vm12421_vm1 }
 0x28a   : > { %8333 = vmatmul.mubr.msk.bf16.gmra.mrb[56].mxu1 %vm12415_vm5, %v2184_v32  ;;  %vm12427_vm5 = vmmov %vm12418_vm2 }
 0x28b   : > { %8338 = vmatprep.mubr.msk.bf16.mxu1 %vm12416_vm7, %v2298_v37  ;;  %vm12428_vm7 = vmmov %vm12421_vm1 }
 0x292   : > { %8339 = vmatmul.mubr.msk.bf16.vlgmr.msra.gmra.mrb[52].mxu1 %vm12417_vm14, %v9940_v27  ;;  %v2520_v27 = vsel %vm12423_vm12, %v2414_v61, 0  ;;  %vm12430_vm14 = vmmov %vm12418_vm2 }
 0x293   : > { %8342 = vmatprep.mubr.msk.bf16.mxu1 %vm12418_vm2, %v9944_v48  ;;  %8347 = vmatpush3.bf16.msra.mxu1 %v2444_v23  ;;  %v2427_v48 = vrot.slane %v9891_v22, 4  ;;  %v2528_v21 = vshrl.u32 %v2520_v27, 16  ;;  %v2531_v53 = vshll.u32 %v2520_v27, 16 }
 0x294   : > { %9042 = vmatprep.subr.msk.bf16.mxu1 %vm12419_vm3, %v7738_v2  ;;  %vm12431_vm3 = vmmov %vm12418_vm2 }
 0x295   : > { %v2428_v54 = vsel %vm12426_vm13, %v9815_v55, %v2427_v48  ;;  %v2530_v52 = vrot.slane %v2528_v21, 4  ;;  %v2533_v19 = vrot.slane %v2531_v53, 5  ;;  %v2430_v22 = vsel %vm12428_vm7, %v2427_v48, %v2429_v29  ;;  %vm12434_vm13 = vmmov %vm12418_vm2  ;;  %v9071_v29 = vld [vmem:[%s12168_s13 + $0x10] sm:$0xff]  }
 0x296   : > { %vm12436_vm7 = vmmov %vm12418_vm2 }
 0x297   : > { %v2534_v51 = vor.u32 %v2533_v19, %v2530_v52  ;;  %v9070_v19 = vld [vmem:[%s12168_s13 + $0x8] sm:$0xff]  }
 0x299   : > { %v2543_v34 = vsel %vm1386_vm0, %v2534_v51, %v9951_v28  ;;  %v9072_v51 = vld [vmem:[%s12168_s13 + $0x18] sm:$0xff]  }
 0x29a   : > { %8343 = vmatmul.mubr.msk.bf16.gmra.mrb[56].mxu1 %vm12420_vm11, %v2325_v46  ;;  %vm12432_vm11 = vmmov %vm12418_vm2 }
 0x29b   : > { %8348 = vmatprep.mubr.msk.bf16.mxu1 %vm12422_vm6, %v2424_v3 }
 0x2a2   : > { %8349 = vmatmul.mubr.msk.bf16.vlgmr.msra.gmra.mrb[52].mxu1 %vm12425_vm15, %v9826_v45  ;;  %v2524_v45 = vsel %vm1740_vm9, %v2519_v60, 0  ;;  %vm2822_vm9 = vcmask 523264   ;;  %vm12433_vm15 = vmmov %vm12418_vm2  ;;  %v9073_v60 = vld [vmem:[%s12168_s13 + $0x20] sm:$0xff]  }
 0x2a3   : > { %8352 = vmatprep.mubr.msk.bf16.mxu1 %vm12427_vm5, %v2428_v54  ;;  %8357 = vmatpush3.bf16.msra.mxu1 %v2584_v24  ;;  %v2563_v55 = vshrl.u32 %v2524_v45, 16  ;;  %v2566_v44 = vshll.u32 %v2524_v45, 16  ;;  %vm12435_vm5 = vmmov %vm12418_vm2  ;;  %v9076_v45 = vld [vmem:[%s12168_s13 + $0x38] sm:$0xff]  }
 0x2a5   : > { %v2565_v49 = vrot.slane %v2563_v55, 4  ;;  %v2568_v42 = vrot.slane %v2566_v44, 5  ;;  %v9077_v55 = vld [vmem:[%s12168_s13 + $0x40] sm:$0xff]   ;;  %v9078_v44 = vld [vmem:[%s12168_s13 + $0x48] sm:$0xff]  }
 0x2a7   : > { %v2569_v33 = vor.u32 %v2568_v42, %v2565_v49  ;;  %v9079_v49 = vld [vmem:[%s12168_s13 + $0x50] sm:$0xff]   ;;  %v9080_v42 = vld [vmem:[%s12168_s13 + $0x58] sm:$0xff]  }
 0x2a9   : > { %v2570_v28 = vsel %vm1386_vm0, %v9953_v36, %v2569_v33  ;;  %v9081_v33 = vld [vmem:[%s12168_s13 + $0x60] sm:$0xff]  }
 0x2aa   : > { %8353 = vmatmul.mubr.msk.bf16.gmra.mrb[56].mxu1 %vm12429_vm8, %v2430_v22  ;;  %v9074_v22 = vld [vmem:[%s12168_s13 + $0x28] sm:$0xff]  }
 0x2ab   : > { %8358 = vmatprep.mubr.msk.bf16.mxu1 %vm12430_vm14, %v2543_v34  ;;  %v9075_v34 = vld [vmem:[%s12168_s13 + $0x30] sm:$0xff]  }
 0x2b2   : > { %8359 = vmatmul.mubr.msk.bf16.vlgmr.msra.gmra.mrb[52].mxu1 %vm12418_vm2, %v9961_v31  ;;  %v7743_v31 = vld [vmem:[%s12167_s12] ss:$0 sm:$0xff] }
 0x2b3   : > { %8362 = vmatprep.mubr.msk.bf16.mxu1 %vm12431_vm3, %v9965_v50 }
 0x2ba   : > { %8363 = vmatmul.mubr.msk.bf16.gmra.mrb[56].mxu1 %vm12432_vm11, %v2570_v28  ;;  %vm12437_vm11 = vmmov %vm12435_vm5  ;;  %v9082_v28 = vld [vmem:[%s12168_s13 + $0x68] sm:$0xff]  }
 0x2bb   : > { %8374 = vmatprep.mubr.msk.bf16.mxu1 %vm2822_vm9, %v9069_v25  ;;  %v9083_v25 = vld [vmem:[%s12168_s13 + $0x70] sm:$0xff]  }
 0x385   : > { %v8360_v40 = vpop.f32.mrb[52].mxu1 }
 0x386   : > { %v2668_v50 = vadd.f32 %v8360_v40, %v7743_v31  ;;  %v2620_v1 = vpop.f32.mrb[53].mxu1  ;;  %v10167_v40 = vld [vmem:[%s12159_s4] ss:$0 sm:$0xff] }
 0x387   : > { %v2666_v38 = vadd.f32 %v7743_v31, %v2620_v1  ;;  %v8361_v26 = vpop.f32.mrb[54].mxu1  ;;  %v769_v1 = vadd.f32 %v9299_v6, %v10167_v40  ;;  %v7841_v6 = vld [vmem:[%s12164_s9 + $0x8] sm:$0xf] }
 0x388   : > { %vm2676_vm1 = vcmp.ge.f32.partialorder %v2668_v50, 0.0  ;;  %v2684_v36 = vmul.f32 0.1, %v2668_v50  ;;  %v2669_v41 = vadd.f32 %v8361_v26, %v7743_v31  ;;  %v2623_v30 = vpop.f32.mrb[55].mxu1  ;;  %v772_v26 = vadd.f32 %v9303_v8, %v10167_v40 }
 0x389   : > { %vm2674_vm6 = vcmp.ge.f32.partialorder %v2666_v38, 0.0  ;;  %v2682_v62 = vmul.f32 0.1, %v2666_v38  ;;  %v2667_v58 = vadd.f32 %v7743_v31, %v2623_v30  ;;  %v777_v30 = vadd.f32 %v10167_v40, %v9309_v11 }
 0x38a   : > { %vm2677_vm12 = vcmp.ge.f32.partialorder %v2669_v41, 0.0  ;;  %v2685_v63 = vmul.f32 0.1, %v2669_v41  ;;  %v2692_v0 = vsel %vm2676_vm1, %v2668_v50, %v2684_v36  ;;  %vm12438_vm1 = vmmov %vm12435_vm5  ;;  %v7792_v50 = vld [vmem:[%s12164_s9 + $0x4] sm:$0xf]  ;;  %v764_v36 = vadd.f32 %v10167_v40, %v9305_v9 }
 0x38b   : > { %vm2675_vm10 = vcmp.ge.f32.partialorder %v2667_v58, 0.0  ;;  %v2683_v59 = vmul.f32 0.1, %v2667_v58  ;;  %v2690_v35 = vsel %vm2674_vm6, %v2666_v38, %v2682_v62  ;;  %2700 = vst.msk [vmem:[%s10084_s28 + $0x10] sm:$0xff] %vm12433_vm15, %v2692_v0  ;;  %vm12439_vm6 = vmmov %vm12438_vm1  ;;  %vm12441_vm15 = vcmask 1043456  }
 0x38c   : > { %2698 = vst.msk [vmem:[%s10084_s28] sm:$0xff] %vm12434_vm13, %v2690_v35  ;;  %v2693_v39 = vsel %vm2677_vm12, %v2669_v41, %v2685_v63  ;;  %vm12440_vm12 = vmmov %vm12438_vm1  ;;  %v761_v38 = vadd.f32 %v10167_v40, %v9301_v7  ;;  %v785_v41 = vadd.f32 %v9307_v10, %v10167_v40  ;;  %vm3065_vm13 = vcmask 60416  }
 0x38d   : > { %v8364_v32 = vpop.f32.mrb[56].mxu1  ;;  %v2691_v37 = vsel %vm2675_vm10, %v2667_v58, %v2683_v59  ;;  %2701 = vst.msk [vmem:[%s10084_s28 + $0x18] sm:$0xff] %vm12435_vm5, %v2693_v39  ;;  %v2739_v4 = vpack.c.bf16 %v2693_v39, %v2692_v0  ;;  %vm3067_vm10 = vcmask 64516   ;;  %v921_v7 = vmul.f32 0.1, %v769_v1 }
 0x38e   : > { %v2672_v5 = vadd.f32 %v8364_v32, %v7743_v31  ;;  %v2636_v56 = vpop.f32.mrb[57].mxu1  ;;  %2699 = vst.msk [vmem:[%s10084_s28 + $0x8] sm:$0xff] %vm12436_vm7, %v2691_v37  ;;  %v2738_v23 = vpack.c.bf16 %v2691_v37, %v2690_v35  ;;  %v788_v8 = vadd.f32 %v9311_v12, %v10167_v40  ;;  %v919_v10 = vmul.f32 0.1, %v761_v38 }
 0x38f   : > { %v2670_v57 = vadd.f32 %v7743_v31, %v2636_v56  ;;  %v8365_v18 = vpop.f32.mrb[58].mxu1  ;;  %3068 = vst.msk [vmem:[#allocation2 + $0x88] sm:$0xf0] %vm3067_vm10, %v12329_v47  ;;  %v922_v11 = vmul.f32 0.1, %v772_v26  ;;  %v780_v63 = vadd.f32 %v10167_v40, %v9313_v13  ;;  %v801_v59 = vadd.f32 %v9315_v14, %v10167_v40 }
 0x390   : > { %vm2680_vm8 = vcmp.ge.f32.partialorder %v2672_v5, 0.0  ;;  %v2688_v2 = vmul.f32 0.1, %v2672_v5  ;;  %v2673_v61 = vadd.f32 %v8365_v18, %v7743_v31  ;;  %v2639_v43 = vpop.f32.mrb[59].mxu1  ;;  %8366 = vmatprep.subr.bf16.mxu1 %v2738_v23  ;;  %3066 = vst.msk [vmem:[#allocation2 + $0x8] sm:$0xf] %vm3065_vm13, %v12329_v47  ;;  %v793_v39 = vadd.f32 %v10167_v40, %v9317_v15 }
 0x391   : > { %vm2678_vm14 = vcmp.ge.f32.partialorder %v2670_v57, 0.0  ;;  %v2686_v20 = vmul.f32 0.1, %v2670_v57  ;;  %v2671_v46 = vadd.f32 %v7743_v31, %v2639_v43  ;;  %8367 = vmatpush3.bf16.msra.mxu1 %v2738_v23  ;;  %v9084_v31 = vld [vmem:[%s12168_s13 + $0x78] sm:$0xff]   ;;  %v920_v58 = vmul.f32 0.1, %v764_v36 }
 0x392   : > { %vm2681_vm2 = vcmp.ge.f32.partialorder %v2673_v61, 0.0  ;;  %v2689_v3 = vmul.f32 0.1, %v2673_v61  ;;  %8368 = vmatprep.subr.bf16.mxu1 %v2739_v4  ;;  %v2696_v27 = vsel %vm2680_vm8, %v2672_v5, %v2688_v2  ;;  %vm889_vm8 = vcmp.ge.f32.partialorder %v769_v1, 0.0  ;;  %v12445_v5 = vld [vmem:[#allocation4_spill] sm:$0xff] }
 0x393   : > { %vm2679_vm3 = vcmp.ge.f32.partialorder %v2671_v46, 0.0  ;;  %v2687_v48 = vmul.f32 0.1, %v2671_v46  ;;  %v2694_v21 = vsel %vm2678_vm14, %v2670_v57, %v2686_v20  ;;  %2704 = vst.msk [vmem:[%s10084_s28 + $0x30] sm:$0xff] %vm12437_vm11, %v2696_v27  ;;  %vm887_vm14 = vcmp.ge.f32.partialorder %v761_v38, 0.0 }
 0x394   : > { %2702 = vst.msk [vmem:[%s10084_s28 + $0x20] sm:$0xff] %vm12438_vm1, %v2694_v21  ;;  %v2697_v53 = vsel %vm2681_vm2, %v2673_v61, %v2689_v3  ;;  %vm890_vm2 = vcmp.ge.f32.partialorder %v772_v26, 0.0  ;;  %v925_v12 = vmul.f32 0.1, %v785_v41  ;;  %v923_v0 = vmul.f32 0.1, %v777_v30 }
 0x395   : > { %8369 = vmatpush3.bf16.msra.mxu1 %v2739_v4  ;;  %v2695_v24 = vsel %vm2679_vm3, %v2671_v46, %v2687_v48  ;;  %2705 = vst.msk [vmem:[%s10084_s28 + $0x38] sm:$0xff] %vm12439_vm6, %v2697_v53  ;;  %v2741_v54 = vpack.c.bf16 %v2697_v53, %v2696_v27  ;;  %vm888_vm3 = vcmp.ge.f32.partialorder %v764_v36, 0.0  ;;  %vm893_vm11 = vcmp.ge.f32.partialorder %v785_v41, 0.0  ;;  %v10226_v18 = vld [vmem:[%s12164_s9 + $0xc] sm:$0xf]  ;;  %v12447_v46 = vld [vmem:[#allocation5_spill] sm:$0xff] }
 0x396   : > { %2703 = vst.msk [vmem:[%s10084_s28 + $0x28] sm:$0xff] %vm12440_vm12, %v2695_v24  ;;  %v2740_v52 = vpack.c.bf16 %v2695_v24, %v2694_v21  ;;  %v926_v35 = vmul.f32 0.1, %v788_v8  ;;  %v804_v32 = vadd.f32 %v9319_v16, %v10167_v40  ;;  %vm891_vm1 = vcmp.ge.f32.partialorder %v777_v30, 0.0  ;;  %v12448_v48 = vld [vmem:[#allocation6_spill] sm:$0xff]  ;;  %v12449_v53 = vld [vmem:[#allocation7_spill] sm:$0xff] }
 0x397   : > { %v796_v37 = vadd.f32 %v10167_v40, %v9321_v17  ;;  %v10206_v13 = vsel %vm889_vm8, %v769_v1, %v921_v7  ;;  %v10209_v4 = vsel %vm887_vm14, %v761_v38, %v919_v10  ;;  %vm894_vm6 = vcmp.ge.f32.partialorder %v788_v8, 0.0  ;;  %v12454_v1 = vld [vmem:[#allocation11_spill] sm:$0xff] }
 0x398   : > { %8370 = vmatprep.subr.bf16.mxu1 %v2740_v52  ;;  %v924_v14 = vmul.f32 0.1, %v780_v63  ;;  %v817_v56 = vadd.f32 %v12445_v5, %v10167_v40  ;;  %v10214_v15 = vsel %vm890_vm2, %v772_v26, %v922_v11  ;;  %v10217_v16 = vsel %vm888_vm3, %v764_v36, %v920_v58  ;;  %v12460_v10 = vld [vmem:[#allocation15_spill] sm:$0xff] }
 0x399   : > { %8371 = vmatpush3.bf16.msra.mxu1 %v2740_v52  ;;  %v929_v23 = vmul.f32 0.1, %v801_v59  ;;  %v10219_v57 = vsel %vm893_vm11, %v785_v41, %v925_v12  ;;  %v10221_v17 = vsel %vm891_vm1, %v777_v30, %v923_v0  ;;  %vm892_vm12 = vcmp.ge.f32.partialorder %v780_v63, 0.0  ;;  %v12455_v41 = vld [vmem:[#allocation12_spill] sm:$0xff]  ;;  %v12461_v0 = vld [vmem:[#allocation27_spill] sm:$0xff] }
 0x39a   : > { %8372 = vmatprep.subr.bf16.mxu1 %v2741_v54  ;;  %v927_v2 = vmul.f32 0.1, %v793_v39  ;;  %v930_v61 = vmul.f32 0.1, %v804_v32  ;;  %v10228_v43 = vsel %vm894_vm6, %v788_v8, %v926_v35  ;;  %v928_v20 = vmul.f32 0.1, %v796_v37 }
 0x39b   : > { %v809_v3 = vadd.f32 %v10167_v40, %v12447_v46  ;;  %v933_v27 = vmul.f32 0.1, %v817_v56  ;;  %v820_v21 = vadd.f32 %v12448_v48, %v10167_v40  ;;  %v812_v24 = vadd.f32 %v10167_v40, %v12449_v53  ;;  %v12459_v8 = vld [vmem:[#allocation14_spill] sm:$0xff]  ;;  %v12468_v46 = vld [vmem:[#allocation24_spill] sm:$0xff] }
 0x39c   : > { %vm896_vm8 = vcmp.ge.f32.partialorder %v796_v37, 0.0  ;;  %vm901_vm14 = vcmp.ge.f32.partialorder %v817_v56, 0.0  ;;  %v828_v38 = vadd.f32 %v10167_v40, %v12454_v1  ;;  %v849_v30 = vadd.f32 %v12455_v41, %v10167_v40 }
 0x39d   : > { %8373 = vmatpush3.bf16.msra.mxu1 %v2741_v54  ;;  %v12450_v54 = vld [vmem:[#allocation8_spill] sm:$0xff]  ;;  %vm899_vm2 = vcmp.ge.f32.partialorder %v809_v3, 0.0  ;;  %vm902_vm3 = vcmp.ge.f32.partialorder %v820_v21, 0.0  ;;  %vm900_vm11 = vcmp.ge.f32.partialorder %v812_v24, 0.0  ;;  %v844_v11 = vadd.f32 %v10167_v40, %v12460_v10  ;;  %v12487_v10 = vld [vmem:[#allocation21_spill] sm:$0xff] }
 0x39e   : > { %9043 = vmatprep.subr.msk.bf16.mxu1 %vm12441_vm15, %v7792_v50  ;;  %v833_v52 = vadd.f32 %v12450_v54, %v10167_v40  ;;  %v936_v12 = vmul.f32 0.1, %v828_v38 }
 0x3a0   : > { %8375 = vmatmul.mubr.msk.bf16.vlgmr.msra.gmra.mrb[60].mxu1 %vm2822_vm9, %v9070_v19  ;;  %v10241_v19 = vsel %vm892_vm12, %v780_v63, %v924_v14  ;;  %vm905_vm1 = vcmp.ge.f32.partialorder %v833_v52, 0.0 }
 0x3a1   : > { %8378 = vmatprep.mubr.msk.bf16.mxu1 %vm2822_vm9, %v9071_v29 }
 0x3a8   : > { %8379 = vmatmul.mubr.msk.bf16.gmra.mrb[64].mxu1 %vm2822_vm9, %v9072_v51  ;;  %v12451_v51 = vld [vmem:[#allocation9_spill] sm:$0xff] }
 0x3a9   : > { %8382 = vmatprep.mubr.msk.bf16.mxu1 %vm2822_vm9, %v9073_v60  ;;  %v825_v60 = vadd.f32 %v10167_v40, %v12451_v51 }
 0x3ab   : > { %v935_v26 = vmul.f32 0.1, %v825_v60  ;;  %vm903_vm6 = vcmp.ge.f32.partialorder %v825_v60, 0.0 }
 0x3ad   : > { %v10294_v5 = vsel %vm903_vm6, %v825_v60, %v935_v26  ;;  %v12473_v60 = vld [vmem:[#allocation29_spill] sm:$0xff] }
 0x3ae   : > { %12466 = vst [vmem:[#allocation5_spill] sm:$0xff] %v10294_v5 }
 0x3b0   : > { %8383 = vmatmul.mubr.msk.bf16.gmra.mrb[68].mxu1 %vm2822_vm9, %v9074_v22  ;;  %v12452_v22 = vld [vmem:[#allocation10_spill] sm:$0xff] }
 0x3b1   : > { %8386 = vmatprep.mubr.msk.bf16.mxu1 %vm2822_vm9, %v9075_v34  ;;  %v836_v34 = vadd.f32 %v12452_v22, %v10167_v40  ;;  %v3196_v22 = vand.u32 15, %v12473_v60 }
 0x3b3   : > { %v938_v36 = vmul.f32 0.1, %v836_v34 }
 0x3b8   : > { %8387 = vmatmul.mubr.msk.bf16.gmra.mrb[72].mxu1 %vm2822_vm9, %v9076_v45 }
 0x3b9   : > { %8390 = vmatprep.mubr.msk.bf16.mxu1 %vm2822_vm9, %v9077_v55 }
 0x3c0   : > { %8391 = vmatmul.mubr.msk.bf16.gmra.mrb[76].mxu1 %vm2822_vm9, %v9078_v44  ;;  %v931_v44 = vmul.f32 0.1, %v809_v3 }
 0x3c1   : > { %8394 = vmatprep.mubr.msk.bf16.mxu1 %vm2822_vm9, %v9079_v49  ;;  %v10253_v49 = vsel %vm896_vm8, %v796_v37, %v928_v20  ;;  %v12465_v37 = vld [vmem:[#allocation16_spill] sm:$0xff]  ;;  %vm904_vm8 = vcmp.ge.f32.partialorder %v828_v38, 0.0  ;;  %v940_v20 = vmul.f32 0.1, %v844_v11 }
 0x3c2   : > { %v10273_v58 = vsel %vm899_vm2, %v809_v3, %v931_v44  ;;  %v865_v14 = vadd.f32 %v12465_v37, %v10167_v40  ;;  %v3191_v3 = vand.u32 15, %v12468_v46  ;;  %v3168_v44 = vadd.s32 72, %v12468_v46 }
 0x3c4   : > { %v945_v54 = vmul.f32 0.1, %v865_v14  ;;  %vm913_vm6 = vcmp.ge.f32.partialorder %v865_v14, 0.0 }
 0x3c6   : > { %v10344_v7 = vsel %vm913_vm6, %v865_v14, %v945_v54 }
 0x3c7   : > { %12485 = vst [vmem:[#allocation11_spill] sm:$0xff] %v10344_v7 }
 0x3c8   : > { %8395 = vmatmul.mubr.msk.bf16.gmra.mrb[80].mxu1 %vm2822_vm9, %v9080_v42  ;;  %v12453_v42 = vld [vmem:[#allocation25_spill] sm:$0xff] }
 0x3c9   : > { %8398 = vmatprep.mubr.msk.bf16.mxu1 %vm2822_vm9, %v9081_v33  ;;  %v3192_v33 = vand.u32 15, %v12453_v42 }
 0x3cb   : > { %vm10264_vm12 = vcmp.ne.s32.totalorder %v3192_v33, 15 }
 0x3d0   : > { %8399 = vmatmul.mubr.msk.bf16.gmra.mrb[84].mxu1 %vm2822_vm9, %v9082_v28  ;;  %v934_v28 = vmul.f32 0.1, %v820_v21 }
 0x3d1   : > { %8402 = vmatprep.mubr.msk.bf16.mxu1 %vm2822_vm9, %v9083_v25  ;;  %v932_v25 = vmul.f32 0.1, %v812_v24 }
 0x3d2   : > { %v10275_v63 = vsel %vm902_vm3, %v820_v21, %v934_v28 }
 0x3d8   : > { %8403 = vmatmul.mubr.msk.bf16.gmra.mrb[88].mxu1 %vm2822_vm9, %v9084_v31  ;;  %vm12442_vm9 = vmmov %vm12441_vm15  ;;  %vm897_vm15 = vcmp.ge.f32.partialorder %v801_v59, 0.0  ;;  %v10256_v31 = vsel %vm901_vm14, %v817_v56, %v933_v27  ;;  %vm909_vm14 = vcmp.ge.f32.partialorder %v849_v30, 0.0  ;;  %v12469_v27 = vld [vmem:[#allocation17_spill] sm:$0xff] }
 0x3d9   : > { %v3760_v62 = vsel %vm12442_vm9, %v7792_v50, 0  ;;  %vm12443_vm5 = vmmov %vm12442_vm9  ;;  %v10243_v29 = vsel %vm897_vm15, %v801_v59, %v929_v23  ;;  %v937_v50 = vmul.f32 0.1, %v833_v52  ;;  %vm906_vm15 = vcmp.ge.f32.partialorder %v836_v34, 0.0 }
 0x3da   : > { %8407 = vmatpush3.bf16.msra.mxu1 %v3760_v62  ;;  %9045 = vmatprep.subr.msk.bf16.mxu0 %vm12443_vm5, %v7841_v6  ;;  %vm12444_vm7 = vmmov %vm12443_vm5  ;;  %v12456_v62 = vld [vmem:[#allocation13_spill] sm:$0xff]  ;;  %v3194_v59 = vand.u32 15, %v12461_v0  ;;  %v10296_v56 = vsel %vm906_vm15, %v836_v34, %v938_v36  ;;  %v941_v23 = vmul.f32 0.1, %v849_v30  ;;  %v857_v48 = vadd.f32 %v10167_v40, %v12469_v27 }
 0x3db   : > { %v4844_v9 = vsel %vm12444_vm7, %v7841_v6, 0  ;;  %vm12446_vm9 = vmmov %vm12443_vm5  ;;  %vm895_vm5 = vcmp.ge.f32.partialorder %v793_v39, 0.0  ;;  %vm898_vm7 = vcmp.ge.f32.partialorder %v804_v32, 0.0  ;;  %v841_v6 = vadd.f32 %v10167_v40, %v12456_v62  ;;  %12467 = vst [vmem:[#allocation6_spill] sm:$0xff] %v10296_v56  ;;  %v12484_v62 = vld [vmem:[#allocation31_spill] sm:$0xff] }
 0x3dc   : > { %8475 = vmatpush3.bf16.msra.mxu0 %v4844_v9  ;;  %v10249_v45 = vsel %vm895_vm5, %v793_v39, %v927_v2  ;;  %v10251_v55 = vsel %vm898_vm7, %v804_v32, %v930_v61  ;;  %v852_v9 = vadd.f32 %v12459_v8, %v10167_v40  ;;  %v10283_v39 = vsel %vm900_vm11, %v812_v24, %v932_v25  ;;  %vm4353_vm7 = vmpackc.low %vm10264_vm12, %vm10264_vm12  ;;  %v12486_v8 = vld [vmem:[#allocation20_spill] sm:$0xff] }
 0x3dd   : > { %9046 = vmatprep.subr.msk.bf16.mxu0 %vm12446_vm9, %v10226_v18  ;;  %vm9108_vm9 = vmmov 1   ;;  %v10286_v32 = vsel %vm905_vm1, %v833_v52, %v937_v50  ;;  %v939_v2 = vmul.f32 0.1, %v841_v6  ;;  %vm907_vm2 = vcmp.ge.f32.partialorder %v841_v6, 0.0  ;;  %v12472_v52 = vld [vmem:[#allocation18_spill] sm:$0xff] }
 0x3de   : > { %vm10278_vm5 = vmpackc.low %vm9108_vm9, %vm9108_vm9  ;;  %12464 = vst [vmem:[#allocation4_spill] sm:$0xff] %v10286_v32  ;;  %v942_v61 = vmul.f32 0.1, %v852_v9  ;;  %vm910_vm3 = vcmp.ge.f32.partialorder %v852_v9, 0.0  ;;  %vm10301_vm11 = vcmp.ne.s32.totalorder %v3194_v59, 15  ;;  %v4385_v24 = vsel %vm4353_vm7, 65537, %v12329_v47 }
 0x3df   : > { %v10308_v53 = vsel %vm10278_vm5, 65537, %v12329_v47  ;;  %v868_v51 = vadd.f32 %v12472_v52, %v10167_v40  ;;  %vm908_vm1 = vcmp.ge.f32.partialorder %v844_v11, 0.0  ;;  %v10315_v34 = vsel %vm904_vm8, %v828_v38, %v936_v12  ;;  %vm4355_vm12 = vmpackc.low %vm10301_vm11, %vm10301_vm11  ;;  %v12480_v38 = vld [vmem:[#allocation19_spill] sm:$0xff]  ;;  %v12488_v59 = vld [vmem:[#allocation22_spill] sm:$0xff] }
 0x3e0   : > { %12474 = vst [vmem:[#allocation7_spill] sm:$0xff] %v10315_v34  ;;  %v10319_v42 = vsel %vm909_vm14, %v849_v30, %v941_v23  ;;  %v7825_v33 = vcombine.low %v10308_v53, %v4385_v24  ;;  %v10326_v28 = vsel %vm907_vm2, %v841_v6, %v939_v2  ;;  %v10329_v25 = vsel %vm910_vm3, %v852_v9, %v942_v61  ;;  %v12490_v61 = vld [vmem:[#allocation26_spill] sm:$0xff] }
 0x3e1   : > { %12475 = vst [vmem:[#allocation8_spill] sm:$0xff] %v10319_v42  ;;  %12476 = vst [vmem:[#allocation9_spill] sm:$0xff] %v10326_v28  ;;  %vm10331_vm15 = vcmp.ne.s32.totalorder %v3191_v3, 0  ;;  %v943_v1 = vmul.f32 0.1, %v857_v48  ;;  %v860_v26 = vadd.f32 %v10167_v40, %v12480_v38  ;;  %v10337_v36 = vsel %vm908_vm1, %v844_v11, %v940_v20  ;;  %v12491_v3 = vld [vmem:[#allocation23_spill] sm:$0xff] }
 0x3e2   : > { %12477 = vst [vmem:[#allocation10_spill] sm:$0xff] %v10329_v25  ;;  %12481 = vst [vmem:[#allocation25_spill] sm:$0xff] %v10337_v36  ;;  %vm911_vm9 = vcmp.ge.f32.partialorder %v857_v48, 0.0  ;;  %v946_v41 = vmul.f32 0.1, %v868_v51  ;;  %vm10339_vm5 = vcmp.ne.s32.totalorder %v3196_v22, 15  ;;  %v881_v9 = vadd.f32 %v12486_v8, %v10167_v40 }
 0x3e3   : > { %v3198_v6 = vand.u32 15, %v12484_v62  ;;  %v873_v12 = vadd.f32 %v10167_v40, %v12487_v10  ;;  %v4387_v0 = vsel %vm4355_vm12, 65537, %v12329_v47  ;;  %v3200_v11 = vand.u32 15, %v3168_v44  ;;  %vm3368_vm7 = vmpackc.low %vm10331_vm15, %vm10331_vm15 }
 0x3e4   : > { %v884_v35 = vadd.f32 %v12488_v59, %v10167_v40  ;;  %v4465_v37 = vshrl.u32 %v7825_v33, 16  ;;  %v4468_v23 = vshll.u32 %v7825_v33, 16  ;;  %vm914_vm8 = vcmp.ge.f32.partialorder %v868_v51, 0.0  ;;  %vm4357_vm14 = vmpackc.low %vm10339_vm5, %vm10339_vm5 }
 0x3e5   : > { %v944_v14 = vmul.f32 0.1, %v860_v26  ;;  %v10360_v2 = vsel %vm911_vm9, %v857_v48, %v943_v1  ;;  %vm912_vm2 = vcmp.ge.f32.partialorder %v860_v26, 0.0  ;;  %v3193_v20 = vand.u32 15, %v12490_v61 }
 0x3e6   : > { %12489 = vst [vmem:[#allocation12_spill] sm:$0xff] %v10360_v2  ;;  %v876_v27 = vadd.f32 %v10167_v40, %v12491_v3  ;;  %v7826_v21 = vcombine.low %v10308_v53, %v4387_v0  ;;  %vm10366_vm3 = vcmp.ne.s32.totalorder %v3198_v6, 15  ;;  %v3400_v54 = vsel %vm3368_vm7, 65537, %v12329_v47 }
 0x3e7   : > { %v949_v52 = vmul.f32 0.1, %v881_v9  ;;  %v947_v60 = vmul.f32 0.1, %v873_v12  ;;  %vm10371_vm11 = vcmp.ne.s32.totalorder %v3200_v11, 15  ;;  %vm917_vm1 = vcmp.ge.f32.partialorder %v881_v9, 0.0  ;;  %vm4359_vm6 = vmpackc.low %vm10366_vm3, %vm10366_vm3 }
 0x3e8   : > { %v950_v48 = vmul.f32 0.1, %v884_v35  ;;  %v4467_v44 = vrot.slane %v4465_v37, 3  ;;  %v4470_v33 = vrot.slane %v4468_v23, 4  ;;  %v4389_v40 = vsel %vm4357_vm14, 65537, %v12329_v47  ;;  %vm4361_vm5 = vmpackc.low %vm10371_vm11, %vm10371_vm11 }
 0x3e9   : > { %vm915_vm12 = vcmp.ge.f32.partialorder %v873_v12, 0.0  ;;  %vm918_vm15 = vcmp.ge.f32.partialorder %v884_v35, 0.0  ;;  %vm10379_vm9 = vcmp.ne.s32.totalorder %v3193_v20, 0  ;;  %v7776_v1 = vcombine.low %v3400_v54, %v10308_v53  ;;  %v10395_v11 = vld [vmem:[#allocation2] sm:$0xf0] }
 0x3ea   : > { %v948_v38 = vmul.f32 0.1, %v876_v27  ;;  %v4473_v30 = vshrl.u32 %v7826_v21, 16  ;;  %v4476_v62 = vshll.u32 %v7826_v21, 16  ;;  %v10388_v6 = vsel %vm914_vm8, %v868_v51, %v946_v41  ;;  %vm3370_vm8 = vmpackc.low %vm10379_vm9, %vm10379_vm9 }
 0x3eb   : > { %12498 = vst [vmem:[#allocation13_spill] sm:$0xff] %v10388_v6  ;;  %v7827_v8 = vcombine.low %v10308_v53, %v4389_v40  ;;  %v3170_v10 = vadd.s32 88, %v12468_v46  ;;  %v10393_v0 = vsel %vm912_vm2, %v860_v26, %v944_v14  ;;  %vm916_vm7 = vcmp.ge.f32.partialorder %v876_v27, 0.0 }
 0x3ec   : > { %12499 = vst [vmem:[#allocation14_spill] sm:$0xff] %v10393_v0  ;;  %v10397_v59 = vor.u32 %v4470_v33, %v4467_v44  ;;  %v10400_v37 = vsel %vm917_vm1, %v881_v9, %v949_v52  ;;  %v10403_v23 = vsel %vm915_vm12, %v873_v12, %v947_v60  ;;  %v10406_v51 = vsel %vm918_vm15, %v884_v35, %v950_v48 }
 0x3ed   : > { %12501 = vst [vmem:[#allocation27_spill] sm:$0xff] %v10400_v37  ;;  %12502 = vst [vmem:[#allocation16_spill] sm:$0xff] %v10403_v23  ;;  %v4391_v26 = vsel %vm4359_vm6, 65537, %v12329_v47  ;;  %v4393_v41 = vsel %vm4361_vm5, 65537, %v12329_v47  ;;  %v3481_v9 = vshrl.u32 %v7776_v1, 16  ;;  %v3484_v14 = vshll.u32 %v7776_v1, 16 }
 0x3ee   : > { %12500 = vst [vmem:[#allocation15_spill] sm:$0xff] %v10397_v59  ;;  %12503 = vst [vmem:[#allocation24_spill] sm:$0xff] %v10406_v51  ;;  %v4475_v12 = vrot.slane %v4473_v30, 3  ;;  %v4478_v61 = vrot.slane %v4476_v62, 4  ;;  %v3172_v35 = vadd.s32 104, %v12468_v46  ;;  %v10419_v20 = vsel %vm916_vm7, %v876_v27, %v948_v38 }
 0x3ef   : > { %12504 = vst [vmem:[#allocation17_spill] sm:$0xff] %v10419_v20  ;;  %v4482_v21 = vshrl.u32 %v7827_v8, 16  ;;  %v3202_v54 = vand.u32 15, %v3170_v10  ;;  %v3402_v52 = vsel %vm3370_vm8, 65537, %v12329_v47  ;;  %vm12222_vm14 = vcmp.ne.s16.totalorder %v10397_v59, 0 }
 0x3f0   : > { %v7828_v24 = vcombine.low %v10308_v53, %v4391_v26  ;;  %v7829_v60 = vcombine.low %v10308_v53, %v4393_v41  ;;  %v3174_v22 = vadd.s32 120, %v12468_v46  ;;  %vm12505_vm2 = vcmask 1043456  }
 0x3f1   : > { %v10429_v48 = vsel %vm12505_vm2, %v10226_v18, 0  ;;  %v3176_v27 = vadd.s32 136, %v12468_v46  ;;  %v3483_v44 = vrot.slane %v3481_v9, 4  ;;  %v3486_v33 = vrot.slane %v3484_v14, 5 }
 0x3f2   : > { %v4479_v40 = vor.u32 %v4478_v61, %v4475_v12  ;;  %v4485_v50 = vshll.u32 %v7827_v8, 16  ;;  %v3204_v1 = vand.u32 15, %v3172_v35  ;;  %v7777_v38 = vcombine.low %v3402_v52, %v10308_v53 }
 0x3f3   : > { %v4624_v30 = vsel %vm12222_vm14, %v10395_v11, 0  ;;  %v4484_v62 = vrot.slane %v4482_v21, 3  ;;  %vm10436_vm3 = vcmp.ne.s32.totalorder %v3202_v54, 15  ;;  %v3178_v18 = vadd.s32 152, %v12468_v46 }
 0x3f4   : > { %v4491_v26 = vshrl.u32 %v7828_v24, 16  ;;  %v4494_v41 = vshll.u32 %v7828_v24, 16  ;;  %v4500_v9 = vshrl.u32 %v7829_v60, 16  ;;  %v3206_v14 = vand.u32 15, %v3174_v22  ;;  %vm4363_vm11 = vmpackc.low %vm10436_vm3, %vm10436_vm3 }
 0x3f5   : > { %v4503_v12 = vshll.u32 %v7829_v60, 16  ;;  %v3208_v8 = vand.u32 15, %v3176_v27  ;;  %v3180_v61 = vadd.s32 168, %v12468_v46  ;;  %v10442_v35 = vor.u32 %v3486_v33, %v3483_v44 }
 0x3f6   : > { %vm10447_vm1 = vcmp.ne.s32.totalorder %v3204_v1, 15  ;;  %v3182_v54 = vadd.s32 184, %v12468_v46  ;;  %v3489_v52 = vshrl.u32 %v7777_v38, 16  ;;  %v3492_v24 = vshll.u32 %v7777_v38, 16 }
 0x3f7   : > { %12508 = vst [vmem:[#allocation18_spill] sm:$0xff] %v10442_v35  ;;  %v4644_v3 = vshrl.u32 %v4624_v30, 16  ;;  %v4647_v22 = vshll.u32 %v4624_v30, 16  ;;  %v4487_v60 = vrot.slane %v4485_v50, 4  ;;  %v3210_v27 = vand.u32 15, %v3178_v18  ;;  %vm4365_vm12 = vmpackc.low %vm10447_vm1, %vm10447_vm1 }
 0x3f8   : > { %v4493_v20 = vrot.slane %v4491_v26, 3  ;;  %v4496_v51 = vrot.slane %v4494_v41, 4  ;;  %v4502_v44 = vrot.slane %v4500_v9, 3  ;;  %vm10452_vm6 = vcmp.ne.s32.totalorder %v3206_v14, 15  ;;  %v3287_v50 = vld [vmem:[#allocation2] sm:$0xf8] }
 0x3f9   : > { %v4395_v1 = vsel %vm4363_vm11, 65537, %v12329_v47  ;;  %vm10460_vm15 = vcmp.ne.s32.totalorder %v3208_v8, 15  ;;  %v3212_v38 = vand.u32 15, %v3180_v61  ;;  %vm12226_vm9 = vcmp.ne.s16.totalorder %v10442_v35, 0  ;;  %vm4367_vm5 = vmpackc.low %vm10452_vm6, %vm10452_vm6 }
 0x3fa   : > { %v4505_v30 = vrot.slane %v4503_v12, 4  ;;  %v3214_v18 = vand.u32 15, %v3182_v54  ;;  %v3491_v26 = vrot.slane %v3489_v52, 4  ;;  %v3494_v41 = vrot.slane %v3492_v24, 5  ;;  %v10479_v12 = vld [vmem:[%s12164_s9] sm:$0xf]  ;;  %vm4369_vm8 = vmpackc.low %vm10460_vm15, %vm10460_vm15 }
 0x3fb   : > { %v10465_v9 = vrot.slane %v4644_v3, 4  ;;  %v10467_v14 = vrot.slane %v4647_v22, 5  ;;  %v4488_v23 = vor.u32 %v4487_v60, %v4484_v62  ;;  %vm10472_vm7 = vcmp.ne.s32.totalorder %v3210_v27, 15  ;;  %9044 = vmatprep.subr.msk.bf16.mxu1 %vm12505_vm2, %v10479_v12  ;;  %v12520_v52 = vld [vmem:[#allocation28_spill] sm:$0xff] }
 0x3fc   : > { %v4497_v61 = vor.u32 %v4496_v51, %v4493_v20  ;;  %v7830_v3 = vcombine.low %v10308_v53, %v4395_v1  ;;  %v4397_v62 = vsel %vm4365_vm12, 65537, %v12329_v47  ;;  %v3640_v54 = vsel %vm12226_vm9, %v3287_v50, 0  ;;  %vm4371_vm11 = vmpackc.low %vm10472_vm7, %vm10472_vm7 }
 0x3fd   : > { %v10497_v51 = vsel %vm1531_vm4, %v10397_v59, %v4479_v40  ;;  %vm10499_vm3 = vcmp.ne.s32.totalorder %v3212_v38, 15  ;;  %v3184_v21 = vadd.s32 200, %v12468_v46  ;;  %v3195_v24 = vand.u32 15, %v12520_v52 }
 0x3fe   : > { %12517 = vst [vmem:[#allocation29_spill] sm:$0xff] %v10497_v51  ;;  %v10505_v22 = vor.u32 %v4505_v30, %v4502_v44  ;;  %v4399_v60 = vsel %vm4367_vm5, 65537, %v12329_v47  ;;  %vm10511_vm1 = vcmp.ne.s32.totalorder %v3214_v18, 15  ;;  %v10515_v33 = vor.u32 %v3494_v41, %v3491_v26  ;;  %vm4373_vm6 = vmpackc.low %vm10499_vm3, %vm10499_vm3 }
 0x3ff   : > { %v10518_v1 = vsel %vm1531_vm4, %v4479_v40, %v4488_v23  ;;  %v7831_v10 = vcombine.low %v10308_v53, %v4397_v62  ;;  %v4401_v44 = vsel %vm4369_vm8, 65537, %v12329_v47  ;;  %v3924_v38 = vshrl.u32 %v3640_v54, 16  ;;  %vm4375_vm12 = vmpackc.low %vm10511_vm1, %vm10511_vm1 }
 0x400   : > { %v10525_v30 = vsel %vm1531_vm4, %v4488_v23, %v4497_v61  ;;  %v4509_v18 = vshrl.u32 %v7830_v3, 16  ;;  %v3927_v26 = vshll.u32 %v3640_v54, 16  ;;  %v7832_v40 = vcombine.low %v10308_v53, %v4399_v60 }
 0x401   : > { %12523 = vst [vmem:[#allocation19_spill] sm:$0xff] %v10525_v30  ;;  %v4403_v41 = vsel %vm4371_vm11, 65537, %v12329_v47  ;;  %v3216_v8 = vand.u32 15, %v3184_v21  ;;  %v3186_v62 = vadd.s32 216, %v12468_v46  ;;  %v10538_v23 = vsel %vm1531_vm4, %v4497_v61, %v10505_v22 }
 0x402   : > { %v4512_v52 = vshll.u32 %v7830_v3, 16  ;;  %v7833_v20 = vcombine.low %v10308_v53, %v4401_v44  ;;  %v10544_v54 = vsel %vm1386_vm0, %v10442_v35, %v10515_v33  ;;  %v4518_v60 = vshrl.u32 %v7831_v10, 16 }
 0x403   : > { %12524 = vst [vmem:[#allocation31_spill] sm:$0xff] %v10544_v54  ;;  %v4521_v50 = vshll.u32 %v7831_v10, 16  ;;  %v4405_v27 = vsel %vm4373_vm6, 65537, %v12329_v47  ;;  %v10547_v59 = vrot.slane %v3924_v38, 3  ;;  %v4511_v21 = vrot.slane %v4509_v18, 3 }
 0x404   : > { %v7834_v37 = vcombine.low %v10308_v53, %v4403_v41  ;;  %v4407_v61 = vsel %vm4375_vm12, 65537, %v12329_v47  ;;  %v3188_v3 = vadd.s32 232, %v12468_v46  ;;  %v4527_v0 = vshrl.u32 %v7832_v40, 16 }
 0x405   : > { %12525 = vst [vmem:[#allocation20_spill] sm:$0xff] %v10547_v59  ;;  %v4530_v44 = vshll.u32 %v7832_v40, 16  ;;  %vm10552_vm15 = vcmp.ne.s32.totalorder %v3216_v8, 15  ;;  %v3218_v2 = vand.u32 15, %v3186_v62  ;;  %v4514_v35 = vrot.slane %v4512_v52, 4 }
 0x406   : > { %v4536_v10 = vshrl.u32 %v7833_v20, 16  ;;  %v4539_v7 = vshll.u32 %v7833_v20, 16  ;;  %v7835_v38 = vcombine.low %v10308_v53, %v4405_v27  ;;  %v4520_v36 = vrot.slane %v4518_v60, 3  ;;  %vm4377_vm5 = vmpackc.low %vm10552_vm15, %vm10552_vm15 }
 0x407   : > { %v7836_v18 = vcombine.low %v10308_v53, %v4407_v61  ;;  %v10558_v41 = vrot.slane %v3927_v26, 4  ;;  %v3190_v25 = vadd.s32 248, %v12468_v46  ;;  %v4523_v28 = vrot.slane %v4521_v50, 4 }
 0x408   : > { %v4545_v42 = vshrl.u32 %v7834_v37, 16  ;;  %v4548_v40 = vshll.u32 %v7834_v37, 16  ;;  %v3220_v8 = vand.u32 15, %v3188_v3  ;;  %v4529_v62 = vrot.slane %v4527_v0, 3 }
 0x409   : > { %12528 = vst [vmem:[#allocation21_spill] sm:$0xff] %v10558_v41  ;;  %v4532_v52 = vrot.slane %v4530_v44, 4  ;;  %vm10564_vm7 = vcmp.ne.s32.totalorder %v3218_v2, 15  ;;  %vm10568_vm8 = vcmp.ne.s32.totalorder %v3195_v24, 0  ;;  %v4538_v26 = vrot.slane %v4536_v10, 3 }
 0x40a   : > { %v4541_v27 = vrot.slane %v4539_v7, 4  ;;  %v4554_v50 = vshrl.u32 %v7835_v38, 16  ;;  %v4557_v61 = vshll.u32 %v7835_v38, 16  ;;  %v4563_v37 = vshrl.u32 %v7836_v18, 16  ;;  %vm4379_vm2 = vmpackc.low %vm10564_vm7, %vm10564_vm7  ;;  %v12535_v38 = vld [vmem:[#allocation30_spill] sm:$0xff] }
 0x40b   : > { %v4566_v34 = vshll.u32 %v7836_v18, 16  ;;  %v4409_v6 = vsel %vm4377_vm5, 65537, %v12329_v47  ;;  %v3222_v56 = vand.u32 15, %v3190_v25  ;;  %v4515_v3 = vor.u32 %v4514_v35, %v4511_v21  ;;  %vm3372_vm11 = vmpackc.low %vm10568_vm8, %vm10568_vm8 }
 0x40c   : > { %v4547_v0 = vrot.slane %v4545_v42, 3  ;;  %v4550_v44 = vrot.slane %v4548_v40, 4  ;;  %vm10576_vm3 = vcmp.ne.s32.totalorder %v3220_v8, 15  ;;  %v4524_v24 = vor.u32 %v4523_v28, %v4520_v36 }
 0x40d   : > { %v4533_v7 = vor.u32 %v4532_v52, %v4529_v62  ;;  %v3189_v10 = vadd.s32 240, %v12468_v46  ;;  %v3197_v18 = vand.u32 15, %v12535_v38  ;;  %v4542_v5 = vor.u32 %v4541_v27, %v4538_v26  ;;  %vm4381_vm1 = vmpackc.low %vm10576_vm3, %vm10576_vm3 }
 0x40e   : > { %v4556_v32 = vrot.slane %v4554_v50, 3  ;;  %v4559_v25 = vrot.slane %v4557_v61, 4  ;;  %v7837_v42 = vcombine.low %v10308_v53, %v4409_v6  ;;  %v4565_v35 = vrot.slane %v4563_v37, 3 }
 0x40f   : > { %v4568_v21 = vrot.slane %v4566_v34, 4  ;;  %v4411_v40 = vsel %vm4379_vm2, 65537, %v12329_v47  ;;  %vm10590_vm6 = vcmp.ne.s32.totalorder %v3222_v56, 15  ;;  %v10596_v36 = vsel %vm1531_vm4, %v10505_v22, %v4515_v3 }
 0x410   : > { %12538 = vst [vmem:[#allocation22_spill] sm:$0xff] %v10596_v36  ;;  %v4551_v8 = vor.u32 %v4550_v44, %v4547_v0  ;;  %v3167_v34 = vadd.s32 64, %v12468_v46  ;;  %v10602_v52 = vsel %vm1531_vm4, %v4515_v3, %v4524_v24  ;;  %v3221_v20 = vand.u32 15, %v3189_v10  ;;  %vm4383_vm15 = vmpackc.low %vm10590_vm6, %vm10590_vm6 }
 0x411   : > { %12539 = vst [vmem:[#allocation26_spill] sm:$0xff] %v10602_v52  ;;  %v3404_v60 = vsel %vm3372_vm11, 65537, %v12329_v47  ;;  %vm10605_vm12 = vcmp.ne.s32.totalorder %v3197_v18, 0  ;;  %v4572_v26 = vshrl.u32 %v7837_v42, 16  ;;  %v4575_v27 = vshll.u32 %v7837_v42, 16 }
 0x412   : > { %v7838_v22 = vcombine.low %v10308_v53, %v4411_v40  ;;  %v4413_v50 = vsel %vm4381_vm1, 65537, %v12329_v47  ;;  %v10615_v61 = vsel %vm1531_vm4, %v4524_v24, %v4533_v7  ;;  %v10618_v37 = vsel %vm1531_vm4, %v4533_v7, %v4542_v5  ;;  %vm3374_vm7 = vmpackc.low %vm10605_vm12, %vm10605_vm12 }
 0x413   : > { %12542 = vst [vmem:[#allocation23_spill] sm:$0xff] %v10615_v61  ;;  %12543 = vst [vmem:[#allocation28_spill] sm:$0xff] %v10618_v37  ;;  %v4560_v6 = vor.u32 %v4559_v25, %v4556_v32  ;;  %v4569_v3 = vor.u32 %v4568_v21, %v4565_v35  ;;  %v10621_v0 = vsel %vm1531_vm4, %v4542_v5, %v4551_v8  ;;  %v3199_v2 = vand.u32 15, %v3167_v34 }
 0x414   : > { %12544 = vst [vmem:[#allocation30_spill] sm:$0xff] %v10621_v0  ;;  %v7778_v44 = vcombine.low %v3404_v60, %v10308_v53  ;;  %v3169_v10 = vadd.s32 80, %v12468_v46  ;;  %v7839_v38 = vcombine.low %v10308_v53, %v4413_v50  ;;  %vm10626_vm5 = vcmp.ne.s32.totalorder %v3221_v20, 0 }
 0x415   : > { %v4415_v24 = vsel %vm4383_vm15, 65537, %v12329_v47  ;;  %v3171_v32 = vadd.s32 96, %v12468_v46  ;;  %v4574_v5 = vrot.slane %v4572_v26, 3  ;;  %v4577_v7 = vrot.slane %v4575_v27, 4  ;;  %vm3398_vm8 = vmpackc.low %vm10626_vm5, %vm10626_vm5 }
 0x416   : > { %v4581_v25 = vshrl.u32 %v7838_v22, 16  ;;  %v3173_v42 = vadd.s32 112, %v12468_v46  ;;  %v10637_v35 = vsel %vm1531_vm4, %v4551_v8, %v4560_v6  ;;  %v10640_v21 = vsel %vm1531_vm4, %v4560_v6, %v4569_v3 }
 0x417   : > { %12547 = vst [vmem:[#allocation32_spill] sm:$0xff] %v10637_v35  ;;  %12548 = vst [vmem:[#allocation33_spill] sm:$0xff] %v10640_v21  ;;  %v4584_v40 = vshll.u32 %v7838_v22, 16  ;;  %v3175_v28 = vadd.s32 128, %v12468_v46  ;;  %v7840_v34 = vcombine.low %v10308_v53, %v4415_v24  ;;  %v3406_v20 = vsel %vm3374_vm7, 65537, %v12329_v47 }
 0x418   : > { %vm10648_vm2 = vcmp.ne.s32.totalorder %v3199_v2, 0  ;;  %v3201_v8 = vand.u32 15, %v3169_v10  ;;  %v4590_v56 = vshrl.u32 %v7839_v38, 16  ;;  %v3498_v26 = vshrl.u32 %v7778_v44, 16 }
 0x419   : > { %v3501_v27 = vshll.u32 %v7778_v44, 16  ;;  %v3203_v50 = vand.u32 15, %v3171_v32  ;;  %v4578_v22 = vor.u32 %v4577_v7, %v4574_v5  ;;  %v4583_v6 = vrot.slane %v4581_v25, 3  ;;  %vm3376_vm3 = vmpackc.low %vm10648_vm2, %vm10648_vm2 }
 0x41a   : > { %v4593_v62 = vshll.u32 %v7839_v38, 16  ;;  %v3205_v59 = vand.u32 15, %v3173_v42  ;;  %v4586_v18 = vrot.slane %v4584_v40, 4  ;;  %v3430_v41 = vsel %vm3398_vm8, 65537, %v12329_v47  ;;  %v10711_v40 = vld [vmem:[%s12164_s9 + $0x10] sm:$0xf] }
 0x41b   : > { %v7779_v24 = vcombine.low %v3406_v20, %v10308_v53  ;;  %v3207_v2 = vand.u32 15, %v3175_v28  ;;  %v4599_v21 = vshrl.u32 %v7840_v34, 16  ;;  %v4602_v10 = vshll.u32 %v7840_v34, 16 }
 0x41c   : > { %vm10657_vm11 = vcmp.ne.s32.totalorder %v3201_v8, 0  ;;  %v3177_v44 = vadd.s32 144, %v12468_v46  ;;  %v4592_v38 = vrot.slane %v4590_v56, 3  ;;  %v3500_v32 = vrot.slane %v3498_v26, 4 }
 0x41d   : > { %v3503_v5 = vrot.slane %v3501_v27, 5  ;;  %vm10662_vm1 = vcmp.ne.s32.totalorder %v3203_v50, 0  ;;  %v4595_v25 = vrot.slane %v4593_v62, 4  ;;  %v3408_v42 = vsel %vm3376_vm3, 65537, %v12329_v47  ;;  %vm3378_vm12 = vmpackc.low %vm10657_vm11, %vm10657_vm11 }
 0x41e   : > { %vm10667_vm6 = vcmp.ne.s32.totalorder %v3205_v59, 0  ;;  %v3179_v28 = vadd.s32 160, %v12468_v46  ;;  %v7791_v34 = vcombine.low %v3430_v41, %v10308_v53  ;;  %v3507_v20 = vshrl.u32 %v7779_v24, 16  ;;  %vm3380_vm7 = vmpackc.low %vm10662_vm1, %vm10662_vm1 }
 0x41f   : > { %v3510_v60 = vshll.u32 %v7779_v24, 16  ;;  %vm10676_vm15 = vcmp.ne.s32.totalorder %v3207_v2, 0  ;;  %v4601_v62 = vrot.slane %v4599_v21, 3  ;;  %v4604_v56 = vrot.slane %v4602_v10, 4  ;;  %vm3382_vm8 = vmpackc.low %vm10667_vm6, %vm10667_vm6 }
 0x420   : > { %vm12559_vm5 = vcmask 1043456   ;;  %v3209_v41 = vand.u32 15, %v3177_v44  ;;  %v10688_v26 = vsel %vm1531_vm4, %v4569_v3, %v4578_v22  ;;  %v4587_v35 = vor.u32 %v4586_v18, %v4583_v6  ;;  %vm3384_vm2 = vmpackc.low %vm10676_vm15, %vm10676_vm15 }
 0x421   : > { %v10682_v59 = vsel %vm12559_vm5, %v10479_v12, 0  ;;  %12560 = vst [vmem:[#allocation34_spill] sm:$0xff] %v10688_v26  ;;  %v3504_v27 = vor.u32 %v3503_v5, %v3500_v32  ;;  %v7780_v50 = vcombine.low %v3408_v42, %v10308_v53  ;;  %v4596_v21 = vor.u32 %v4595_v25, %v4592_v38  ;;  %vm12571_vm6 = vmmov %vm12559_vm5 }
 0x422   : > { %v3410_v12 = vsel %vm3378_vm12, 65537, %v12329_v47  ;;  %v3211_v24 = vand.u32 15, %v3179_v28  ;;  %v3181_v2 = vadd.s32 176, %v12468_v46  ;;  %v3615_v3 = vshrl.u32 %v7791_v34, 16 }
 0x423   : > { %v3509_v10 = vrot.slane %v3507_v20, 4  ;;  %v3512_v6 = vrot.slane %v3510_v60, 5  ;;  %v3412_v18 = vsel %vm3380_vm7, 65537, %v12329_v47  ;;  %v3618_v44 = vshll.u32 %v7791_v34, 16 }
 0x424   : > { %v10700_v32 = vor.u32 %v4604_v56, %v4601_v62  ;;  %v3414_v5 = vsel %vm3382_vm8, 65537, %v12329_v47  ;;  %vm10703_vm3 = vcmp.ne.s32.totalorder %v3209_v41, 0  ;;  %v3516_v7 = vshrl.u32 %v7780_v50, 16 }
 0x425   : > { %v3519_v25 = vshll.u32 %v7780_v50, 16  ;;  %v7781_v42 = vcombine.low %v3410_v12, %v10308_v53  ;;  %v3416_v28 = vsel %vm3384_vm2, 65537, %v12329_v47  ;;  %v10715_v34 = vsel %vm1531_vm4, %v4578_v22, %v4587_v35  ;;  %vm3386_vm1 = vmpackc.low %vm10703_vm3, %vm10703_vm3 }
 0x426   : > { %12561 = vst [vmem:[#allocation35_spill] sm:$0xff] %v10700_v32  ;;  %12564 = vst [vmem:[#allocation36_spill] sm:$0xff] %v10715_v34  ;;  %v7782_v20 = vcombine.low %v3412_v18, %v10308_v53  ;;  %vm10718_vm11 = vcmp.ne.s32.totalorder %v3211_v24, 0  ;;  %v3213_v8 = vand.u32 15, %v3181_v2  ;;  %v10723_v62 = vsel %vm1531_vm4, %v4587_v35, %v4596_v21 }
 0x427   : > { %12567 = vst [vmem:[#allocation37_spill] sm:$0xff] %v10723_v62  ;;  %v10727_v56 = vsel %vm1386_vm0, %v10515_v33, %v3504_v27  ;;  %v10729_v41 = vor.u32 %v3512_v6, %v3509_v10  ;;  %v7783_v50 = vcombine.low %v3414_v5, %v10308_v53  ;;  %v10735_v22 = vrot.slane %v3615_v3, 4  ;;  %vm3388_vm12 = vmpackc.low %vm10718_vm11, %vm10718_vm11 }
 0x428   : > { %12568 = vst [vmem:[#allocation38_spill] sm:$0xff] %v10727_v56  ;;  %v10737_v12 = vrot.slane %v3618_v44, 5  ;;  %v10741_v35 = vsel %vm12571_vm6, %v10711_v40, 0  ;;  %v7784_v24 = vcombine.low %v3416_v28, %v10308_v53  ;;  %v10746_v33 = vsel %vm1531_vm4, %v4596_v21, %v10700_v32  ;;  %vm12577_vm2 = vmmov %vm12571_vm6 }
 0x429   : > { %12569 = vst [vmem:[#allocation39_spill] sm:$0xff] %v10735_v22  ;;  %12572 = vst [vmem:[#allocation41_spill] sm:$0xff] %v10741_v35  ;;  %v3518_v2 = vrot.slane %v3516_v7, 4  ;;  %v3521_v10 = vrot.slane %v3519_v25, 5  ;;  %v3525_v6 = vshrl.u32 %v7781_v42, 16  ;;  %v3528_v18 = vshll.u32 %v7781_v42, 16 }
 0x42a   : > { %12570 = vst [vmem:[#allocation40_spill] sm:$0xff] %v10737_v12  ;;  %12573 = vst [vmem:[#allocation42_spill] sm:$0xff] %v10746_v33  ;;  %v3534_v44 = vshrl.u32 %v7782_v20, 16  ;;  %v3418_v5 = vsel %vm3386_vm1, 65537, %v12329_v47  ;;  %vm10752_vm15 = vcmp.ne.s32.totalorder %v3213_v8, 0  ;;  %v10759_v7 = vsel %vm1386_vm0, %v3504_v27, %v10729_v41 }
 0x42b   : > { %12576 = vst [vmem:[#allocation43_spill] sm:$0xff] %v10759_v7  ;;  %v3537_v25 = vshll.u32 %v7782_v20, 16  ;;  %v3543_v60 = vshrl.u32 %v7783_v50, 16  ;;  %v3546_v42 = vshll.u32 %v7783_v50, 16  ;;  %v3552_v35 = vshrl.u32 %v7784_v24, 16  ;;  %vm3390_vm5 = vmpackc.low %vm10752_vm15, %vm10752_vm15 }
 0x42c   : > { %v3420_v32 = vsel %vm3388_vm12, 65537, %v12329_v47  ;;  %v3522_v56 = vor.u32 %v3521_v10, %v3518_v2  ;;  %v3555_v62 = vshll.u32 %v7784_v24, 16  ;;  %v3527_v20 = vrot.slane %v3525_v6, 4  ;;  %vm12583_vm6 = vmmov %vm12577_vm2 }
 0x42d   : > { %v3545_v7 = vrot.slane %v3543_v60, 4  ;;  %v7786_v34 = vcombine.low %v3420_v32, %v10308_v53  ;;  %v3554_v2 = vrot.slane %v3552_v35, 4  ;;  %v3422_v24 = vsel %vm3390_vm5, 65537, %v12329_v47  ;;  %vm12584_vm12 = vmmov %vm12577_vm2 }
 0x42e   : > { %vm12220_vm7 = vcmp.ne.s16.totalorder %v10497_v51, 0  ;;  %vm12221_vm8 = vcmp.ne.s16.totalorder %v10518_v1, 0  ;;  %v3185_v32 = vadd.s32 208, %v12468_v46  ;;  %vm12578_vm3 = vcmask 64512  }
 0x42f   : > { %v3570_v6 = vshrl.u32 %v7786_v34, 16  ;;  %vm12224_vm11 = vcmp.ne.s16.totalorder %v10525_v30, 0  ;;  %vm4611_vm15 = vcmp.ne.s16.totalorder %v10538_v23, 0  ;;  %vm12585_vm5 = vmmov %vm12578_vm3 }
 0x473   : > { %v8376_v3 = vpop.f32.mrb[60].mxu1 }
 0x474   : > { %v3034_v28 = vadd.f32 %v8376_v3, %v10206_v13  ;;  %v2905_v21 = vpop.f32.mrb[61].mxu1  ;;  %v7785_v13 = vcombine.low %v3418_v5, %v10308_v53  ;;  %v3536_v3 = vrot.slane %v3534_v44, 4  ;;  %v3557_v5 = vrot.slane %v3555_v62, 5 }
 0x475   : > { %v3032_v12 = vadd.f32 %v2905_v21, %v10209_v4  ;;  %v8377_v22 = vpop.f32.mrb[62].mxu1  ;;  %v3530_v4 = vrot.slane %v3528_v18, 5  ;;  %v3539_v21 = vrot.slane %v3537_v25, 5  ;;  %v3573_v18 = vshll.u32 %v7786_v34, 16 }
 0x476   : > { %v3035_v8 = vadd.f32 %v8377_v22, %v10214_v15  ;;  %v2908_v33 = vpop.f32.mrb[63].mxu1  ;;  %v3548_v22 = vrot.slane %v3546_v42, 5  ;;  %v3561_v38 = vshrl.u32 %v7785_v13, 16  ;;  %v3564_v26 = vshll.u32 %v7785_v13, 16 }
 0x477   : > { %v3033_v27 = vadd.f32 %v2908_v33, %v10217_v16  ;;  %v3531_v16 = vor.u32 %v3530_v4, %v3527_v20  ;;  %v3183_v33 = vadd.s32 192, %v12468_v46  ;;  %v10777_v62 = vcombine.low %v3422_v24, %v10308_v53 }
 0x478   : > { %v3071_v50 = vpack.c.bf16 %v3035_v8, %v3034_v28  ;;  %v3540_v60 = vor.u32 %v3539_v21, %v3536_v3  ;;  %v3549_v42 = vor.u32 %v3548_v22, %v3545_v7  ;;  %v3563_v34 = vrot.slane %v3561_v38, 4 }
 0x479   : > { %v3070_v15 = vpack.c.bf16 %v3033_v27, %v3032_v12  ;;  %v3566_v13 = vrot.slane %v3564_v26, 5  ;;  %v3215_v20 = vand.u32 15, %v3183_v33  ;;  %v3217_v4 = vand.u32 15, %v3185_v32 }
 0x47a   : > { %v3103_v10 = vrot.slane %v3071_v50, 4  ;;  %v3572_v50 = vrot.slane %v3570_v6, 4  ;;  %v3575_v3 = vrot.slane %v3573_v18, 5  ;;  %v3579_v7 = vshrl.u32 %v10777_v62, 16 }
 0x47b   : > { %v3102_v0 = vrot.slane %v3070_v15, 4  ;;  %v8380_v37 = vpop.f32.mrb[64].mxu1  ;;  %v10796_v15 = vsel %vm1386_vm0, %v3522_v56, %v3531_v16  ;;  %vm10824_vm1 = vcmp.ne.s32.totalorder %v3217_v4, 0 }
 0x47c   : > { %v3038_v12 = vadd.f32 %v8380_v37, %v10219_v57  ;;  %v2921_v35 = vpop.f32.mrb[65].mxu1  ;;  %v10784_v37 = vor.u32 %v3557_v5, %v3554_v2  ;;  %v3567_v2 = vor.u32 %v3566_v13, %v3563_v34  ;;  %v12587_v34 = vrot.slane %v10395_v11, 4 }
 0x47d   : > { %v3104_v44 = vsel %vm12577_vm2, %v3102_v0, %v3103_v10  ;;  %3150 = vst.msk [vmem:[#allocation2 + $0x8] sm:$0xf0] %vm3067_vm10, %v3102_v0  ;;  %v3036_v28 = vadd.f32 %v2921_v35, %v10221_v17  ;;  %v8381_v25 = vpop.f32.mrb[66].mxu1  ;;  %v10788_v0 = vadd.s32 224, %v12468_v46  ;;  %v10804_v46 = vsel %vm1386_vm0, %v3540_v60, %v3549_v42  ;;  %vm12586_vm2 = vmmov %vm12578_vm3 }
 0x47e   : > { %3151 = vst.msk [vmem:[#allocation2 + $0x10] sm:$0xff] %vm12578_vm3, %v3104_v44  ;;  %v3039_v8 = vadd.f32 %v8381_v25, %v10228_v43  ;;  %v2924_v57 = vpop.f32.mrb[67].mxu1  ;;  %v10793_v43 = vsel %vm1386_vm0, %v10729_v41, %v3522_v56  ;;  %v10808_v22 = vsel %vm1386_vm0, %v3549_v42, %v10784_v37  ;;  %v3582_v41 = vshll.u32 %v10777_v62, 16 }
 0x47f   : > { %v3037_v27 = vadd.f32 %v2924_v57, %v10241_v19  ;;  %v10799_v19 = vsel %vm1386_vm0, %v3531_v16, %v3540_v60  ;;  %vm10811_vm10 = vcmp.ne.s32.totalorder %v3215_v20, 0  ;;  %v3219_v38 = vand.u32 15, %v10788_v0 }
 0x480   : > { %v3073_v17 = vpack.c.bf16 %v3039_v8, %v3038_v12  ;;  %v10820_v12 = vor.u32 %v3575_v3, %v3572_v50  ;;  %v10822_v35 = vrot.slane %v3579_v7, 4  ;;  %vm3392_vm3 = vmpackc.low %vm10811_vm10, %vm10811_vm10  ;;  %vm12228_vm10 = vcmp.ne.s16.totalorder %v10544_v54, 0 }
 0x481   : > { %v3072_v21 = vpack.c.bf16 %v3037_v27, %v3036_v28  ;;  %v3424_v11 = vsel %vm3392_vm3, 65537, %v12329_v47  ;;  %vm3394_vm3 = vmpackc.low %vm10824_vm1, %vm10824_vm1 }
 0x482   : > { %v10801_v26 = vrot.slane %v3073_v17, 4 }
 0x483   : > { %v3105_v24 = vrot.slane %v3072_v21, 4  ;;  %v8384_v5 = vpop.f32.mrb[68].mxu1 }
 0x484   : > { %v3042_v16 = vadd.f32 %v8384_v5, %v10243_v29  ;;  %v2937_v33 = vpop.f32.mrb[69].mxu1  ;;  %v10817_v32 = vld [vmem:[#allocation2 + $0x8] sm:$0xff]  ;;  %v3584_v5 = vrot.slane %v3582_v41, 5  ;;  %v10884_v41 = vcombine.low %v3424_v11, %v10308_v53 }
 0x485   : > { %v3106_v18 = vsel %vm12583_vm6, %v3103_v10, %v3105_v24  ;;  %v3108_v62 = vsel %vm12584_vm12, %v3105_v24, %v10801_v26  ;;  %v3040_v29 = vadd.f32 %v2937_v33, %v10249_v45  ;;  %v8385_v44 = vpop.f32.mrb[70].mxu1  ;;  %v3679_v28 = vrot.slane %v10817_v32, 4  ;;  %v10833_v25 = vld [vmem:[#allocation2 + $0x10] sm:$0xff]  ;;  %vm12588_vm12 = vmmov %vm12586_vm2 }
 0x486   : > { %3152 = vst.msk [vmem:[#allocation2 + $0x18] sm:$0xff] %vm12585_vm5, %v3106_v18  ;;  %v3043_v60 = vadd.f32 %v8385_v44, %v10251_v55  ;;  %v2940_v42 = vpop.f32.mrb[71].mxu1  ;;  %v3681_v10 = vrot.slane %v10833_v25, 4  ;;  %v4625_v45 = vsel %vm12220_vm7, %v10817_v32, 0  ;;  %v4626_v8 = vsel %vm12221_vm8, %v10833_v25, 0  ;;  %vm12589_vm5 = vmmov %vm12583_vm6 }
 0x487   : > { %3153 = vst.msk [vmem:[#allocation2 + $0x20] sm:$0xff] %vm12586_vm2, %v3108_v62  ;;  %v3041_v57 = vadd.f32 %v2940_v42, %v10253_v49  ;;  %v3680_v55 = vsel %vm12583_vm6, %v12587_v34, %v3679_v28  ;;  %v4652_v13 = vshrl.u32 %v4625_v45, 16  ;;  %v4655_v27 = vshll.u32 %v4625_v45, 16  ;;  %v12606_v62 = vld [vmem:[#allocation5_spill] sm:$0xff] }
 0x488   : > { %v3075_v20 = vpack.c.bf16 %v3043_v60, %v3042_v16  ;;  %8408 = vmatprep.mubr.msk.bf16.mxu1 %vm12588_vm12, %v3680_v55  ;;  %v3682_v4 = vsel %vm12589_vm5, %v3679_v28, %v3681_v10  ;;  %v4661_v0 = vshrl.u32 %v4626_v8, 16  ;;  %v4664_v17 = vshll.u32 %v4626_v8, 16 }
 0x489   : > { %v3074_v50 = vpack.c.bf16 %v3041_v57, %v3040_v29  ;;  %8409 = vmatmul.mubr.msk.bf16.vlgmr.msra.gmra.mrb[92].mxu1 %vm12586_vm2, %v3682_v4  ;;  %v4654_v3 = vrot.slane %v4652_v13, 4  ;;  %v4657_v49 = vrot.slane %v4655_v27, 5  ;;  %v10865_v18 = vsel %vm1386_vm0, %v10784_v37, %v3567_v2 }
 0x48a   : > { %v10859_v7 = vrot.slane %v3075_v20, 4  ;;  %v4663_v21 = vrot.slane %v4661_v0, 4  ;;  %v4666_v24 = vrot.slane %v4664_v17, 5  ;;  %8441 = vmatpush3.bf16.msra.mxu1 %v10682_v59  ;;  %vm10870_vm6 = vcmp.ne.s32.totalorder %v3219_v38, 0 }
 0x48b   : > { %v3109_v56 = vrot.slane %v3074_v50, 4  ;;  %v8388_v16 = vpop.f32.mrb[72].mxu1  ;;  %v4658_v33 = vor.u32 %v4657_v49, %v4654_v3  ;;  %vm12267_vm12 = vcmp.ne.s16.totalorder %v10596_v36, 0  ;;  %vm12223_vm5 = vcmp.ne.s16.totalorder %v10602_v52, 0 }
 0x48c   : > { %v3046_v29 = vadd.f32 %v8388_v16, %v10256_v31  ;;  %v2953_v44 = vpop.f32.mrb[73].mxu1  ;;  %v10875_v59 = vor.u32 %v4666_v24, %v4663_v21  ;;  %v10881_v37 = vsel %vm1386_vm0, %v3567_v2, %v10820_v12  ;;  %vm12592_vm2 = vcmask 1043456  }
 0x48d   : > { %v3110_v38 = vsel %vm12592_vm2, %v10801_v26, %v3109_v56  ;;  %vm12593_vm7 = vmmov %vm12592_vm2  ;;  %v3044_v28 = vadd.f32 %v2953_v44, %v10273_v58  ;;  %v8389_v60 = vpop.f32.mrb[74].mxu1  ;;  %v12594_v42 = vor.u32 %v10467_v14, %v10465_v9  ;;  %v10895_v8 = vld [vmem:[#allocation2 + $0x18] sm:$0xff]  ;;  %vm12595_vm8 = vcmask 64512   ;;  %v12604_v44 = vld [vmem:[#allocation28_spill] sm:$0xff] }
 0x48e   : > { %v3112_v31 = vsel %vm12593_vm7, %v3109_v56, %v10859_v7  ;;  %v10897_v2 = vld [vmem:[#allocation2 + $0x20] sm:$0xff]  ;;  %3154 = vst.msk [vmem:[#allocation2 + $0x28] sm:$0xff] %vm12595_vm8, %v3110_v38  ;;  %vm12596_vm14 = vmmov %vm12595_vm8  ;;  %v3047_v26 = vadd.f32 %v8389_v60, %v10275_v63  ;;  %v2956_v57 = vpop.f32.mrb[75].mxu1  ;;  %v4668_v58 = vsel %vm1386_vm0, %v4658_v33, %v10875_v59  ;;  %v10906_v9 = vor.u32 %v3584_v5, %v10822_v35  ;;  %v12603_v5 = vld [vmem:[#allocation4_spill] sm:$0xff] }
 0x48f   : > { %v4659_v45 = vsel %vm1386_vm0, %v12594_v42, %v4658_v33  ;;  %3155 = vst.msk [vmem:[#allocation2 + $0x30] sm:$0xff] %vm12596_vm14, %v3112_v31  ;;  %vm12597_vm2 = vmmov %vm12595_vm8  ;;  %v3426_v14 = vsel %vm3394_vm3, 65537, %v12329_v47  ;;  %v3045_v34 = vadd.f32 %v2956_v57, %v10283_v39  ;;  %v3683_v63 = vrot.slane %v10895_v8, 4 }
 0x490   : > { %8476 = vmatprep.mubr.msk.bf16.mxu0 %vm12597_vm2, %v4659_v45  ;;  %vm12598_vm14 = vmmov %vm12597_vm2  ;;  %v3685_v55 = vrot.slane %v10897_v2, 4  ;;  %v4627_v35 = vsel %vm12224_vm11, %v10895_v8, 0  ;;  %v3077_v13 = vpack.c.bf16 %v3047_v26, %v3046_v29  ;;  %v4628_v6 = vsel %vm4611_vm15, %v10897_v2, 0 }
 0x491   : > { %8477 = vmatmul.mubr.msk.bf16.vlgmr.msra.gmra.mrb[0].mxu0 %vm12598_vm14, %v4668_v58  ;;  %v4670_v27 = vshrl.u32 %v4627_v35, 16  ;;  %v4673_v20 = vshll.u32 %v4627_v35, 16  ;;  %vm3396_vm7 = vmpackc.low %vm10870_vm6, %vm10870_vm6  ;;  %v3076_v39 = vpack.c.bf16 %v3045_v34, %v3044_v28  ;;  %vm12599_vm8 = vcmask 1043456   ;;  %v12610_v35 = vld [vmem:[#allocation7_spill] sm:$0xff] }
 0x492   : > { %8509 = vmatpush3.bf16.msra.mxu0 %v10429_v48  ;;  %v3684_v4 = vsel %vm12599_vm8, %v3681_v10, %v3683_v63  ;;  %vm12600_vm1 = vmmov %vm12599_vm8  ;;  %v4679_v17 = vshrl.u32 %v4628_v6, 16  ;;  %v10934_v48 = vrot.slane %v3077_v13, 4  ;;  %v4682_v49 = vshll.u32 %v4628_v6, 16 }
 0x493   : > { %v3686_v0 = vsel %vm12600_vm1, %v3683_v63, %v3685_v55  ;;  %vm12601_vm3 = vmmov %vm12600_vm1  ;;  %8412 = vmatprep.mubr.msk.bf16.mxu1 %vm12597_vm2, %v3684_v4  ;;  %v4672_v50 = vrot.slane %v4670_v27, 4  ;;  %v4675_v3 = vrot.slane %v4673_v20, 5  ;;  %v3113_v11 = vrot.slane %v3076_v39, 4  ;;  %v8392_v21 = vpop.f32.mrb[76].mxu1 }
 0x494   : > { %9047 = vmatprep.subr.msk.bf16.mxu0 %vm12601_vm3, %v10711_v40  ;;  %vm12602_vm14 = vmmov %vm12597_vm2  ;;  %v4681_v24 = vrot.slane %v4679_v17, 4  ;;  %v10939_v10 = vcombine.low %v3426_v14, %v10308_v53  ;;  %v3428_v40 = vsel %vm3396_vm7, 65537, %v12329_v47  ;;  %v3050_v56 = vadd.f32 %v8392_v21, %v12603_v5  ;;  %v2969_v16 = vpop.f32.mrb[77].mxu1 }
 0x495   : > { %8413 = vmatmul.mubr.msk.bf16.gmra.mrb[96].mxu1 %vm12602_vm14, %v3686_v0  ;;  %v4676_v33 = vor.u32 %v4675_v3, %v4672_v50  ;;  %v4684_v29 = vrot.slane %v4682_v49, 5  ;;  %vm12230_vm8 = vcmp.ne.s16.totalorder %v10615_v61, 0  ;;  %vm12225_vm1 = vcmp.ne.s16.totalorder %v12604_v44, 0  ;;  %vm12605_vm2 = vmmov %vm12601_vm3  ;;  %v8393_v47 = vpop.f32.mrb[78].mxu1  ;;  %v10956_v42 = vld [vmem:[#allocation2 + $0x28] sm:$0xff] }
 0x496   : > { %v3114_v31 = vsel %vm12601_vm3, %v10859_v7, %v3113_v11  ;;  %v3116_v28 = vsel %vm12605_vm2, %v3113_v11, %v10934_v48  ;;  %v3048_v60 = vadd.f32 %v2969_v16, %v12606_v62  ;;  %v10958_v45 = vld [vmem:[#allocation2 + $0x30] sm:$0xff]  ;;  %v10963_v26 = vsel %vm12228_vm10, %v10817_v32, 0  ;;  %vm12607_vm6 = vmmov %vm12602_vm14  ;;  %v12609_v7 = vld [vmem:[#allocation6_spill] sm:$0xff]  ;;  %v2972_v58 = vpop.f32.mrb[79].mxu1 }
 0x497   : > { %3156 = vst.msk [vmem:[#allocation2 + $0x38] sm:$0xff] %vm12607_vm6, %v3114_v31  ;;  %vm12608_vm7 = vmmov %vm12607_vm6  ;;  %v3051_v57 = vadd.f32 %v8393_v47, %v12609_v7  ;;  %v4677_v14 = vsel %vm1386_vm0, %v10875_v59, %v4676_v33  ;;  %v4685_v34 = vor.u32 %v4684_v29, %v4681_v24  ;;  %v3687_v63 = vrot.slane %v10956_v42, 4  ;;  %v12617_v29 = vld [vmem:[#allocation8_spill] sm:$0xff] }
 0x498   : > { %3157 = vst.msk [vmem:[#allocation2 + $0x40] sm:$0xff] %vm12608_vm7, %v3116_v28  ;;  %v3049_v13 = vadd.f32 %v2972_v58, %v12610_v35  ;;  %vm12611_vm14 = vmmov %vm12607_vm6  ;;  %v3689_v32 = vrot.slane %v10958_v45, 4  ;;  %v4629_v27 = vsel %vm12267_vm12, %v10956_v42, 0  ;;  %v4630_v20 = vsel %vm12223_vm5, %v10958_v45, 0  ;;  %v12619_v47 = vld [vmem:[#allocation32_spill] sm:$0xff] }
 0x499   : > { %8480 = vmatprep.mubr.msk.bf16.mxu0 %vm12611_vm14, %v4677_v14  ;;  %v3079_v6 = vpack.c.bf16 %v3051_v57, %v3050_v56  ;;  %v4686_v59 = vsel %vm1386_vm0, %v4676_v33, %v4685_v34  ;;  %vm12612_vm3 = vmmov %vm12605_vm2  ;;  %v4688_v4 = vshrl.u32 %v4629_v27, 16  ;;  %v4691_v50 = vshll.u32 %v4629_v27, 16 }
 0x49a   : > { %v3688_v39 = vsel %vm12612_vm3, %v3685_v55, %v3687_v63  ;;  %v3078_v0 = vpack.c.bf16 %v3049_v13, %v3048_v60  ;;  %vm12613_vm2 = vmmov %vm12607_vm6  ;;  %v4697_v3 = vshrl.u32 %v4630_v20, 16  ;;  %v4700_v21 = vshll.u32 %v4630_v20, 16  ;;  %v12618_v60 = vld [vmem:[#allocation30_spill] sm:$0xff] }
 0x49b   : > { %8481 = vmatmul.mubr.msk.bf16.gmra.mrb[4].mxu0 %vm12613_vm2, %v4686_v59  ;;  %vm12614_vm6 = vmmov %vm12613_vm2  ;;  %v10985_v49 = vrot.slane %v3079_v6, 4  ;;  %v4690_v11 = vrot.slane %v4688_v4, 4  ;;  %v8396_v55 = vpop.f32.mrb[80].mxu1  ;;  %v4693_v56 = vrot.slane %v4691_v50, 5  ;;  %v10990_v33 = vcombine.low %v3428_v40, %v10308_v53  ;;  %v12622_v40 = vld [vmem:[#allocation9_spill] sm:$0xff] }
 0x49c   : > { %8416 = vmatprep.mubr.msk.bf16.mxu1 %vm12614_vm6, %v3688_v39  ;;  %vm12615_vm7 = vmmov %vm12612_vm3  ;;  %v3117_v5 = vrot.slane %v3078_v0, 4  ;;  %v4699_v16 = vrot.slane %v4697_v3, 4  ;;  %v3054_v31 = vadd.f32 %v8396_v55, %v12617_v29  ;;  %v2985_v28 = vpop.f32.mrb[81].mxu1  ;;  %v4702_v62 = vrot.slane %v4700_v21, 5  ;;  %v12625_v4 = vld [vmem:[#allocation25_spill] sm:$0xff] }
 0x49d   : > { %v3690_v17 = vsel %vm12615_vm7, %v3687_v63, %v3689_v32  ;;  %vm12616_vm14 = vmmov %vm12613_vm2  ;;  %vm4616_vm3 = vcmp.ne.s16.totalorder %v12618_v60, 0  ;;  %vm12232_vm2 = vcmp.ne.s16.totalorder %v12619_v47, 0  ;;  %v3932_v7 = vshrl.u32 %v10963_v26, 16  ;;  %v8397_v63 = vpop.f32.mrb[82].mxu1 }
 0x49e   : > { %8417 = vmatmul.mubr.msk.bf16.gmra.mrb[100].mxu1 %vm12616_vm14, %v3690_v17  ;;  %v10999_v57 = vsel %vm1386_vm0, %v10820_v12, %v10906_v9  ;;  %vm12620_vm6 = vmmov %vm12615_vm7  ;;  %v3052_v14 = vadd.f32 %v2985_v28, %v12622_v40  ;;  %v4694_v35 = vor.u32 %v4693_v56, %v4690_v11  ;;  %v11006_v13 = vld [vmem:[#allocation2 + $0x38] sm:$0xff]  ;;  %v2988_v6 = vpop.f32.mrb[83].mxu1  ;;  %v4703_v59 = vor.u32 %v4702_v62, %v4699_v16  ;;  %v5039_v28 = vld [vmem:[#allocation2 + $0x8] sm:$0xf8] }
 0x49f   : > { %v3118_v58 = vsel %vm12620_vm6, %v10934_v48, %v3117_v5  ;;  %vm12621_vm7 = vmmov %vm12620_vm6  ;;  %v11008_v27 = vld [vmem:[#allocation2 + $0x40] sm:$0xff]  ;;  %v12624_v12 = vld [vmem:[#allocation10_spill] sm:$0xff]  ;;  %v3691_v48 = vrot.slane %v11006_v13, 4  ;;  %v3053_v0 = vadd.f32 %v2988_v6, %v12625_v4  ;;  %v4631_v50 = vsel %vm12230_vm8, %v11006_v13, 0 }
 0x4a0   : > { %v3120_v53 = vsel %vm12621_vm7, %v3117_v5, %v10985_v49  ;;  %3158 = vst.msk [vmem:[#allocation2 + $0x48] sm:$0xff] %vm12616_vm14, %v3118_v58  ;;  %vm12623_vm5 = vmmov %vm12616_vm14  ;;  %v3055_v20 = vadd.f32 %v8397_v63, %v12624_v12  ;;  %v3693_v39 = vrot.slane %v11008_v27, 4  ;;  %v4695_v17 = vsel %vm1386_vm0, %v4685_v34, %v4694_v35  ;;  %v12629_v12 = vld [vmem:[#allocation11_spill] sm:$0xff]  ;;  %v12630_v4 = vld [vmem:[#allocation33_spill] sm:$0xff] }
 0x4a1   : > { %3159 = vst.msk [vmem:[#allocation2 + $0x50] sm:$0xff] %vm12623_vm5, %v3120_v53  ;;  %v4632_v3 = vsel %vm12225_vm1, %v11008_v27, 0  ;;  %8484 = vmatprep.mubr.msk.bf16.mxu0 %vm12623_vm5, %v4695_v17  ;;  %v4704_v21 = vsel %vm1386_vm0, %v4694_v35, %v4703_v59  ;;  %v3692_v5 = vsel %vm12620_vm6, %v3689_v32, %v3691_v48  ;;  %vm12626_vm7 = vmmov %vm12620_vm6  ;;  %v3080_v56 = vpack.c.bf16 %v3053_v0, %v3052_v14  ;;  %v12631_v0 = vld [vmem:[#allocation34_spill] sm:$0xff] }
 0x4a2   : > { %v3081_v11 = vpack.c.bf16 %v3055_v20, %v3054_v31  ;;  %v3694_v55 = vsel %vm12626_vm7, %v3691_v48, %v3693_v39  ;;  %vm12627_vm14 = vmmov %vm12623_vm5  ;;  %v4706_v34 = vshrl.u32 %v4631_v50, 16  ;;  %v4709_v16 = vshll.u32 %v4631_v50, 16 }
 0x4a3   : > { %8485 = vmatmul.mubr.msk.bf16.gmra.mrb[8].mxu0 %vm12627_vm14, %v4704_v21  ;;  %vm12628_vm11 = vmmov %vm12623_vm5  ;;  %v4715_v29 = vshrl.u32 %v4632_v3, 16  ;;  %v4718_v31 = vshll.u32 %v4632_v3, 16  ;;  %v3935_v58 = vshll.u32 %v10963_v26, 16  ;;  %v3121_v40 = vrot.slane %v3080_v56, 4  ;;  %v8400_v32 = vpop.f32.mrb[84].mxu1  ;;  %v12634_v21 = vld [vmem:[#allocation12_spill] sm:$0xff] }
 0x4a4   : > { %8420 = vmatprep.mubr.msk.bf16.mxu1 %vm12628_vm11, %v3692_v5  ;;  %v11029_v62 = vrot.slane %v3081_v11, 4  ;;  %v4708_v14 = vrot.slane %v4706_v34, 4  ;;  %v4711_v63 = vrot.slane %v4709_v16, 5  ;;  %v3058_v20 = vadd.f32 %v8400_v32, %v12629_v12  ;;  %v3001_v6 = vpop.f32.mrb[85].mxu1  ;;  %vm12633_vm14 = vmmov %vm12626_vm7  ;;  %v12637_v32 = vld [vmem:[#allocation14_spill] sm:$0xff] }
 0x4a5   : > { %v4717_v35 = vrot.slane %v4715_v29, 4  ;;  %v4720_v48 = vrot.slane %v4718_v31, 5  ;;  %vm12231_vm11 = vcmp.ne.s16.totalorder %v12630_v4, 0  ;;  %vm12238_vm6 = vcmp.ne.s16.totalorder %v12631_v0, 0  ;;  %vm12635_vm1 = vmmov %vm12623_vm5 }
 0x4a6   : > { %8421 = vmatmul.mubr.msk.bf16.gmra.mrb[104].mxu1 %vm12623_vm5, %v3694_v55  ;;  %v11037_v17 = vrot.slane %v3932_v7, 3  ;;  %v11041_v50 = vsel %vm12226_vm9, %v5039_v28, 0  ;;  %v3122_v3 = vsel %vm12626_vm7, %v10985_v49, %v3121_v40  ;;  %v3124_v11 = vsel %vm12633_vm14, %v3121_v40, %v11029_v62  ;;  %v8401_v55 = vpop.f32.mrb[86].mxu1  ;;  %v12636_v7 = vld [vmem:[#allocation13_spill] sm:$0xff]  ;;  %vm12638_vm14 = vmmov %vm12626_vm7 }
 0x4a7   : > { %v3056_v5 = vadd.f32 %v3001_v6, %v12634_v21  ;;  %v4712_v56 = vor.u32 %v4711_v63, %v4708_v14  ;;  %v11048_v34 = vld [vmem:[#allocation2 + $0x48] sm:$0xff]  ;;  %3160 = vst.msk [vmem:[#allocation2 + $0x58] sm:$0xff] %vm12623_vm5, %v3122_v3  ;;  %v3059_v29 = vadd.f32 %v8401_v55, %v12636_v7  ;;  %v3004_v28 = vpop.f32.mrb[87].mxu1  ;;  %v4721_v31 = vor.u32 %v4720_v48, %v4717_v35  ;;  %v11067_v3 = vld [vmem:[#allocation2 + $0x10] sm:$0xff]  ;;  %vm12639_vm5 = vmmov %vm12635_vm1 }
 0x4a8   : > { %v11050_v16 = vld [vmem:[#allocation2 + $0x50] sm:$0xff]  ;;  %3161 = vst.msk [vmem:[#allocation2 + $0x60] sm:$0xff] %vm12635_vm1, %v3124_v11  ;;  %v11056_v49 = vrot.slane %v11048_v34, 4  ;;  %v3057_v12 = vadd.f32 %v3004_v28, %v12637_v32  ;;  %v4633_v63 = vsel %vm4616_vm3, %v11048_v34, 0  ;;  %vm12640_vm9 = vmmov %vm12635_vm1  ;;  %v5079_v38 = vshll.u32 %v11041_v50, 16 }
 0x4a9   : > { %v3697_v40 = vrot.slane %v11050_v16, 4  ;;  %v4713_v14 = vsel %vm1386_vm0, %v4703_v59, %v4712_v56  ;;  %v4634_v6 = vsel %vm12232_vm2, %v11050_v16, 0  ;;  %v3083_v35 = vpack.c.bf16 %v3059_v29, %v3058_v20 }
 0x4aa   : > { %8488 = vmatprep.mubr.msk.bf16.mxu0 %vm12635_vm1, %v4713_v14  ;;  %v4722_v48 = vsel %vm1386_vm0, %v4712_v56, %v4721_v31  ;;  %v3696_v11 = vsel %vm12626_vm7, %v3693_v39, %v11056_v49  ;;  %v3082_v21 = vpack.c.bf16 %v3057_v12, %v3056_v5  ;;  %v4724_v55 = vshrl.u32 %v4633_v63, 16 }
 0x4ab   : > { %v3698_v59 = vsel %vm12638_vm14, %v11056_v49, %v3697_v40  ;;  %8489 = vmatmul.mubr.msk.bf16.gmra.mrb[12].mxu0 %vm12639_vm5, %v4722_v48  ;;  %8424 = vmatprep.mubr.msk.bf16.mxu1 %vm12640_vm9, %v3696_v11  ;;  %v4727_v7 = vshll.u32 %v4633_v63, 16  ;;  %v4733_v28 = vshrl.u32 %v4634_v6, 16  ;;  %v11077_v32 = vrot.slane %v3083_v35, 4  ;;  %v8404_v5 = vpop.f32.mrb[88].mxu1  ;;  %v12641_v11 = vld [vmem:[#allocation36_spill] sm:$0xff]  ;;  %v12642_v63 = vld [vmem:[#allocation27_spill] sm:$0xff]  ;;  %vm12644_vm5 = vmmov %vm12638_vm14 }
 0x4ac   : > { %v4736_v20 = vshll.u32 %v4634_v6, 16  ;;  %v3937_v29 = vrot.slane %v3935_v58, 4  ;;  %v11082_v56 = vsel %vm12228_vm10, %v11067_v3, 0  ;;  %v3125_v39 = vrot.slane %v3082_v21, 4  ;;  %v3017_v35 = vpop.f32.mrb[89].mxu1  ;;  %v12643_v6 = vld [vmem:[#allocation37_spill] sm:$0xff]  ;;  %vm12646_vm10 = vmmov %vm12635_vm1 }
 0x4ad   : > { %v4726_v12 = vrot.slane %v4724_v55, 4  ;;  %v4729_v14 = vrot.slane %v4727_v7, 5  ;;  %v4735_v48 = vrot.slane %v4733_v28, 4  ;;  %vm12237_vm9 = vcmp.ne.s16.totalorder %v12641_v11, 0  ;;  %v12645_v55 = vld [vmem:[#allocation16_spill] sm:$0xff]  ;;  %v8405_v28 = vpop.f32.mrb[90].mxu1 }
 0x4ae   : > { %8425 = vmatmul.mubr.msk.bf16.gmra.mrb[108].mxu1 %vm12635_vm1, %v3698_v59  ;;  %v3062_v53 = vadd.f32 %v8404_v5, %v12642_v63  ;;  %v4738_v24 = vrot.slane %v4736_v20, 5  ;;  %vm4621_vm7 = vcmp.ne.s16.totalorder %v12643_v6, 0  ;;  %v5076_v58 = vshrl.u32 %v11041_v50, 16  ;;  %v11095_v54 = vld [vmem:[#allocation2 + $0x58] sm:$0xff]  ;;  %v12647_v20 = vld [vmem:[#allocation24_spill] sm:$0xff]  ;;  %v3020_v63 = vpop.f32.mrb[91].mxu1 }
 0x4af   : > { %v3126_v21 = vsel %vm12638_vm14, %v11029_v62, %v3125_v39  ;;  %v3128_v59 = vsel %vm12644_vm5, %v3125_v39, %v11077_v32  ;;  %v3060_v7 = vadd.f32 %v3017_v35, %v12645_v55  ;;  %v4730_v26 = vor.u32 %v4729_v14, %v4726_v12  ;;  %v11097_v5 = vld [vmem:[#allocation2 + $0x60] sm:$0xff]  ;;  %v12648_v35 = vld [vmem:[#allocation38_spill] sm:$0xff]  ;;  %v12649_v12 = vld [vmem:[#allocation17_spill] sm:$0xff] }
 0x4b0   : > { %3162 = vst.msk [vmem:[#allocation2 + $0x68] sm:$0xff] %vm12635_vm1, %v3126_v21  ;;  %v3063_v50 = vadd.f32 %v8405_v28, %v12647_v20  ;;  %v4739_v44 = vor.u32 %v4738_v24, %v4735_v48  ;;  %v11103_v62 = vrot.slane %v11095_v54, 4  ;;  %v3701_v39 = vrot.slane %v11097_v5, 4  ;;  %v12650_v24 = vld [vmem:[#allocation43_spill] sm:$0xff]  ;;  %vm12651_vm5 = vmmov %vm12635_vm1 }
 0x4b1   : > { %3163 = vst.msk [vmem:[#allocation2 + $0x70] sm:$0xff] %vm12646_vm10, %v3128_v59  ;;  %vm3625_vm14 = vcmp.ne.s16.totalorder %v12648_v35, 0  ;;  %v3061_v14 = vadd.f32 %v3020_v63, %v12649_v12  ;;  %v4731_v55 = vsel %vm1386_vm0, %v4721_v31, %v4730_v26  ;;  %v4635_v21 = vsel %vm12231_vm11, %v11095_v54, 0  ;;  %vm12654_vm11 = vmmov %vm12651_vm5 }
 0x4b2   : > { %v4636_v59 = vsel %vm12238_vm6, %v11097_v5, 0  ;;  %vm12257_vm10 = vcmp.ne.s16.totalorder %v12650_v24, 0  ;;  %v3085_v48 = vpack.c.bf16 %v3063_v50, %v3062_v53  ;;  %8492 = vmatprep.mubr.msk.bf16.mxu0 %vm12651_vm5, %v4731_v55  ;;  %v4740_v28 = vsel %vm1386_vm0, %v4730_v26, %v4739_v44  ;;  %vm12655_vm2 = vmmov %vm12651_vm5 }
 0x4b3   : > { %vm12652_vm1 = vcmask 1043456   ;;  %v3084_v63 = vpack.c.bf16 %v3061_v14, %v3060_v7  ;;  %8493 = vmatmul.mubr.msk.bf16.gmra.mrb[16].mxu0 %vm12654_vm11, %v4740_v28  ;;  %v4742_v12 = vshrl.u32 %v4635_v21, 16  ;;  %v4745_v61 = vshll.u32 %v4635_v21, 16  ;;  %vm12656_vm5 = vmmov %vm12655_vm2 }
 0x4b4   : > { %v3700_v20 = vsel %vm12652_vm1, %v3697_v40, %v11103_v62  ;;  %vm12653_vm8 = vmmov %vm12652_vm1  ;;  %v4751_v0 = vshrl.u32 %v4636_v59, 16  ;;  %v3131_v53 = vrot.slane %v3085_v48, 4  ;;  %v4754_v50 = vshll.u32 %v4636_v59, 16 }
 0x4b5   : > { %v11122_v31 = vsel %vm12653_vm8, %v11103_v62, %v3701_v39  ;;  %8428 = vmatprep.mubr.msk.bf16.mxu1 %vm12655_vm2, %v3700_v20  ;;  %v11127_v55 = vor.u32 %v3937_v29, %v11037_v17  ;;  %v3129_v40 = vrot.slane %v3084_v63, 4  ;;  %v4744_v4 = vrot.slane %v4742_v12, 4  ;;  %vm12657_vm8 = vmmov %vm12652_vm1 }
 0x4b6   : > { %8429 = vmatmul.mubr.msk.bf16.gmra.mrb[112].mxu1 %vm12656_vm5, %v11122_v31  ;;  %v4747_v7 = vrot.slane %v4745_v61, 5  ;;  %v4753_v14 = vrot.slane %v4751_v0, 4  ;;  %3166 = vst.msk [vmem:[#allocation2 + $0x88] sm:$0xf] %vm3065_vm13, %v3131_v53  ;;  %v4756_v28 = vrot.slane %v4754_v50, 5  ;;  %v11133_v20 = vrot.slane %v5076_v58, 3  ;;  %vm12658_vm2 = vmmov %vm12652_vm1 }
 0x4b7   : > { %v11135_v21 = vrot.slane %v5079_v38, 4  ;;  %v5084_v59 = vshrl.u32 %v11082_v56, 16  ;;  %v3130_v17 = vsel %vm12657_vm8, %v11077_v32, %v3129_v40  ;;  %v3132_v29 = vsel %vm12658_vm2, %v3129_v40, %v3131_v53  ;;  %v11141_v63 = vld [vmem:[#allocation2 + $0x68] sm:$0xff]  ;;  %v12659_v61 = vld [vmem:[#allocation42_spill] sm:$0xff]  ;;  %vm12660_vm13 = vmmov %vm12656_vm5 }
 0x4b8   : > { %v4748_v48 = vor.u32 %v4747_v7, %v4744_v4  ;;  %v11143_v12 = vld [vmem:[#allocation2 + $0x70] sm:$0xff]  ;;  %vm12252_vm11 = vcmp.ne.s16.totalorder %v12659_v61, 0  ;;  %v5087_v0 = vshll.u32 %v11082_v56, 16  ;;  %3164 = vst.msk [vmem:[#allocation2 + $0x78] sm:$0xff] %vm12660_vm13, %v3130_v17  ;;  %vm12661_vm1 = vmmov %vm12656_vm5  ;;  %v4757_v38 = vor.u32 %v4756_v28, %v4753_v14  ;;  %v12662_v53 = vld [vmem:[#allocation35_spill] sm:$0xff] }
 0x4b9   : > { %3165 = vst.msk [vmem:[#allocation2 + $0x80] sm:$0xff] %vm12661_vm1, %v3132_v29  ;;  %v3703_v58 = vrot.slane %v11141_v63, 4  ;;  %v3705_v32 = vrot.slane %v11143_v12, 4  ;;  %v4637_v4 = vsel %vm12237_vm9, %v11141_v63, 0  ;;  %vm4623_vm5 = vcmp.ne.s16.totalorder %v12662_v53, 0  ;;  %vm12663_vm8 = vmmov %vm12661_vm1 }
 0x4ba   : > { %v4749_v50 = vsel %vm1386_vm0, %v4739_v44, %v4748_v48  ;;  %v4760_v40 = vshrl.u32 %v4637_v4, 16  ;;  %v4763_v7 = vshll.u32 %v4637_v4, 16  ;;  %v4638_v56 = vsel %vm4621_vm7, %v11143_v12, 0  ;;  %vm12665_vm13 = vmmov %vm12658_vm2 }
 0x4bb   : > { %8496 = vmatprep.mubr.msk.bf16.mxu0 %vm12663_vm8, %v4749_v50  ;;  %v4758_v14 = vsel %vm1386_vm0, %v4748_v48, %v4757_v38  ;;  %v11162_v28 = vsel %vm12658_vm2, %v3701_v39, %v3703_v58  ;;  %v11165_v17 = vsel %vm12665_vm13, %v3703_v58, %v3705_v32  ;;  %v4769_v29 = vshrl.u32 %v4638_v56, 16  ;;  %vm12667_vm9 = vmmov %vm12663_vm8 }
 0x4bc   : > { %12664 = vst [vmem:[#allocation4_spill] sm:$0xff] %v11162_v28  ;;  %12666 = vst [vmem:[#allocation5_spill] sm:$0xff] %v11165_v17  ;;  %vm3627_vm1 = vcmp.ne.s16.totalorder %v10793_v43, 0  ;;  %8497 = vmatmul.mubr.msk.bf16.gmra.mrb[20].mxu0 %vm12667_vm9, %v4758_v14  ;;  %v4762_v44 = vrot.slane %v4760_v40, 4  ;;  %v4765_v4 = vrot.slane %v4763_v7, 5  ;;  %v4772_v26 = vshll.u32 %v4638_v56, 16 }
 0x4bd   : > { %vm12668_vm6 = vmmov %vm12663_vm8  ;;  %v3642_v48 = vsel %vm3625_vm14, %v10833_v25, 0  ;;  %v4771_v39 = vrot.slane %v4769_v29, 4  ;;  %v3643_v58 = vsel %vm12257_vm10, %v10895_v8, 0  ;;  %vm12258_vm8 = vcmp.ne.s16.totalorder %v10796_v15, 0  ;;  %v12671_v56 = vld [vmem:[#allocation21_spill] sm:$0xff]  ;;  %v12672_v29 = vld [vmem:[#allocation20_spill] sm:$0xff] }
 0x4be   : > { %8432 = vmatprep.mubr.msk.bf16.mxu1 %vm12668_vm6, %v11162_v28  ;;  %v12669_v50 = vshrl.u32 %v10884_v41, 16  ;;  %v12670_v6 = vshll.u32 %v10884_v41, 16  ;;  %v4766_v7 = vor.u32 %v4765_v4, %v4762_v44  ;;  %v4774_v25 = vrot.slane %v4772_v26, 5  ;;  %vm12675_vm9 = vmmov %vm12668_vm6 }
 0x4bf   : > { %8433 = vmatmul.mubr.msk.bf16.gmra.mrb[116].mxu1 %vm12668_vm6, %v11165_v17  ;;  %v12673_v11 = vor.u32 %v12671_v56, %v12672_v29  ;;  %v12674_v52 = vshrl.u32 %v10939_v10, 16  ;;  %v5089_v30 = vrot.slane %v5087_v0, 4  ;;  %v3941_v41 = vshrl.u32 %v3642_v48, 16  ;;  %v11198_v17 = vld [vmem:[#allocation2 + $0x78] sm:$0xff]  ;;  %vm12677_vm13 = vmmov %vm12658_vm2 }
 0x4c0   : > { %v11180_v14 = vrot.slane %v12669_v50, 4  ;;  %v11184_v40 = vrot.slane %v12670_v6, 5  ;;  %v5086_v50 = vrot.slane %v5084_v59, 3  ;;  %v3944_v6 = vshll.u32 %v3642_v48, 16  ;;  %v11200_v26 = vld [vmem:[#allocation2 + $0x80] sm:$0xf] }
 0x4c1   : > { %v3939_v47 = vsel %vm1531_vm4, %v12673_v11, %v11127_v55  ;;  %v11195_v60 = vrot.slane %v12674_v52, 4  ;;  %v4767_v28 = vsel %vm1386_vm0, %v4757_v38, %v4766_v7  ;;  %v4775_v51 = vor.u32 %v4774_v25, %v4771_v39  ;;  %v4287_v44 = vld [vmem:[#allocation2 + $0x80] sm:$0x1f] }
 0x4c2   : > { %v5082_v4 = vor.u32 %v11135_v21, %v11133_v20  ;;  %v3950_v11 = vshrl.u32 %v3643_v58, 16  ;;  %8500 = vmatprep.mubr.msk.bf16.mxu0 %vm12675_vm9, %v4767_v28  ;;  %v11206_v52 = vrot.slane %v11198_v17, 4  ;;  %v3709_v59 = vrot.slane %v11200_v26, 4  ;;  %v11215_v21 = vld [vmem:[#allocation2 + $0x20] sm:$0xff] }
 0x4c3   : > { %v4639_v0 = vsel %vm12252_vm11, %v11198_v17, 0  ;;  %v3953_v38 = vshll.u32 %v3643_v58, 16  ;;  %v4776_v48 = vsel %vm1386_vm0, %v4766_v7, %v4775_v51  ;;  %v4640_v20 = vsel %vm4623_vm5, %v4287_v44, 0  ;;  %vm12678_vm11 = vmmov %vm12675_vm9 }
 0x4c4   : > { %v4778_v39 = vshrl.u32 %v4639_v0, 16  ;;  %v4781_v25 = vshll.u32 %v4639_v0, 16  ;;  %v11219_v28 = vsel %vm12658_vm2, %v3705_v32, %v11206_v52  ;;  %v3710_v56 = vsel %vm12677_vm13, %v11206_v52, %v3709_v59  ;;  %8501 = vmatmul.mubr.msk.bf16.gmra.mrb[24].mxu0 %vm12675_vm9, %v4776_v48  ;;  %vm12679_vm13 = vmmov %vm12675_vm9 }
 0x4c5   : > { %12676 = vst [vmem:[#allocation6_spill] sm:$0xff] %v11219_v28  ;;  %v4787_v29 = vshrl.u32 %v4640_v20, 16  ;;  %v4790_v61 = vshll.u32 %v4640_v20, 16  ;;  %vm12259_vm6 = vcmp.ne.s16.totalorder %v10799_v19, 0  ;;  %8436 = vmatprep.mubr.msk.bf16.mxu1 %vm12678_vm11, %v11219_v28  ;;  %v3943_v44 = vrot.slane %v3941_v41, 3  ;;  %vm12680_vm11 = vmmov %vm12675_vm9 }
 0x4c6   : > { %v4780_v58 = vrot.slane %v4778_v39, 4  ;;  %v4783_v7 = vrot.slane %v4781_v25, 5  ;;  %v5058_v32 = vsel %vm3625_vm14, %v10895_v8, 0  ;;  %vm12260_vm2 = vcmp.ne.s16.totalorder %v10804_v46, 0 }
 0x4c7   : > { %v4789_v0 = vrot.slane %v4787_v29, 4  ;;  %v4792_v59 = vrot.slane %v4790_v61, 5  ;;  %v3946_v53 = vrot.slane %v3944_v6, 4  ;;  %v5059_v20 = vsel %vm12257_vm10, %v11215_v21, 0  ;;  %8437 = vmatmul.mubr.msk.bf16.gmra.mrb[120].mxu1 %vm12679_vm13, %v3710_v56 }
 0x4c8   : > { %v4784_v48 = vor.u32 %v4783_v7, %v4780_v58  ;;  %v3952_v28 = vrot.slane %v3950_v11, 3  ;;  %v3955_v39 = vrot.slane %v3953_v38, 4  ;;  %v3644_v41 = vsel %vm3627_vm1, %v10897_v2, 0  ;;  %8442 = vmatprep.mubr.msk.bf16.mxu1 %vm12680_vm11, %v3939_v47  ;;  %v11245_v47 = vld [vmem:[#allocation2 + $0x28] sm:$0xff]  ;;  %vm12682_vm11 = vmmov %vm12675_vm9 }
 0x4c9   : > { %v4793_v8 = vor.u32 %v4792_v59, %v4789_v0  ;;  %v5090_v25 = vor.u32 %v5089_v30, %v5086_v50  ;;  %v5093_v29 = vshrl.u32 %v5058_v32, 16  ;;  %v5096_v61 = vshll.u32 %v5058_v32, 16  ;;  %v11247_v32 = vld [vmem:[#allocation2 + $0x30] sm:$0xff]  ;;  %vm12683_vm10 = vmmov %vm12682_vm11 }
 0x4ca   : > { %v4785_v6 = vsel %vm1386_vm0, %v4775_v51, %v4784_v48  ;;  %v5102_v35 = vshrl.u32 %v5059_v20, 16  ;;  %v5105_v24 = vshll.u32 %v5059_v20, 16  ;;  %v3645_v56 = vsel %vm12258_vm8, %v10956_v42, 0 }
 0x4cb   : > { %8504 = vmatprep.mubr.msk.bf16.mxu0 %vm12675_vm9, %v4785_v6  ;;  %v4794_v11 = vsel %vm1386_vm0, %v4784_v48, %v4793_v8  ;;  %v3947_v38 = vor.u32 %v3946_v53, %v3943_v44  ;;  %v3959_v2 = vshrl.u32 %v3644_v41, 16  ;;  %v3962_v58 = vshll.u32 %v3644_v41, 16 }
 0x4cc   : > { %v3956_v30 = vor.u32 %v3955_v39, %v3952_v28  ;;  %v3968_v50 = vshrl.u32 %v3645_v56, 16  ;;  %v3971_v7 = vshll.u32 %v3645_v56, 16  ;;  %v12681_v51 = vshll.u32 %v10939_v10, 16  ;;  %8505 = vmatmul.mubr.msk.bf16.gmra.mrb[28].mxu0 %vm12682_vm11, %v4794_v11  ;;  %vm12684_vm11 = vmmov %vm12683_vm10 }
 0x4cd   : > { %v5095_v59 = vrot.slane %v5093_v29, 3  ;;  %v5098_v20 = vrot.slane %v5096_v61, 4  ;;  %vm12262_vm13 = vcmp.ne.s16.totalorder %v10808_v22, 0  ;;  %v3606_v42 = vshrl.u32 %v10990_v33, 16 }
 0x4ce   : > { %v3602_v0 = vrot.slane %v12681_v51, 5  ;;  %v3609_v53 = vshll.u32 %v10990_v33, 16  ;;  %v5091_v44 = vsel %vm1531_vm4, %v5082_v4, %v5090_v25  ;;  %v5104_v28 = vrot.slane %v5102_v35, 3 }
 0x4cf   : > { %v5107_v48 = vrot.slane %v5105_v24, 4  ;;  %v5060_v39 = vsel %vm3627_vm1, %v11245_v47, 0  ;;  %vm12261_vm9 = vcmp.ne.s16.totalorder %v10865_v18, 0  ;;  %8510 = vmatprep.mubr.msk.bf16.mxu0 %vm12683_vm10, %v5091_v44  ;;  %v3948_v10 = vsel %vm1531_vm4, %v11127_v55, %v3947_v38  ;;  %v11277_v44 = vld [vmem:[#allocation2 + $0x38] sm:$0xff] }
 0x4d0   : > { %v3961_v41 = vrot.slane %v3959_v2, 3  ;;  %v3964_v8 = vrot.slane %v3962_v58, 4  ;;  %v5061_v33 = vsel %vm12258_vm8, %v11247_v32, 0  ;;  %8443 = vmatmul.mubr.msk.bf16.vlgmr.msra.gmra.mrb[92].mxu1 %vm12684_vm11, %v3948_v10  ;;  %v3957_v35 = vsel %vm1531_vm4, %v3947_v38, %v3956_v30  ;;  %v11282_v10 = vld [vmem:[#allocation2 + $0x40] sm:$0xff]  ;;  %vm12685_vm8 = vmmov %vm12683_vm10 }
 0x4d1   : > { %v3970_v24 = vrot.slane %v3968_v50, 3  ;;  %v3973_v4 = vrot.slane %v3971_v7, 4  ;;  %v3646_v29 = vsel %vm12259_vm6, %v10958_v45, 0  ;;  %8446 = vmatprep.mubr.msk.bf16.mxu1 %vm12683_vm10, %v3957_v35  ;;  %v5099_v61 = vor.u32 %v5098_v20, %v5095_v59 }
 0x4d2   : > { %v5111_v55 = vshrl.u32 %v5060_v39, 16  ;;  %v5114_v6 = vshll.u32 %v5060_v39, 16  ;;  %v3647_v56 = vsel %vm12260_vm2, %v11006_v13, 0  ;;  %v5108_v11 = vor.u32 %v5107_v48, %v5104_v28 }
 0x4d3   : > { %v5120_v2 = vshrl.u32 %v5061_v33, 16  ;;  %v5123_v58 = vshll.u32 %v5061_v33, 16  ;;  %v3594_v38 = vor.u32 %v11184_v40, %v11180_v14  ;;  %v3965_v50 = vor.u32 %v3964_v8, %v3961_v41  ;;  %v11289_v40 = vld [vmem:[%s12164_s9 + $0x14] sm:$0xf] }
 0x4d4   : > { %v3977_v7 = vshrl.u32 %v3646_v29, 16  ;;  %v3980_v51 = vshll.u32 %v3646_v29, 16  ;;  %v11280_v45 = vor.u32 %v3602_v0, %v11195_v60  ;;  %v3974_v59 = vor.u32 %v3973_v4, %v3970_v24 }
 0x4d5   : > { %v3986_v20 = vshrl.u32 %v3647_v56, 16  ;;  %v3989_v39 = vshll.u32 %v3647_v56, 16  ;;  %v3608_v13 = vrot.slane %v3606_v42, 4  ;;  %v5100_v28 = vsel %vm1531_vm4, %v5090_v25, %v5099_v61 }
 0x4d6   : > { %v5113_v48 = vrot.slane %v5111_v55, 3  ;;  %v5116_v33 = vrot.slane %v5114_v6, 4  ;;  %vm12264_vm11 = vcmp.ne.s16.totalorder %v10881_v37, 0  ;;  %v3611_v14 = vrot.slane %v3609_v53, 5  ;;  %8511 = vmatmul.mubr.msk.bf16.vlgmr.msra.gmra.mrb[0].mxu0 %vm12683_vm10, %v5100_v28  ;;  %v12686_v53 = vld [vmem:[#allocation41_spill] sm:$0xff]  ;;  %vm12687_vm10 = vmmov %vm12685_vm8 }
 0x4d7   : > { %v5109_v60 = vsel %vm1531_vm4, %v5099_v61, %v5108_v11  ;;  %v5122_v0 = vrot.slane %v5120_v2, 3  ;;  %v5125_v41 = vrot.slane %v5123_v58, 4  ;;  %v5062_v25 = vsel %vm12259_vm6, %v11277_v44, 0  ;;  %8543 = vmatpush3.bf16.msra.mxu0 %v12686_v53  ;;  %vm12689_vm6 = vmmov %vm12687_vm10 }
 0x4d8   : > { %8514 = vmatprep.mubr.msk.bf16.mxu0 %vm12685_vm8, %v5109_v60  ;;  %v3966_v42 = vsel %vm1531_vm4, %v3956_v30, %v3965_v50  ;;  %v3979_v8 = vrot.slane %v3977_v7, 3  ;;  %v3982_v35 = vrot.slane %v3980_v51, 4  ;;  %v5063_v24 = vsel %vm12260_vm2, %v11282_v10, 0  ;;  %v11318_v60 = vld [vmem:[#allocation2 + $0x50] sm:$0xff]  ;;  %vm12691_vm2 = vmmov %vm12689_vm6 }
 0x4d9   : > { %8447 = vmatmul.mubr.msk.bf16.gmra.mrb[96].mxu1 %vm12687_vm10, %v3966_v42  ;;  %v3975_v4 = vsel %vm1531_vm4, %v3965_v50, %v3974_v59  ;;  %v3988_v29 = vrot.slane %v3986_v20, 3  ;;  %v3991_v61 = vrot.slane %v3989_v39, 4  ;;  %v3648_v55 = vsel %vm12262_vm13, %v11008_v27, 0 }
 0x4da   : > { %vm12688_vm8 = vcmask 1043456   ;;  %8450 = vmatprep.mubr.msk.bf16.mxu1 %vm12689_vm6, %v3975_v4  ;;  %v5117_v30 = vor.u32 %v5116_v33, %v5113_v48  ;;  %v5129_v6 = vshrl.u32 %v5062_v25, 16  ;;  %v5132_v56 = vshll.u32 %v5062_v25, 16 }
 0x4db   : > { %9048 = vmatprep.subr.msk.bf16.mxu0 %vm12688_vm8, %v11289_v40  ;;  %v3649_v2 = vsel %vm12261_vm9, %v11048_v34, 0  ;;  %v5126_v58 = vor.u32 %v5125_v41, %v5122_v0  ;;  %v5138_v50 = vshrl.u32 %v5063_v24, 16  ;;  %v5141_v7 = vshll.u32 %v5063_v24, 16  ;;  %vm12690_vm8 = vmmov %vm12689_vm6 }
 0x4dc   : > { %vm12263_vm10 = vcmp.ne.s16.totalorder %v10999_v57, 0  ;;  %v3983_v51 = vor.u32 %v3982_v35, %v3979_v8  ;;  %v3995_v20 = vshrl.u32 %v3648_v55, 16  ;;  %v3998_v27 = vshll.u32 %v3648_v55, 16 }
 0x4dd   : > { %v11316_v39 = vsel %vm1386_vm0, %v10906_v9, %v3594_v38  ;;  %v3992_v28 = vor.u32 %v3991_v61, %v3988_v29  ;;  %v4004_v48 = vshrl.u32 %v3649_v2, 16  ;;  %v4007_v33 = vshll.u32 %v3649_v2, 16  ;;  %v12694_v2 = vld [vmem:[#allocation40_spill] sm:$0xff] }
 0x4de   : > { %v11322_v25 = vsel %vm1386_vm0, %v3594_v38, %v11280_v45  ;;  %v5118_v0 = vsel %vm1531_vm4, %v5108_v11, %v5117_v30  ;;  %v5131_v41 = vrot.slane %v5129_v6, 3  ;;  %v5134_v42 = vrot.slane %v5132_v56, 4  ;;  %v12693_v56 = vld [vmem:[#allocation39_spill] sm:$0xff] }
 0x4df   : > { %v3612_v53 = vor.u32 %v3611_v14, %v3608_v13  ;;  %8515 = vmatmul.mubr.msk.bf16.gmra.mrb[4].mxu0 %vm12689_vm6, %v5118_v0  ;;  %v5127_v8 = vsel %vm1531_vm4, %v5117_v30, %v5126_v58  ;;  %v5140_v9 = vrot.slane %v5138_v50, 3  ;;  %v5143_v35 = vrot.slane %v5141_v7, 4  ;;  %vm12692_vm6 = vmmov %vm12691_vm2 }
 0x4e0   : > { %v5064_v24 = vsel %vm12262_vm13, %v11048_v34, 0  ;;  %8518 = vmatprep.mubr.msk.bf16.mxu0 %vm12690_vm8, %v5127_v8  ;;  %v3984_v38 = vsel %vm1531_vm4, %v3974_v59, %v3983_v51  ;;  %v3997_v4 = vrot.slane %v3995_v20, 3  ;;  %v4000_v29 = vrot.slane %v3998_v27, 4  ;;  %vm12696_vm13 = vmmov %vm12692_vm6 }
 0x4e1   : > { %v5065_v11 = vsel %vm12261_vm9, %v11318_v60, 0  ;;  %8451 = vmatmul.mubr.msk.bf16.gmra.mrb[100].mxu1 %vm12691_vm2, %v3984_v38  ;;  %v3993_v13 = vsel %vm1531_vm4, %v3983_v51, %v3992_v28  ;;  %v4006_v14 = vrot.slane %v4004_v48, 3  ;;  %v4009_v61 = vrot.slane %v4007_v33, 4  ;;  %vm12695_vm9 = vmmov %vm12692_vm6 }
 0x4e2   : > { %v3650_v34 = vsel %vm12264_vm11, %v11050_v16, 0  ;;  %8454 = vmatprep.mubr.msk.bf16.mxu1 %vm12692_vm6, %v3993_v13  ;;  %v5135_v55 = vor.u32 %v5134_v42, %v5131_v41  ;;  %v5147_v59 = vshrl.u32 %v5064_v24, 16  ;;  %v5150_v30 = vshll.u32 %v5064_v24, 16 }
 0x4e3   : > { %v3651_v6 = vsel %vm12263_vm10, %v11095_v54, 0  ;;  %v11346_v50 = vor.u32 %v12694_v2, %v12693_v56  ;;  %v5144_v7 = vor.u32 %v5143_v35, %v5140_v9  ;;  %v5156_v51 = vshrl.u32 %v5065_v11, 16 }
 0x4e4   : > { %v5159_v20 = vshll.u32 %v5065_v11, 16  ;;  %v4001_v27 = vor.u32 %v4000_v29, %v3997_v4  ;;  %v4013_v48 = vshrl.u32 %v3650_v34, 16  ;;  %v4016_v33 = vshll.u32 %v3650_v34, 16 }
 0x4e5   : > { %vm12270_vm2 = vcmp.ne.s16.totalorder %v11316_v39, 0  ;;  %v4010_v16 = vor.u32 %v4009_v61, %v4006_v14  ;;  %v4022_v0 = vshrl.u32 %v3651_v6, 16  ;;  %v4025_v41 = vshll.u32 %v3651_v6, 16 }
 0x4e6   : > { %vm12265_vm8 = vcmp.ne.s16.totalorder %v11322_v25, 0  ;;  %v5136_v42 = vsel %vm1531_vm4, %v5126_v58, %v5135_v55  ;;  %v5149_v8 = vrot.slane %v5147_v59, 3  ;;  %v5152_v24 = vrot.slane %v5150_v30, 4 }
 0x4e7   : > { %v11353_v38 = vsel %vm1386_vm0, %v11280_v45, %v3612_v53  ;;  %8519 = vmatmul.mubr.msk.bf16.gmra.mrb[8].mxu0 %vm12692_vm6, %v5136_v42  ;;  %v5145_v9 = vsel %vm1531_vm4, %v5135_v55, %v5144_v7  ;;  %v5158_v35 = vrot.slane %v5156_v51, 3  ;;  %v5161_v4 = vrot.slane %v5159_v20, 4 }
 0x4e8   : > { %v5066_v29 = vsel %vm12264_vm11, %v11095_v54, 0  ;;  %8522 = vmatprep.mubr.msk.bf16.mxu0 %vm12695_vm9, %v5145_v9  ;;  %v4002_v58 = vsel %vm1531_vm4, %v3992_v28, %v4001_v27  ;;  %v4015_v11 = vrot.slane %v4013_v48, 3  ;;  %v4018_v13 = vrot.slane %v4016_v33, 4  ;;  %vm12698_vm11 = vmmov %vm12692_vm6 }
 0x4e9   : > { %v5067_v45 = vsel %vm12263_vm10, %v11097_v5, 0  ;;  %8455 = vmatmul.mubr.msk.bf16.gmra.mrb[104].mxu1 %vm12696_vm13, %v4002_v58  ;;  %v4011_v14 = vsel %vm1531_vm4, %v4001_v27, %v4010_v16  ;;  %v4024_v61 = vrot.slane %v4022_v0, 3  ;;  %v4027_v34 = vrot.slane %v4025_v41, 4  ;;  %vm12697_vm10 = vmmov %vm12692_vm6 }
 0x4ea   : > { %v3652_v54 = vsel %vm12270_vm2, %v11097_v5, 0  ;;  %8458 = vmatprep.mubr.msk.bf16.mxu1 %vm12692_vm6, %v4011_v14  ;;  %v5153_v55 = vor.u32 %v5152_v24, %v5149_v8  ;;  %v5165_v28 = vshrl.u32 %v5066_v29, 16  ;;  %v5168_v59 = vshll.u32 %v5066_v29, 16 }
 0x4eb   : > { %v3653_v30 = vsel %vm12265_vm8, %v11141_v63, 0  ;;  %v5162_v6 = vor.u32 %v5161_v4, %v5158_v35  ;;  %v5174_v56 = vshrl.u32 %v5067_v45, 16  ;;  %v5177_v2 = vshll.u32 %v5067_v45, 16 }
 0x4ec   : > { %v11376_v51 = vsel %vm1386_vm0, %v3612_v53, %v11346_v50  ;;  %v4019_v20 = vor.u32 %v4018_v13, %v4015_v11  ;;  %v4031_v27 = vshrl.u32 %v3652_v54, 16  ;;  %v4034_v48 = vshll.u32 %v3652_v54, 16 }
 0x4ed   : > { %v4028_v5 = vor.u32 %v4027_v34, %v4024_v61  ;;  %v4040_v33 = vshrl.u32 %v3653_v30, 16  ;;  %v4043_v0 = vshll.u32 %v3653_v30, 16  ;;  %vm12269_vm13 = vcmp.ne.s16.totalorder %v11353_v38, 0 }
 0x4ee   : > { %v5154_v41 = vsel %vm1531_vm4, %v5144_v7, %v5153_v55  ;;  %v5167_v42 = vrot.slane %v5165_v28, 3  ;;  %v5170_v8 = vrot.slane %v5168_v59, 4  ;;  %vm12266_vm9 = vcmp.ne.s16.totalorder %v11376_v51, 0 }
 0x4ef   : > { %8523 = vmatmul.mubr.msk.bf16.gmra.mrb[12].mxu0 %vm12692_vm6, %v5154_v41  ;;  %v5163_v24 = vsel %vm1531_vm4, %v5153_v55, %v5162_v6  ;;  %v5176_v53 = vrot.slane %v5174_v56, 3  ;;  %v5179_v9 = vrot.slane %v5177_v2, 4  ;;  %v5068_v35 = vsel %vm12270_vm2, %v11141_v63, 0 }
 0x4f0   : > { %8526 = vmatprep.mubr.msk.bf16.mxu0 %vm12697_vm10, %v5163_v24  ;;  %v4020_v4 = vsel %vm1531_vm4, %v4010_v16, %v4019_v20  ;;  %v4033_v29 = vrot.slane %v4031_v27, 3  ;;  %v4036_v7 = vrot.slane %v4034_v48, 4  ;;  %v5069_v58 = vsel %vm12265_vm8, %v11143_v12, 0  ;;  %v11401_v27 = vld [vmem:[#allocation2 + $0x80] sm:$0xff]  ;;  %vm12699_vm10 = vmmov %vm12692_vm6 }
 0x4f1   : > { %8459 = vmatmul.mubr.msk.bf16.gmra.mrb[108].mxu1 %vm12698_vm11, %v4020_v4  ;;  %v4029_v11 = vsel %vm1531_vm4, %v4019_v20, %v4028_v5  ;;  %v4042_v13 = vrot.slane %v4040_v33, 3  ;;  %v4045_v45 = vrot.slane %v4043_v0, 4  ;;  %v3654_v63 = vsel %vm12269_vm13, %v11143_v12, 0  ;;  %vm12700_vm8 = vmmov %vm12692_vm6 }
 0x4f2   : > { %8462 = vmatprep.mubr.msk.bf16.mxu1 %vm12692_vm6, %v4029_v11  ;;  %v5171_v14 = vor.u32 %v5170_v8, %v5167_v42  ;;  %v5183_v16 = vshrl.u32 %v5068_v35, 16  ;;  %v5186_v61 = vshll.u32 %v5068_v35, 16  ;;  %v3655_v34 = vsel %vm12266_vm9, %v11198_v17, 0 }
 0x4f3   : > { %v5180_v54 = vor.u32 %v5179_v9, %v5176_v53  ;;  %v5192_v55 = vshrl.u32 %v5069_v58, 16  ;;  %v5195_v28 = vshll.u32 %v5069_v58, 16  ;;  %v4037_v59 = vor.u32 %v4036_v7, %v4033_v29 }
 0x4f4   : > { %v4049_v30 = vshrl.u32 %v3654_v63, 16  ;;  %v4052_v56 = vshll.u32 %v3654_v63, 16  ;;  %vm12268_vm11 = vcmp.ne.s16.totalorder %v11346_v50, 0  ;;  %v4046_v2 = vor.u32 %v4045_v45, %v4042_v13 }
 0x4f5   : > { %v4058_v20 = vshrl.u32 %v3655_v34, 16  ;;  %v4061_v12 = vshll.u32 %v3655_v34, 16  ;;  %v3656_v48 = vsel %vm12268_vm11, %v11200_v26, 0  ;;  %v5172_v33 = vsel %vm1531_vm4, %v5162_v6, %v5171_v14 }
 0x4f6   : > { %v5185_v0 = vrot.slane %v5183_v16, 3  ;;  %v5188_v41 = vrot.slane %v5186_v61, 4  ;;  %v5181_v42 = vsel %vm1531_vm4, %v5171_v14, %v5180_v54  ;;  %v5194_v8 = vrot.slane %v5192_v55, 3 }
 0x4f7   : > { %8527 = vmatmul.mubr.msk.bf16.gmra.mrb[16].mxu0 %vm12699_vm10, %v5172_v33  ;;  %v5197_v24 = vrot.slane %v5195_v28, 4  ;;  %v5070_v53 = vsel %vm12269_vm13, %v11198_v17, 0  ;;  %v4038_v9 = vsel %vm1531_vm4, %v4028_v5, %v4037_v59  ;;  %v4051_v35 = vrot.slane %v4049_v30, 3  ;;  %vm12701_vm10 = vmmov %vm12692_vm6 }
 0x4f8   : > { %8530 = vmatprep.mubr.msk.bf16.mxu0 %vm12692_vm6, %v5181_v42  ;;  %v4054_v26 = vrot.slane %v4052_v56, 4  ;;  %v5071_v6 = vsel %vm12266_vm9, %v11401_v27, 0  ;;  %v4047_v4 = vsel %vm1531_vm4, %v4037_v59, %v4046_v2  ;;  %v4060_v29 = vrot.slane %v4058_v20, 3  ;;  %v11429_v59 = vld [vmem:[#allocation2 + $0x88] sm:$0xf]  ;;  %vm12705_vm9 = vmmov %vm12692_vm6 }
 0x4f9   : > { %8463 = vmatmul.mubr.msk.bf16.gmra.mrb[112].mxu1 %vm12700_vm8, %v4038_v9  ;;  %v4063_v7 = vrot.slane %v4061_v12, 4  ;;  %v5498_v58 = vrot.slane %v11245_v47, 4  ;;  %v5189_v17 = vor.u32 %v5188_v41, %v5185_v0  ;;  %v5201_v11 = vshrl.u32 %v5070_v53, 16 }
 0x4fa   : > { %8466 = vmatprep.mubr.msk.bf16.mxu1 %vm12701_vm10, %v4047_v4  ;;  %v5204_v13 = vshll.u32 %v5070_v53, 16  ;;  %v5500_v5 = vrot.slane %v11247_v32, 4  ;;  %v5198_v45 = vor.u32 %v5197_v24, %v5194_v8  ;;  %v5210_v63 = vshrl.u32 %v5071_v6, 16  ;;  %vm12703_vm10 = vmmov %vm12692_vm6 }
 0x4fb   : > { %v5213_v14 = vshll.u32 %v5071_v6, 16  ;;  %v4055_v16 = vor.u32 %v4054_v26, %v4051_v35  ;;  %v4067_v61 = vshrl.u32 %v3656_v48, 16  ;;  %v4070_v34 = vshll.u32 %v3656_v48, 16 }
 0x4fc   : > { %vm12702_vm8 = vcmask 1043456   ;;  %v4064_v28 = vor.u32 %v4063_v7, %v4060_v29  ;;  %v5190_v30 = vsel %vm1531_vm4, %v5180_v54, %v5189_v17  ;;  %v5203_v56 = vrot.slane %v5201_v11, 3 }
 0x4fd   : > { %v11427_v55 = vsel %vm12702_vm8, %v5498_v58, %v5500_v5  ;;  %v5206_v20 = vrot.slane %v5204_v13, 4  ;;  %v5199_v12 = vsel %vm1531_vm4, %v5189_v17, %v5198_v45  ;;  %v5212_v33 = vrot.slane %v5210_v63, 3  ;;  %vm12704_vm8 = vmmov %vm12692_vm6 }
 0x4fe   : > { %v5215_v48 = vrot.slane %v5213_v14, 4  ;;  %v4056_v0 = vsel %vm1531_vm4, %v4046_v2, %v4055_v16  ;;  %v4069_v41 = vrot.slane %v4067_v61, 3  ;;  %v4072_v42 = vrot.slane %v4070_v34, 4  ;;  %v5471_v14 = vld [vmem:[#allocation2 + $0x8] sm:$0xf0] }
 0x4ff   : > { %8531 = vmatmul.mubr.msk.bf16.gmra.mrb[20].mxu0 %vm12692_vm6, %v5190_v30  ;;  %v5072_v8 = vsel %vm12268_vm11, %v11429_v59, 0  ;;  %v4065_v54 = vsel %vm1531_vm4, %v4055_v16, %v4064_v28  ;;  %v5207_v24 = vor.u32 %v5206_v20, %v5203_v56  ;;  %v5773_v2 = vsel %vm4611_vm15, %v11245_v47, 0 }
 0x500   : > { %8534 = vmatprep.mubr.msk.bf16.mxu0 %vm12703_vm10, %v5199_v12  ;;  %v5216_v53 = vor.u32 %v5215_v48, %v5212_v33  ;;  %v5219_v9 = vshrl.u32 %v5072_v8, 16  ;;  %v5222_v35 = vshll.u32 %v5072_v8, 16  ;;  %v4073_v26 = vor.u32 %v4072_v42, %v4069_v41  ;;  %vm12707_vm10 = vmmov %vm12692_vm6  ;;  %v9085_v8 = vld [vmem:[#allocation2 + $0x18] sm:$0xff] }
 0x501   : > { %8467 = vmatmul.mubr.msk.bf16.gmra.mrb[116].mxu1 %vm12704_vm8, %v4056_v0  ;;  %v5208_v6 = vsel %vm1531_vm4, %v5198_v45, %v5207_v24  ;;  %v5824_v4 = vshrl.u32 %v5773_v2, 16  ;;  %v5827_v29 = vshll.u32 %v5773_v2, 16  ;;  %v5774_v13 = vsel %vm12267_vm12, %v11247_v32, 0  ;;  %vm12708_vm8 = vmmov %vm12692_vm6 }
 0x502   : > { %8470 = vmatprep.mubr.msk.bf16.mxu1 %vm12705_vm9, %v4065_v54  ;;  %v5217_v7 = vsel %vm1531_vm4, %v5207_v24, %v5216_v53  ;;  %v5221_v17 = vrot.slane %v5219_v9, 3  ;;  %v5224_v11 = vrot.slane %v5222_v35, 4  ;;  %vm12706_vm9 = vmmov %vm12692_vm6  ;;  %v4074_v63 = vsel %vm1531_vm4, %v4064_v28, %v4073_v26  ;;  %v11475_v35 = vld [vmem:[%s12164_s9 + $0x18] sm:$0xf] }
 0x503   : > { %v5826_v16 = vrot.slane %v5824_v4, 4  ;;  %v5829_v61 = vrot.slane %v5827_v29, 5  ;;  %v5833_v45 = vshrl.u32 %v5774_v13, 16  ;;  %v5836_v34 = vshll.u32 %v5774_v13, 16  ;;  %vm12713_vm11 = vmmov %vm12708_vm8  ;;  %v12731_v29 = vld [vmem:[#allocation15_spill] sm:$0xff]  ;;  %v11529_v13 = vld [vmem:[#allocation2 + $0x58] sm:$0xff] }
 0x504   : > { %v5491_v56 = vrot.slane %v5471_v14, 4  ;;  %v5492_v20 = vrot.slane %v11067_v3, 4  ;;  %v5225_v48 = vor.u32 %v5224_v11, %v5221_v17  ;;  %v5494_v54 = vrot.slane %v9085_v8, 4  ;;  %vm12717_vm13 = vmmov %vm12708_vm8  ;;  %v11525_v17 = vld [vmem:[#allocation2 + $0x28] sm:$0xff]  ;;  %v11527_v11 = vld [vmem:[#allocation2 + $0x30] sm:$0xff] }
 0x505   : > { %v5835_v30 = vrot.slane %v5833_v45, 4  ;;  %v11455_v12 = vor.u32 %v5829_v61, %v5826_v16  ;;  %v5838_v33 = vrot.slane %v5836_v34, 5  ;;  %v5496_v24 = vrot.slane %v11215_v21, 4  ;;  %v11544_v45 = vld [vmem:[#allocation2 + $0x68] sm:$0xff]  ;;  %v11546_v34 = vld [vmem:[#allocation2 + $0x70] sm:$0xff] }
 0x506   : > { %v5226_v41 = vsel %vm1531_vm4, %v5216_v53, %v5225_v48  ;;  %v11489_v2 = vrot.slane %v11277_v44, 4  ;;  %vm12732_vm2 = vcmp.ne.s16.totalorder %v12731_v29, 0  ;;  %v12273_v16 = vrot.slane %v11525_v17, 4  ;;  %v11555_v48 = vld [vmem:[#allocation2 + $0x78] sm:$0xff]  ;;  %v12750_v29 = vld [vmem:[#allocation19_spill] sm:$0xff] }
 0x507   : > { %8535 = vmatmul.mubr.msk.bf16.gmra.mrb[24].mxu0 %vm12692_vm6, %v5208_v6  ;;  %v11457_v0 = vor.u32 %v5838_v33, %v5835_v30  ;;  %vm12709_vm6 = vcmask 1043456   ;;  %v11492_v6 = vrot.slane %v11282_v10, 4  ;;  %v12272_v30 = vrot.slane %v11527_v11, 4 }
 0x508   : > { %8538 = vmatprep.mubr.msk.bf16.mxu0 %vm12706_vm9, %v5217_v7  ;;  %v5493_v28 = vsel %vm12709_vm6, %v5491_v56, %v5492_v20  ;;  %vm12710_vm9 = vmmov %vm12708_vm8  ;;  %v5497_v26 = vsel %vm12709_vm6, %v5494_v54, %v5496_v24  ;;  %12718 = vst [vmem:[#allocation7_spill] sm:$0xff] %v11489_v2  ;;  %v5769_v7 = vsel %vm12732_vm2, %v5471_v14, 0  ;;  %v12734_v14 = vld [vmem:[#allocation29_spill] sm:$0xff]  ;;  %v12271_v56 = vrot.slane %v11529_v13, 4 }
 0x509   : > { %8471 = vmatmul.mubr.msk.bf16.gmra.mrb[120].mxu1 %vm12707_vm10, %v4074_v63  ;;  %v11465_v42 = vsel %vm1386_vm0, %v11455_v12, %v11457_v0  ;;  %vm12711_vm10 = vmmov %vm12709_vm6  ;;  %12719 = vst [vmem:[#allocation8_spill] sm:$0xff] %v11492_v6  ;;  %v11502_v47 = vsel %vm12709_vm6, %v11489_v2, %v11492_v6  ;;  %v11534_v63 = vld [vmem:[#allocation2 + $0x60] sm:$0xff]  ;;  %vm12735_vm2 = vcmp.ne.s16.totalorder %v12734_v14, 0 }
 0x50a   : > { %v5989_v9 = vsel %vm12711_vm10, %v11289_v40, 0  ;;  %vm12712_vm12 = vmmov %vm12709_vm6  ;;  %12721 = vst [vmem:[#allocation9_spill] sm:$0xff] %v11502_v47  ;;  %v5770_v61 = vsel %vm12735_vm2, %v11067_v3, 0  ;;  %v6655_v3 = vrot.slane %v11534_v63, 4 }
 0x50b   : > { %v5495_v53 = vsel %vm12712_vm12, %v5492_v20, %v5494_v54  ;;  %vm12715_vm10 = vmmov %vm12709_vm6  ;;  %v11550_v20 = vld [vmem:[#allocation2 + $0x20] sm:$0xff] }
 0x50c   : > { %v5499_v40 = vsel %vm12715_vm10, %v5496_v24, %v5498_v58  ;;  %vm12716_vm12 = vmmov %vm12708_vm8  ;;  %v11507_v58 = vrot.slane %v11318_v60, 4  ;;  %v5792_v24 = vshll.u32 %v5769_v7, 16 }
 0x50d   : > { %vm12725_vm10 = vmmov %vm12708_vm8 }
 0x50e   : > { %12723 = vst [vmem:[#allocation10_spill] sm:$0xff] %v11507_v58 }
 0x50f   : > { %8539 = vmatmul.mubr.msk.bf16.gmra.mrb[28].mxu0 %vm12708_vm8, %v5226_v41  ;;  %v11557_v41 = vld [vmem:[#allocation2 + $0x88] sm:$0xff] }
 0x510   : > { %8544 = vmatprep.mubr.msk.bf16.mxu0 %vm12710_vm9, %v5493_v28  ;;  %vm12714_vm9 = vmmov %vm12709_vm6  ;;  %v11559_v28 = vld [vmem:[#allocation2 + $0x90] sm:$0xf] }
 0x517   : > { %8545 = vmatmul.mubr.msk.bf16.vlgmr.msra.gmra.mrb[0].mxu0 %vm12708_vm8, %v5495_v53  ;;  %v12741_v53 = vld [vmem:[#allocation5_spill] sm:$0xff] }
 0x518   : > { %8548 = vmatprep.mubr.msk.bf16.mxu0 %vm12713_vm11, %v5497_v26  ;;  %8577 = vmatpush3.bf16.msra.mxu0 %v5989_v9  ;;  %vm12720_vm11 = vmmov %vm12709_vm6  ;;  %v11567_v9 = vld [vmem:[#allocation2 + $0x18] sm:$0xff] }
 0x519   : > { %9049 = vmatprep.subr.msk.bf16.mxu0 %vm12714_vm9, %v11475_v35  ;;  %v5503_v4 = vsel %vm12720_vm11, %v5500_v5, %v11489_v2  ;;  %vm12724_vm9 = vmmov %vm12709_vm6 }
 0x51a   : > { %vm12727_vm11 = vmmov %vm12708_vm8 }
 0x51f   : > { %8549 = vmatmul.mubr.msk.bf16.gmra.mrb[4].mxu0 %vm12716_vm12, %v5499_v40  ;;  %vm12726_vm12 = vmmov %vm12709_vm6  ;;  %v5797_v40 = vshrl.u32 %v5770_v61, 16 }
 0x520   : > { %8552 = vmatprep.mubr.msk.bf16.mxu0 %vm12717_vm13, %v11427_v55  ;;  %vm12722_vm13 = vmmov %vm12708_vm8  ;;  %v5507_v55 = vsel %vm12724_vm9, %v11492_v6, %v11056_v49  ;;  %v5509_v32 = vsel %vm12726_vm12, %v11056_v49, %v11507_v58  ;;  %v11532_v49 = vrot.slane %v11401_v27, 4  ;;  %vm12733_vm9 = vcmp.ne.s16.totalorder %v10518_v1, 0 }
 0x527   : > { %8553 = vmatmul.mubr.msk.bf16.gmra.mrb[8].mxu0 %vm12708_vm8, %v5503_v4  ;;  %vm12728_vm8 = vmmov %vm12709_vm6 }
 0x528   : > { %8556 = vmatprep.mubr.msk.bf16.mxu0 %vm12722_vm13, %v11502_v47  ;;  %v5511_v5 = vsel %vm12728_vm8, %v11507_v58, %v11103_v62  ;;  %vm12729_vm6 = vmmov %vm12725_vm10  ;;  %v5789_v62 = vshrl.u32 %v5769_v7, 16  ;;  %v11574_v1 = vsel %vm12728_vm8, %v12273_v16, %v12272_v30  ;;  %v6667_v7 = vrot.slane %v11559_v28, 4  ;;  %v12755_v58 = vld [vmem:[#allocation6_spill] sm:$0xff] }
 0x529   : > { %vm12730_vm13 = vmmov %vm12729_vm6  ;;  %12740 = vst [vmem:[#allocation25_spill] sm:$0xff] %v11574_v1  ;;  %v5794_v30 = vrot.slane %v5792_v24, 5 }
 0x52a   : > { %vm12738_vm12 = vmmov %vm12729_vm6  ;;  %v5791_v26 = vrot.slane %v5789_v62, 4 }
 0x52f   : > { %8557 = vmatmul.mubr.msk.bf16.gmra.mrb[12].mxu0 %vm12725_vm10, %v5507_v55  ;;  %vm12736_vm10 = vmmov %vm12733_vm9  ;;  %v6659_v55 = vrot.slane %v11546_v34, 4 }
 0x530   : > { %8560 = vmatprep.mubr.msk.bf16.mxu0 %vm12727_vm11, %v5509_v32  ;;  %v6916_v33 = vsel %vm12736_vm10, %v11550_v20, 0  ;;  %vm12739_vm11 = vmmov %vm12728_vm8  ;;  %v12275_v32 = vrot.slane %v11555_v48, 4 }
 0x531   : > { %v5521_v54 = vsel %vm12739_vm11, %v11206_v52, %v11532_v49  ;;  %v6657_v52 = vrot.slane %v11544_v45, 4  ;;  %vm12746_vm10 = vmmov %vm12728_vm8  ;;  %vm12751_vm11 = vcmp.ne.s16.totalorder %v12750_v29, 0 }
 0x533   : > { %v11597_v36 = vsel %vm12746_vm10, %v6657_v52, %v6659_v55 }
 0x534   : > { %12747 = vst [vmem:[#allocation13_spill] sm:$0xff] %v11597_v36 }
 0x537   : > { %8561 = vmatmul.mubr.msk.bf16.gmra.mrb[16].mxu0 %vm12729_vm6, %v5511_v5 }
 0x538   : > { %8564 = vmatprep.mubr.msk.bf16.mxu0 %vm12730_vm13, %v11122_v31  ;;  %v11539_v31 = vsel %vm12733_vm9, %v9085_v8, 0  ;;  %v12737_v8 = vld [vmem:[#allocation4_spill] sm:$0xff]  ;;  %vm12742_vm13 = vmmov %vm12728_vm8 }
 0x539   : > { %v11581_v4 = vsel %vm12742_vm13, %v12271_v56, %v6655_v3  ;;  %vm12744_vm9 = vmmov %vm12728_vm8  ;;  %v6915_v56 = vsel %vm12735_vm2, %v11567_v9, 0  ;;  %v5809_v16 = vshll.u32 %v11539_v31, 16  ;;  %vm12756_vm13 = vcmask 64512  }
 0x53a   : > { %12743 = vst [vmem:[#allocation11_spill] sm:$0xff] %v11581_v4  ;;  %v11590_v62 = vsel %vm12744_vm9, %v6655_v3, %v6657_v52  ;;  %v5772_v3 = vsel %vm12751_vm11, %v11215_v21, 0  ;;  %v6942_v24 = vshrl.u32 %v6915_v56, 16  ;;  %v6951_v4 = vshrl.u32 %v6916_v33, 16  ;;  %vm12757_vm9 = vmmov %vm12756_vm13 }
 0x53b   : > { %12745 = vst [vmem:[#allocation12_spill] sm:$0xff] %v11590_v62  ;;  %v12752_v62 = vrot.slane %v11557_v41, 4  ;;  %v6954_v52 = vshll.u32 %v6916_v33, 16  ;;  %v5818_v1 = vshll.u32 %v5772_v3, 16  ;;  %vm12762_vm2 = vmmov %vm12757_vm9 }
 0x53c   : > { %v6953_v6 = vrot.slane %v6951_v4, 4  ;;  %vm12764_vm10 = vmmov %vm12762_vm2 }
 0x53d   : > { %v11610_v14 = vsel %vm12728_vm8, %v12752_v62, %v6667_v7  ;;  %v6956_v47 = vrot.slane %v6954_v52, 5  ;;  %v5795_v52 = vor.u32 %v5794_v30, %v5791_v26 }
 0x53e   : > { %12753 = vst [vmem:[#allocation27_spill] sm:$0xff] %v11610_v14  ;;  %v5815_v14 = vshrl.u32 %v5772_v3, 16 }
 0x53f   : > { %8565 = vmatmul.mubr.msk.bf16.gmra.mrb[20].mxu0 %vm12738_vm12, %v12737_v8  ;;  %v5800_v8 = vshll.u32 %v5770_v61, 16  ;;  %vm12748_vm12 = vmmov %vm12728_vm8  ;;  %v5799_v61 = vrot.slane %v5797_v40, 4 }
 0x540   : > { %8568 = vmatprep.mubr.msk.bf16.mxu0 %vm12729_vm6, %v12741_v53  ;;  %v5806_v53 = vshrl.u32 %v11539_v31, 16  ;;  %v11602_v5 = vsel %vm12748_vm12, %v6659_v55, %v12275_v32  ;;  %v6945_v31 = vshll.u32 %v6915_v56, 16  ;;  %vm12754_vm6 = vmmov %vm12751_vm11  ;;  %v6944_v32 = vrot.slane %v6942_v24, 4 }
 0x541   : > { %12749 = vst [vmem:[#allocation14_spill] sm:$0xff] %v11602_v5  ;;  %v6917_v36 = vsel %vm12754_vm6, %v11525_v17, 0  ;;  %v5802_v55 = vrot.slane %v5800_v8, 5  ;;  %v6918_v56 = vsel %vm4611_vm15, %v11527_v11, 0  ;;  %v5522_v8 = vrot.slane %v11429_v59, 4  ;;  %vm12760_vm15 = vmmov %vm12728_vm8 }
 0x542   : > { %v6960_v40 = vshrl.u32 %v6917_v36, 16  ;;  %v6963_v5 = vshll.u32 %v6917_v36, 16  ;;  %v6947_v21 = vrot.slane %v6945_v31, 5  ;;  %v6969_v29 = vshrl.u32 %v6918_v56, 16  ;;  %vm12765_vm12 = vmmov %vm12728_vm8 }
 0x543   : > { %v6972_v62 = vshll.u32 %v6918_v56, 16  ;;  %v6957_v36 = vor.u32 %v6956_v47, %v6953_v6  ;;  %v5803_v2 = vor.u32 %v5802_v55, %v5799_v61  ;;  %v5523_v6 = vsel %vm12760_vm15, %v11532_v49, %v5522_v8  ;;  %v12766_v56 = vld [vmem:[#allocation26_spill] sm:$0xff] }
 0x544   : > { %v6962_v33 = vrot.slane %v6960_v40, 4  ;;  %v6965_v7 = vrot.slane %v6963_v5, 5  ;;  %v11622_v24 = vor.u32 %v6947_v21, %v6944_v32  ;;  %v6971_v31 = vrot.slane %v6969_v29, 4 }
 0x545   : > { %v6974_v4 = vrot.slane %v6972_v62, 5  ;;  %v5811_v5 = vrot.slane %v5809_v16, 5  ;;  %v5804_v30 = vsel %vm1386_vm0, %v5795_v52, %v5803_v2  ;;  %v5817_v26 = vrot.slane %v5815_v14, 4  ;;  %v12768_v14 = vld [vmem:[#allocation32_spill] sm:$0xff] }
 0x546   : > { %v11626_v23 = vsel %vm1386_vm0, %v11622_v24, %v6957_v36  ;;  %v5820_v32 = vrot.slane %v5818_v1, 5  ;;  %v6421_v21 = vsel %vm12765_vm12, %v11475_v35, 0  ;;  %vm12767_vm11 = vcmp.ne.s16.totalorder %v12766_v56, 0  ;;  %v12772_v35 = vld [vmem:[#allocation34_spill] sm:$0xff] }
 0x547   : > { %8569 = vmatmul.mubr.msk.bf16.gmra.mrb[24].mxu0 %vm12756_vm13, %v12755_v58  ;;  %v6966_v58 = vor.u32 %v6965_v7, %v6962_v33  ;;  %v11631_v59 = vor.u32 %v6974_v4, %v6971_v31  ;;  %v5775_v33 = vsel %vm12767_vm11, %v11277_v44, 0  ;;  %vm12769_vm8 = vcmp.ne.s16.totalorder %v12768_v14, 0  ;;  %v12770_v31 = vld [vmem:[#allocation33_spill] sm:$0xff]  ;;  %v12774_v44 = vld [vmem:[#allocation36_spill] sm:$0xff]  ;;  %vm12781_vm11 = vmmov %vm12762_vm2 }
 0x548   : > { %8572 = vmatprep.mubr.msk.bf16.mxu0 %vm12757_vm9, %v5521_v54  ;;  %v5808_v54 = vrot.slane %v5806_v53, 4  ;;  %v6923_v53 = vsel %vm4616_vm3, %v11529_v13, 0  ;;  %v6924_v1 = vsel %vm12769_vm8, %v11534_v63, 0  ;;  %v5821_v29 = vor.u32 %v5820_v32, %v5817_v26  ;;  %v11671_v32 = vld [vmem:[%s12164_s9 + $0x1c] sm:$0xf] }
 0x549   : > { %v11629_v40 = vsel %vm1386_vm0, %v6957_v36, %v6966_v58  ;;  %12759 = vst [vmem:[#allocation24_spill] sm:$0xff] %v11631_v59  ;;  %v11637_v47 = vsel %vm1386_vm0, %v6966_v58, %v11631_v59  ;;  %v7014_v3 = vshrl.u32 %v6923_v53, 16  ;;  %v7017_v55 = vshll.u32 %v6923_v53, 16 }
 0x54a   : > { %12758 = vst [vmem:[#allocation16_spill] sm:$0xff] %v11629_v40  ;;  %12761 = vst [vmem:[#allocation17_spill] sm:$0xff] %v11637_v47  ;;  %v5812_v61 = vor.u32 %v5811_v5, %v5808_v54  ;;  %v7023_v8 = vshrl.u32 %v6924_v1, 16  ;;  %v7026_v36 = vshll.u32 %v6924_v1, 16  ;;  %vm12771_vm6 = vcmp.ne.s16.totalorder %v12770_v31, 0  ;;  %v12776_v5 = vld [vmem:[#allocation23_spill] sm:$0xff] }
 0x54b   : > { %v7016_v7 = vrot.slane %v7014_v3, 4  ;;  %v7019_v62 = vrot.slane %v7017_v55, 5  ;;  %v6925_v4 = vsel %vm12771_vm6, %v11544_v45, 0  ;;  %vm12773_vm13 = vcmp.ne.s16.totalorder %v12772_v35, 0  ;;  %vm12784_vm6 = vmmov %vm12762_vm2 }
 0x54c   : > { %v5813_v58 = vsel %vm1386_vm0, %v5803_v2, %v5812_v61  ;;  %v6926_v52 = vsel %vm12773_vm13, %v11546_v34, 0  ;;  %vm12775_vm9 = vcmp.ne.s16.totalorder %v12774_v44, 0  ;;  %vm12777_vm15 = vcmp.ne.s16.totalorder %v12776_v5, 0  ;;  %vm12785_vm13 = vmmov %vm12762_vm2 }
 0x54d   : > { %v6927_v54 = vsel %vm12775_vm9, %v11555_v48, 0  ;;  %v7025_v26 = vrot.slane %v7023_v8, 4  ;;  %v7028_v2 = vrot.slane %v7026_v36, 5  ;;  %v7032_v53 = vshrl.u32 %v6925_v4, 16  ;;  %vm12787_vm9 = vmmov %vm12762_vm2 }
 0x54e   : > { %v7035_v3 = vshll.u32 %v6925_v4, 16  ;;  %v7041_v55 = vshrl.u32 %v6926_v52, 16  ;;  %v7044_v1 = vshll.u32 %v6926_v52, 16  ;;  %v5822_v59 = vsel %vm1386_vm0, %v5812_v61, %v5821_v29 }
 0x54f   : > { %8573 = vmatmul.mubr.msk.bf16.gmra.mrb[28].mxu0 %vm12762_vm2, %v5523_v6  ;;  %v5776_v6 = vsel %vm12777_vm15, %v11282_v10, 0  ;;  %v7029_v47 = vor.u32 %v7028_v2, %v7025_v26  ;;  %v7050_v5 = vshrl.u32 %v6927_v54, 16  ;;  %v7053_v10 = vshll.u32 %v6927_v54, 16 }
 0x550   : > { %8578 = vmatprep.mubr.msk.bf16.mxu0 %vm12764_vm10, %v5804_v30  ;;  %v11666_v30 = vor.u32 %v7019_v62, %v7016_v7  ;;  %vm12778_vm10 = vmmov %vm12762_vm2  ;;  %v7034_v7 = vrot.slane %v7032_v53, 4  ;;  %v7037_v62 = vrot.slane %v7035_v3, 5  ;;  %v7043_v8 = vrot.slane %v7041_v55, 4 }
 0x551   : > { %v7046_v36 = vrot.slane %v7044_v1, 5  ;;  %v7055_v52 = vrot.slane %v7053_v10, 5  ;;  %v5842_v61 = vshrl.u32 %v5775_v33, 16  ;;  %v5845_v26 = vshll.u32 %v5775_v33, 16 }
 0x552   : > { %v11680_v4 = vsel %vm1386_vm0, %v11666_v30, %v7029_v47  ;;  %v7038_v2 = vor.u32 %v7037_v62, %v7034_v7  ;;  %v5851_v40 = vshrl.u32 %v5776_v6, 16  ;;  %v9087_v7 = vld [vmem:[#allocation2 + $0x48] sm:$0xff]  ;;  %vm12788_vm15 = vcmp.ne.s16.totalorder %v12770_v31, 0 }
 0x553   : > { %v7047_v54 = vor.u32 %v7046_v36, %v7043_v8  ;;  %v5844_v33 = vrot.slane %v5842_v61, 4  ;;  %v5847_v1 = vrot.slane %v5845_v26, 5  ;;  %v12782_v62 = vld [vmem:[#allocation28_spill] sm:$0xff]  ;;  %v5778_v8 = vsel %vm4616_vm3, %v11318_v60, 0 }
 0x554   : > { %v11685_v53 = vsel %vm1386_vm0, %v7029_v47, %v7038_v2  ;;  %vm12783_vm8 = vcmp.ne.s16.totalorder %v12782_v62, 0  ;;  %v5872_v61 = vshll.u32 %v5778_v8, 16  ;;  %vm12786_vm3 = vcmp.ne.s16.totalorder %v12768_v14, 0 }
 0x555   : > { %v11688_v3 = vsel %vm1386_vm0, %v7038_v2, %v7047_v54  ;;  %v5777_v47 = vsel %vm12783_vm8, %v9087_v7, 0  ;;  %v5848_v36 = vor.u32 %v5847_v1, %v5844_v33  ;;  %v9089_v33 = vld [vmem:[#allocation2 + $0x60] sm:$0xff]  ;;  %vm12792_vm8 = vmmov %vm12762_vm2 }
 0x556   : > { %v5780_v1 = vsel %vm12788_vm15, %v9089_v33, 0 }
 0x557   : > { %8579 = vmatmul.mubr.msk.bf16.vlgmr.msra.gmra.mrb[0].mxu0 %vm12762_vm2, %v5813_v58  ;;  %v7052_v58 = vrot.slane %v7050_v5, 4  ;;  %v5831_v5 = vsel %vm1386_vm0, %v5821_v29, %v11455_v12  ;;  %v5863_v12 = vshll.u32 %v5777_v47, 16 }
 0x558   : > { %8582 = vmatprep.mubr.msk.bf16.mxu0 %vm12778_vm10, %v5822_v59  ;;  %8611 = vmatpush3.bf16.msra.mxu0 %v6421_v21  ;;  %v5854_v59 = vshll.u32 %v5776_v6, 16  ;;  %v5853_v6 = vrot.slane %v5851_v40, 4  ;;  %v5849_v40 = vsel %vm1386_vm0, %v11457_v0, %v5848_v36  ;;  %vm12789_vm10 = vcmp.ne.s16.totalorder %v12772_v35, 0 }
 0x559   : > { %9050 = vmatprep.subr.msk.bf16.mxu0 %vm12765_vm12, %v11671_v32  ;;  %v11682_v21 = vor.u32 %v7055_v52, %v7052_v58  ;;  %v5860_v58 = vshrl.u32 %v5777_v47, 16  ;;  %v5869_v52 = vshrl.u32 %v5778_v8, 16  ;;  %v5865_v2 = vrot.slane %v5863_v12, 5  ;;  %vm12790_vm12 = vmmov %vm12762_vm2 }
 0x55a   : > { %v5856_v10 = vrot.slane %v5854_v59, 5  ;;  %v5874_v59 = vrot.slane %v5872_v61, 5  ;;  %v5887_v47 = vshrl.u32 %v5780_v1, 16  ;;  %v5890_v8 = vshll.u32 %v5780_v1, 16 }
 0x55b   : > { %12779 = vst [vmem:[#allocation21_spill] sm:$0xff] %v11682_v21  ;;  %v11692_v55 = vsel %vm1386_vm0, %v7047_v54, %v11682_v21  ;;  %v5862_v26 = vrot.slane %v5860_v58, 4 }
 0x55c   : > { %12780 = vst [vmem:[#allocation20_spill] sm:$0xff] %v11692_v55  ;;  %v5857_v29 = vor.u32 %v5856_v10, %v5853_v6  ;;  %v5892_v61 = vrot.slane %v5890_v8, 5 }
 0x55d   : > { %v5866_v6 = vor.u32 %v5865_v2, %v5862_v26  ;;  %v9091_v26 = vld [vmem:[#allocation2 + $0x70] sm:$0xff] }
 0x55e   : > { %v5858_v54 = vsel %vm1386_vm0, %v5848_v36, %v5857_v29 }
 0x55f   : > { %8583 = vmatmul.mubr.msk.bf16.gmra.mrb[4].mxu0 %vm12781_vm11, %v5831_v5  ;;  %v9088_v5 = vld [vmem:[#allocation2 + $0x58] sm:$0xff]  ;;  %v5867_v36 = vsel %vm1386_vm0, %v5857_v29, %v5866_v6  ;;  %vm12791_vm11 = vcmp.ne.s16.totalorder %v12774_v44, 0 }
 0x560   : > { %8586 = vmatprep.mubr.msk.bf16.mxu0 %vm12784_vm6, %v11465_v42  ;;  %v5871_v42 = vrot.slane %v5869_v52, 4  ;;  %v5779_v16 = vsel %vm12786_vm3, %v9088_v5, 0  ;;  %v5889_v52 = vrot.slane %v5887_v47, 4  ;;  %v5782_v2 = vsel %vm12791_vm11, %v9091_v26, 0  ;;  %v9092_v47 = vld [vmem:[#allocation2 + $0x78] sm:$0xff]  ;;  %vm12794_vm6 = vmmov %vm12762_vm2 }
 0x561   : > { %v5878_v0 = vshrl.u32 %v5779_v16, 16  ;;  %v5881_v10 = vshll.u32 %v5779_v16, 16  ;;  %v5905_v5 = vshrl.u32 %v5782_v2, 16  ;;  %v5908_v16 = vshll.u32 %v5782_v2, 16  ;;  %vm12797_vm3 = vmmov %vm12762_vm2 }
 0x562   : > { %v5875_v7 = vor.u32 %v5874_v59, %v5871_v42  ;;  %v5893_v59 = vor.u32 %v5892_v61, %v5889_v52  ;;  %v5783_v44 = vsel %vm4621_vm7, %v9092_v47, 0 }
 0x563   : > { %v5880_v58 = vrot.slane %v5878_v0, 4  ;;  %v5883_v12 = vrot.slane %v5881_v10, 5  ;;  %v5907_v0 = vrot.slane %v5905_v5, 4  ;;  %v5910_v10 = vrot.slane %v5908_v16, 5  ;;  %v6184_v16 = vld [vmem:[#allocation2 + $0x10] sm:$0xf8] }
 0x564   : > { %v5876_v14 = vsel %vm1386_vm0, %v5866_v6, %v5875_v7  ;;  %v12901_v8 = vld [vmem:[#allocation20_spill] sm:$0xff] }
 0x565   : > { %v5911_v52 = vor.u32 %v5910_v10, %v5907_v0  ;;  %v12802_v0 = vld [vmem:[#allocation18_spill] sm:$0xff] }
 0x567   : > { %8587 = vmatmul.mubr.msk.bf16.gmra.mrb[8].mxu0 %vm12785_vm13, %v5849_v40  ;;  %v9090_v40 = vld [vmem:[#allocation2 + $0x68] sm:$0xff] }
 0x568   : > { %8590 = vmatprep.mubr.msk.bf16.mxu0 %vm12787_vm9, %v5858_v54  ;;  %v5781_v31 = vsel %vm12789_vm10, %v9090_v40, 0  ;;  %v5884_v54 = vor.u32 %v5883_v12, %v5880_v58  ;;  %vm12798_vm9 = vmmov %vm12762_vm2 }
 0x569   : > { %v5896_v29 = vshrl.u32 %v5781_v31, 16  ;;  %v5899_v42 = vshll.u32 %v5781_v31, 16  ;;  %vm12804_vm10 = vmmov %vm12797_vm3 }
 0x56a   : > { %v5885_v33 = vsel %vm1386_vm0, %v5875_v7, %v5884_v54  ;;  %v5894_v35 = vsel %vm1386_vm0, %v5884_v54, %v5893_v59  ;;  %v5914_v7 = vshrl.u32 %v5783_v44, 16  ;;  %v5768_v54 = vld [vmem:[#allocation2 + $0x88] sm:$0x1f] }
 0x56b   : > { %v5898_v1 = vrot.slane %v5896_v29, 4  ;;  %v5901_v6 = vrot.slane %v5899_v42, 5 }
 0x56c   : > { %v5916_v26 = vrot.slane %v5914_v7, 4 }
 0x56d   : > { %v5902_v12 = vor.u32 %v5901_v6, %v5898_v1 }
 0x56f   : > { %8591 = vmatmul.mubr.msk.bf16.gmra.mrb[12].mxu0 %vm12762_vm2, %v5867_v36  ;;  %v12795_v36 = vld [vmem:[#allocation42_spill] sm:$0xff]  ;;  %v5903_v31 = vsel %vm1386_vm0, %v5893_v59, %v5902_v12  ;;  %v5912_v29 = vsel %vm1386_vm0, %v5902_v12, %v5911_v52  ;;  %vm12803_vm2 = vcmp.ne.s16.totalorder %v12802_v0, 0 }
 0x570   : > { %8594 = vmatprep.mubr.msk.bf16.mxu0 %vm12790_vm12, %v5876_v14  ;;  %vm12796_vm13 = vcmp.ne.s16.totalorder %v12795_v36, 0  ;;  %v5917_v14 = vshll.u32 %v5783_v44, 16  ;;  %v6201_v10 = vsel %vm12803_vm2, %v6184_v16, 0  ;;  %vm12806_vm12 = vmmov %vm12797_vm3 }
 0x571   : > { %v5784_v58 = vsel %vm12796_vm13, %v11401_v27, 0  ;;  %vm12812_vm13 = vcmask 1043456  }
 0x572   : > { %v5923_v61 = vshrl.u32 %v5784_v58, 16  ;;  %v5926_v40 = vshll.u32 %v5784_v58, 16  ;;  %v5919_v2 = vrot.slane %v5917_v14, 5  ;;  %v6221_v14 = vshrl.u32 %v6201_v10, 16  ;;  %vm12817_vm2 = vmmov %vm12812_vm13 }
 0x574   : > { %v5925_v42 = vrot.slane %v5923_v61, 4  ;;  %v5928_v5 = vrot.slane %v5926_v40, 5  ;;  %v5920_v59 = vor.u32 %v5919_v2, %v5916_v26  ;;  %v6224_v61 = vshll.u32 %v6201_v10, 16 }
 0x575   : > { %v6203_v2 = vsel %vm3625_vm14, %v11550_v20, 0  ;;  %vm12809_vm14 = vmmov %vm12797_vm3 }
 0x576   : > { %v5929_v47 = vor.u32 %v5928_v5, %v5925_v42  ;;  %v5921_v40 = vsel %vm1386_vm0, %v5911_v52, %v5920_v59  ;;  %v12807_v5 = vld [vmem:[#allocation43_spill] sm:$0xff]  ;;  %v6226_v52 = vrot.slane %v6224_v61, 4  ;;  %v6241_v0 = vshll.u32 %v6203_v2, 16  ;;  %v11758_v61 = vld [vmem:[#allocation2 + $0x38] sm:$0xff] }
 0x577   : > { %8595 = vmatmul.mubr.msk.bf16.gmra.mrb[16].mxu0 %vm12792_vm8, %v5885_v33  ;;  %v12799_v33 = vld [vmem:[#allocation31_spill] sm:$0xff]  ;;  %vm12808_vm11 = vcmp.ne.s16.totalorder %v12807_v5, 0  ;;  %vm12810_vm8 = vmmov %vm12797_vm3 }
 0x578   : > { %8598 = vmatprep.mubr.msk.bf16.mxu0 %vm12794_vm6, %v5894_v35  ;;  %vm12800_vm15 = vcmp.ne.s16.totalorder %v12799_v33, 0  ;;  %v5785_v35 = vsel %vm4623_vm5, %v5768_v54, 0  ;;  %v6204_v16 = vsel %vm12808_vm11, %v11525_v17, 0  ;;  %v6243_v55 = vrot.slane %v6241_v0, 4 }
 0x579   : > { %v6202_v1 = vsel %vm12800_vm15, %v11567_v9, 0  ;;  %v5932_v12 = vshrl.u32 %v5785_v35, 16  ;;  %v5935_v7 = vshll.u32 %v5785_v35, 16  ;;  %v6238_v35 = vshrl.u32 %v6203_v2, 16 }
 0x57a   : > { %v6229_v44 = vshrl.u32 %v6202_v1, 16  ;;  %v6232_v58 = vshll.u32 %v6202_v1, 16  ;;  %v6223_v1 = vrot.slane %v6221_v14, 3  ;;  %v6205_v14 = vsel %vm3627_vm1, %v11527_v11, 0  ;;  %vm12813_vm1 = vmmov %vm12797_vm3 }
 0x57b   : > { %v5934_v54 = vrot.slane %v5932_v12, 4  ;;  %v5937_v42 = vrot.slane %v5935_v7, 5  ;;  %v6240_v21 = vrot.slane %v6238_v35, 3  ;;  %vm12811_vm6 = vcmp.ne.s16.totalorder %v10796_v15, 0  ;;  %v11771_v15 = vld [vmem:[%s12164_s9 + $0x20] sm:$0xf]  ;;  %vm12820_vm11 = vmmov %vm12813_vm1 }
 0x57c   : > { %v6234_v33 = vrot.slane %v6232_v58, 4  ;;  %v6259_v2 = vshll.u32 %v6205_v14, 16  ;;  %vm12816_vm15 = vcmp.ne.s16.totalorder %v10804_v46, 0 }
 0x57d   : > { %v5938_v58 = vor.u32 %v5937_v42, %v5934_v54 }
 0x57e   : > { %v6261_v35 = vrot.slane %v6259_v2, 4 }
 0x57f   : > { %8599 = vmatmul.mubr.msk.bf16.gmra.mrb[20].mxu0 %vm12797_vm3, %v5903_v31  ;;  %v5930_v31 = vsel %vm1386_vm0, %v5920_v59, %v5929_v47  ;;  %v6247_v59 = vshrl.u32 %v6204_v16, 16  ;;  %v5939_v26 = vsel %vm1386_vm0, %v5929_v47, %v5938_v58  ;;  %v6206_v47 = vsel %vm12811_vm6, %v11758_v61, 0 }
 0x580   : > { %8602 = vmatprep.mubr.msk.bf16.mxu0 %vm12798_vm9, %v5912_v29  ;;  %v6231_v29 = vrot.slane %v6229_v44, 3  ;;  %v6250_v44 = vshll.u32 %v6204_v16, 16  ;;  %v6265_v42 = vshrl.u32 %v6206_v47, 16  ;;  %v6268_v5 = vshll.u32 %v6206_v47, 16  ;;  %vm12815_vm9 = vmmov %vm12813_vm1 }
 0x581   : > { %v6249_v7 = vrot.slane %v6247_v59, 3  ;;  %v6718_v16 = vsel %vm12812_vm13, %v11671_v32, 0  ;;  %v11775_v59 = vld [vmem:[#allocation2 + $0x40] sm:$0xff]  ;;  %vm12814_vm3 = vcmp.ne.s16.totalorder %v10799_v19, 0  ;;  %vm12823_vm6 = vcmp.ne.s16.totalorder %v10881_v37, 0  ;;  %vm12824_vm13 = vmmov %vm12813_vm1 }
 0x582   : > { %v6235_v10 = vor.u32 %v6234_v33, %v6231_v29  ;;  %v6244_v29 = vor.u32 %v6243_v55, %v6240_v21  ;;  %v6256_v33 = vshrl.u32 %v6205_v14, 16  ;;  %v6267_v55 = vrot.slane %v6265_v42, 3 }
 0x583   : > { %v6270_v0 = vrot.slane %v6268_v5, 4  ;;  %v6207_v32 = vsel %vm12814_vm3, %v11775_v59, 0 }
 0x584   : > { %v6245_v43 = vsel %vm1531_vm4, %v6235_v10, %v6244_v29  ;;  %v6274_v58 = vshrl.u32 %v6207_v32, 16 }
 0x586   : > { %v6276_v19 = vrot.slane %v6274_v58, 3  ;;  %v6211_v58 = vsel %vm12823_vm6, %v11534_v63, 0  ;;  %vm12835_vm6 = vcmp.ne.s16.totalorder %v11346_v50, 0 }
 0x587   : > { %8603 = vmatmul.mubr.msk.bf16.gmra.mrb[24].mxu0 %vm12804_vm10, %v5921_v40  ;;  %v6227_v40 = vor.u32 %v6226_v52, %v6223_v1  ;;  %v11765_v1 = vld [vmem:[#allocation2 + $0x48] sm:$0xff]  ;;  %v6258_v52 = vrot.slane %v6256_v33, 3  ;;  %vm12818_vm10 = vmmov %vm12813_vm1 }
 0x588   : > { %8606 = vmatprep.mubr.msk.bf16.mxu0 %vm12806_vm12, %v5930_v31  ;;  %v6252_v31 = vrot.slane %v6250_v44, 4  ;;  %vm12819_vm12 = vcmp.ne.s16.totalorder %v10808_v22, 0 }
 0x589   : > { %v6236_v12 = vsel %vm1531_vm4, %v6227_v40, %v6235_v10  ;;  %v6208_v10 = vsel %vm12816_vm15, %v11765_v1, 0  ;;  %v6262_v44 = vor.u32 %v6261_v35, %v6258_v52  ;;  %v6277_v40 = vshll.u32 %v6207_v32, 16 }
 0x58a   : > { %v6253_v54 = vor.u32 %v6252_v31, %v6249_v7  ;;  %v6286_v7 = vshll.u32 %v6208_v10, 16  ;;  %v6209_v33 = vsel %vm12819_vm12, %v11318_v60, 0  ;;  %vm12831_vm12 = vcmp.ne.s16.totalorder %v11353_v38, 0 }
 0x58b   : > { %v6279_v14 = vrot.slane %v6277_v40, 4  ;;  %v6295_v5 = vshll.u32 %v6209_v33, 16 }
 0x58c   : > { %v6254_v21 = vsel %vm1531_vm4, %v6244_v29, %v6253_v54  ;;  %v6263_v31 = vsel %vm1531_vm4, %v6253_v54, %v6262_v44  ;;  %v6288_v46 = vrot.slane %v6286_v7, 4  ;;  %v6292_v54 = vshrl.u32 %v6209_v33, 16 }
 0x58d   : > { %v6280_v42 = vor.u32 %v6279_v14, %v6276_v19  ;;  %v6313_v7 = vshll.u32 %v6211_v58, 16 }
 0x58e   : > { %v6294_v60 = vrot.slane %v6292_v54, 3 }
 0x58f   : > { %8607 = vmatmul.mubr.msk.bf16.gmra.mrb[28].mxu0 %vm12809_vm14, %v5939_v26  ;;  %v6271_v26 = vor.u32 %v6270_v0, %v6267_v55  ;;  %vm12821_vm14 = vcmp.ne.s16.totalorder %v10865_v18, 0  ;;  %v6297_v0 = vrot.slane %v6295_v5, 4  ;;  %v6315_v33 = vrot.slane %v6313_v7, 4 }
 0x590   : > { %8612 = vmatprep.mubr.msk.bf16.mxu0 %vm12810_vm8, %v6236_v12  ;;  %v6283_v12 = vshrl.u32 %v6208_v10, 16  ;;  %v6210_v2 = vsel %vm12821_vm14, %v11529_v13, 0  ;;  %vm12822_vm8 = vmmov %vm12813_vm1  ;;  %v6215_v7 = vsel %vm12831_vm12, %v11401_v27, 0  ;;  %vm12833_vm14 = vcmp.ne.s16.totalorder %v11376_v51, 0 }
 0x591   : > { %v6272_v47 = vsel %vm1531_vm4, %v6262_v44, %v6271_v26  ;;  %v6304_v52 = vshll.u32 %v6210_v2, 16  ;;  %v6281_v22 = vsel %vm1531_vm4, %v6271_v26, %v6280_v42  ;;  %v6298_v26 = vor.u32 %v6297_v0, %v6294_v60  ;;  %vm12826_vm3 = vmmov %vm12822_vm8 }
 0x592   : > { %v6285_v29 = vrot.slane %v6283_v12, 3  ;;  %v6310_v12 = vshrl.u32 %v6211_v58, 16  ;;  %vm12828_vm15 = vmmov %vm12826_vm3 }
 0x593   : > { %v6306_v44 = vrot.slane %v6304_v52, 4 }
 0x594   : > { %v6312_v63 = vrot.slane %v6310_v12, 3 }
 0x597   : > { %8613 = vmatmul.mubr.msk.bf16.vlgmr.msra.gmra.mrb[0].mxu0 %vm12813_vm1, %v6245_v43  ;;  %v6301_v43 = vshrl.u32 %v6210_v2, 16  ;;  %vm12825_vm1 = vcmp.ne.s16.totalorder %v10999_v57, 0 }
 0x598   : > { %8616 = vmatprep.mubr.msk.bf16.mxu0 %vm12815_vm9, %v6254_v21  ;;  %8645 = vmatpush3.bf16.msra.mxu0 %v6718_v16  ;;  %v6289_v16 = vor.u32 %v6288_v46, %v6285_v29  ;;  %v6212_v40 = vsel %vm12825_vm1, %v11544_v45, 0  ;;  %vm12827_vm9 = vcmp.ne.s16.totalorder %v11316_v39, 0  ;;  %vm12837_vm1 = vmmov %vm12826_vm3 }
 0x599   : > { %9051 = vmatprep.subr.msk.bf16.mxu0 %vm12817_vm2, %v11771_v15  ;;  %v6303_v10 = vrot.slane %v6301_v43, 3  ;;  %v6319_v19 = vshrl.u32 %v6212_v40, 16  ;;  %v6322_v14 = vshll.u32 %v6212_v40, 16  ;;  %v6213_v54 = vsel %vm12827_vm9, %v11546_v34, 0  ;;  %vm12839_vm9 = vmmov %vm12837_vm1 }
 0x59a   : > { %v6290_v32 = vsel %vm1531_vm4, %v6280_v42, %v6289_v16  ;;  %v6299_v37 = vsel %vm1531_vm4, %v6289_v16, %v6298_v26  ;;  %vm12829_vm2 = vcmp.ne.s16.totalorder %v11322_v25, 0  ;;  %v6316_v16 = vor.u32 %v6315_v33, %v6312_v63  ;;  %vm12844_vm12 = vmmov %vm12837_vm1 }
 0x59b   : > { %v6321_v2 = vrot.slane %v6319_v19, 3  ;;  %v6324_v42 = vrot.slane %v6322_v14, 4  ;;  %v6214_v5 = vsel %vm12829_vm2, %v11555_v48, 0  ;;  %v6328_v43 = vshrl.u32 %v6213_v54, 16  ;;  %vm12841_vm2 = vmmov %vm12837_vm1 }
 0x59c   : > { %v6331_v52 = vshll.u32 %v6213_v54, 16  ;;  %v6337_v60 = vshrl.u32 %v6214_v5, 16  ;;  %v6340_v0 = vshll.u32 %v6214_v5, 16  ;;  %v6346_v14 = vshrl.u32 %v6215_v7, 16 }
 0x59d   : > { %v6330_v34 = vrot.slane %v6328_v43, 3  ;;  %v6217_v43 = vsel %vm12835_vm6, %v11559_v28, 0 }
 0x59e   : > { %v6333_v58 = vrot.slane %v6331_v52, 4  ;;  %v6342_v12 = vrot.slane %v6340_v0, 4  ;;  %v6348_v27 = vrot.slane %v6346_v14, 3 }
 0x59f   : > { %8617 = vmatmul.mubr.msk.bf16.gmra.mrb[4].mxu0 %vm12818_vm10, %v6263_v31  ;;  %v6307_v31 = vor.u32 %v6306_v44, %v6303_v10  ;;  %vm12830_vm10 = vmmov %vm12826_vm3 }
 0x5a0   : > { %8620 = vmatprep.mubr.msk.bf16.mxu0 %vm12820_vm11, %v6272_v47  ;;  %vm12832_vm11 = vmmov %vm12826_vm3  ;;  %v6334_v19 = vor.u32 %v6333_v58, %v6330_v34  ;;  %v6367_v34 = vshll.u32 %v6217_v43, 16 }
 0x5a1   : > { %v6308_v45 = vsel %vm1531_vm4, %v6298_v26, %v6307_v31  ;;  %v6317_v39 = vsel %vm1531_vm4, %v6307_v31, %v6316_v16  ;;  %v6339_v26 = vrot.slane %v6337_v60, 3  ;;  %v6216_v31 = vsel %vm12833_vm14, %v11557_v41, 0  ;;  %vm12847_vm14 = vmmov %vm12837_vm1 }
 0x5a3   : > { %v11796_v35 = vpop.f32.mrb[92].mxu1  ;;  %v6343_v63 = vor.u32 %v6342_v12, %v6339_v26 }
 0x5a4   : > { %v11798_v21 = vpop.f32.mrb[93].mxu1 }
 0x5a5   : > { %v11800_v55 = vpop.f32.mrb[94].mxu1  ;;  %v6344_v51 = vsel %vm1531_vm4, %v6334_v19, %v6343_v63 }
 0x5a6   : > { %v11804_v18 = vpop.f32.mrb[95].mxu1 }
 0x5a7   : > { %8621 = vmatmul.mubr.msk.bf16.gmra.mrb[8].mxu0 %vm12822_vm8, %v6281_v22  ;;  %v6325_v22 = vor.u32 %v6324_v42, %v6321_v2  ;;  %v6355_v2 = vshrl.u32 %v6216_v31, 16  ;;  %v6358_v42 = vshll.u32 %v6216_v31, 16  ;;  %vm12834_vm8 = vmmov %vm12826_vm3  ;;  %v6637_v31 = vrot.slane %v11567_v9, 4 }
 0x5a8   : > { %8624 = vmatprep.mubr.msk.bf16.mxu0 %vm12824_vm13, %v6290_v32  ;;  %vm12836_vm13 = vmmov %vm12826_vm3 }
 0x5a9   : > { %v6326_v40 = vsel %vm1531_vm4, %v6316_v16, %v6325_v22  ;;  %v6335_v38 = vsel %vm1531_vm4, %v6325_v22, %v6334_v19  ;;  %v6357_v52 = vrot.slane %v6355_v2, 3  ;;  %v6360_v60 = vrot.slane %v6358_v42, 4 }
 0x5aa   : > { %v6369_v19 = vrot.slane %v6367_v34, 4 }
 0x5ac   : > { %v11814_v47 = vpop.f32.mrb[96].mxu1 }
 0x5ad   : > { %v11816_v29 = vpop.f32.mrb[97].mxu1 }
 0x5ae   : > { %v11818_v46 = vpop.f32.mrb[98].mxu1 }
 0x5af   : > { %8625 = vmatmul.mubr.msk.bf16.gmra.mrb[12].mxu0 %vm12826_vm3, %v6299_v37  ;;  %v11822_v57 = vpop.f32.mrb[99].mxu1  ;;  %v6349_v37 = vshll.u32 %v6215_v7, 16  ;;  %vm12838_vm3 = vmmov %vm12837_vm1 }
 0x5b0   : > { %8628 = vmatprep.mubr.msk.bf16.mxu0 %vm12828_vm15, %v6308_v45  ;;  %vm12840_vm15 = vcmask 1043456  }
 0x5b1   : > { %v6351_v5 = vrot.slane %v6349_v37, 4  ;;  %v6616_v37 = vld [vmem:[#allocation2 + $0x10] sm:$0xf0] }
 0x5b3   : > { %v6352_v0 = vor.u32 %v6351_v5, %v6348_v27 }
 0x5b4   : > { %v11832_v32 = vpop.f32.mrb[100].mxu1 }
 0x5b5   : > { %v11834_v10 = vpop.f32.mrb[101].mxu1  ;;  %v6353_v12 = vsel %vm1531_vm4, %v6343_v63, %v6352_v0 }
 0x5b6   : > { %v11836_v44 = vpop.f32.mrb[102].mxu1 }
 0x5b7   : > { %8629 = vmatmul.mubr.msk.bf16.gmra.mrb[16].mxu0 %vm12830_vm10, %v6317_v39  ;;  %v11840_v25 = vpop.f32.mrb[103].mxu1  ;;  %v6364_v39 = vshrl.u32 %v6217_v43, 16  ;;  %v6639_v43 = vrot.slane %v11550_v20, 4  ;;  %vm12842_vm10 = vmmov %vm12840_vm15 }
 0x5b8   : > { %8632 = vmatprep.mubr.msk.bf16.mxu0 %vm12832_vm11, %v6326_v40  ;;  %v6361_v40 = vor.u32 %v6360_v60, %v6357_v52  ;;  %v7134_v60 = vsel %vm12842_vm10, %v11771_v15, 0 }
 0x5b9   : > { %v6366_v7 = vrot.slane %v6364_v39, 3 }
 0x5ba   : > { %v6362_v28 = vsel %vm1531_vm4, %v6352_v0, %v6361_v40 }
 0x5bb   : > { %v6370_v14 = vor.u32 %v6369_v19, %v6366_v7  ;;  %v12848_v19 = vld [vmem:[#allocation25_spill] sm:$0xff] }
 0x5bc   : > { %v11850_v33 = vpop.f32.mrb[104].mxu1 }
 0x5bd   : > { %v11852_v45 = vpop.f32.mrb[105].mxu1  ;;  %v6371_v27 = vsel %vm1531_vm4, %v6361_v40, %v6370_v14  ;;  %vm12843_vm4 = vmmov %vm12842_vm10  ;;  %v12845_v40 = vrot.slane %v11525_v17, 4  ;;  %v12850_v14 = vld [vmem:[#allocation7_spill] sm:$0xff] }
 0x5be   : > { %v11854_v54 = vpop.f32.mrb[106].mxu1  ;;  %v6640_v39 = vsel %vm12843_vm4, %v6637_v31, %v6639_v43  ;;  %vm12846_vm11 = vmmov %vm12843_vm4 }
 0x5bf   : > { %8633 = vmatmul.mubr.msk.bf16.gmra.mrb[20].mxu0 %vm12834_vm8, %v6335_v38  ;;  %v11858_v16 = vpop.f32.mrb[107].mxu1  ;;  %v6636_v38 = vrot.slane %v6616_v37, 4  ;;  %vm12849_vm8 = vmmov %vm12837_vm1 }
 0x5c0   : > { %8636 = vmatprep.mubr.msk.bf16.mxu0 %vm12836_vm13, %v6344_v51  ;;  %vm12852_vm6 = vmmov %vm12843_vm4 }
 0x5c1   : > { %v6638_v51 = vsel %vm12840_vm15, %v6636_v38, %v6637_v31  ;;  %v12851_v31 = vrot.slane %v11527_v11, 4  ;;  %vm12853_vm13 = vmmov %vm12837_vm1  ;;  %v6649_v38 = vrot.slane %v11765_v1, 4  ;;  %v12861_v11 = vrot.slane %v11529_v13, 4 }
 0x5c3   : > { %v6646_v17 = vsel %vm12852_vm6, %v12851_v31, %v12850_v14  ;;  %v12868_v14 = vld [vmem:[#allocation13_spill] sm:$0xff]  ;;  %v12870_v31 = vld [vmem:[#allocation14_spill] sm:$0xff] }
 0x5c4   : > { %v11865_v22 = vpop.f32.mrb[108].mxu1 }
 0x5c5   : > { %v11867_v58 = vpop.f32.mrb[109].mxu1 }
 0x5c6   : > { %v11869_v26 = vpop.f32.mrb[110].mxu1 }
 0x5c7   : > { %8637 = vmatmul.mubr.msk.bf16.gmra.mrb[24].mxu0 %vm12837_vm1, %v6353_v12  ;;  %v11873_v50 = vpop.f32.mrb[111].mxu1  ;;  %v6642_v12 = vsel %vm12846_vm11, %v6639_v43, %v12845_v40  ;;  %vm12867_vm11 = vmmov %vm12837_vm1 }
 0x5c8   : > { %8640 = vmatprep.mubr.msk.bf16.mxu0 %vm12838_vm3, %v6362_v28  ;;  %vm12856_vm3 = vmmov %vm12843_vm4 }
 0x5c9   : > { %vm12859_vm15 = vmmov %vm12856_vm3 }
 0x5ca   : > { %vm12862_vm10 = vmmov %vm12856_vm3 }
 0x5cb   : > { %vm12863_vm4 = vmmov %vm12837_vm1 }
 0x5cc   : > { %v11878_v2 = vpop.f32.mrb[112].mxu1 }
 0x5cd   : > { %v11880_v42 = vpop.f32.mrb[113].mxu1 }
 0x5ce   : > { %v11882_v63 = vpop.f32.mrb[114].mxu1 }
 0x5cf   : > { %8641 = vmatmul.mubr.msk.bf16.gmra.mrb[28].mxu0 %vm12839_vm9, %v6371_v27  ;;  %v11886_v5 = vpop.f32.mrb[115].mxu1  ;;  %v12854_v27 = vld [vmem:[#allocation9_spill] sm:$0xff]  ;;  %vm12857_vm9 = vmmov %vm12837_vm1 }
 0x5d0   : > { %8646 = vmatprep.mubr.msk.bf16.mxu0 %vm12841_vm2, %v6638_v51  ;;  %v12855_v51 = vld [vmem:[#allocation8_spill] sm:$0xff]  ;;  %vm12860_vm2 = vmmov %vm12837_vm1 }
 0x5d1   : > { %v6650_v43 = vsel %vm12856_vm3, %v12855_v51, %v6649_v38  ;;  %v12874_v51 = vrot.slane %v11555_v48, 4 }
 0x5d4   : > { %v11891_v9 = vpop.f32.mrb[116].mxu1 }
 0x5d5   : > { %v11893_v52 = vpop.f32.mrb[117].mxu1 }
 0x5d6   : > { %v11897_v0 = vpop.f32.mrb[118].mxu1 }
 0x5d7   : > { %8647 = vmatmul.mubr.msk.bf16.vlgmr.msra.gmra.mrb[0].mxu0 %vm12844_vm12, %v6640_v39  ;;  %v11901_v34 = vpop.f32.mrb[119].mxu1  ;;  %vm12865_vm12 = vmmov %vm12837_vm1 }
 0x5d8   : > { %8650 = vmatprep.mubr.msk.bf16.mxu0 %vm12847_vm14, %v6642_v12  ;;  %8679 = vmatpush3.bf16.msra.mxu0 %v7134_v60  ;;  %v12858_v60 = vld [vmem:[#allocation10_spill] sm:$0xff]  ;;  %v12864_v12 = vld [vmem:[#allocation11_spill] sm:$0xff]  ;;  %vm12869_vm14 = vmmov %vm12837_vm1 }
 0x5d9   : > { %v6652_v39 = vsel %vm12859_vm15, %v6649_v38, %v12858_v60  ;;  %v6654_v40 = vsel %vm12862_vm10, %v12858_v60, %v12861_v11  ;;  %v12876_v60 = vrot.slane %v11557_v41, 4  ;;  %vm12879_vm15 = vmmov %vm12837_vm1 }
 0x5dc   : > { %v11907_v20 = vpop.f32.mrb[120].mxu1 }
 0x5dd   : > { %v11909_v7 = vpop.f32.mrb[121].mxu1 }
 0x5de   : > { %v11911_v15 = vpop.f32.mrb[122].mxu1 }
 0x5df   : > { %8651 = vmatmul.mubr.msk.bf16.gmra.mrb[4].mxu0 %vm12849_vm8, %v12848_v19  ;;  %v11915_v28 = vpop.f32.mrb[123].mxu1  ;;  %v12866_v19 = vld [vmem:[#allocation12_spill] sm:$0xff]  ;;  %vm12871_vm8 = vmmov %vm12837_vm1 }
 0x5e0   : > { %8654 = vmatprep.mubr.msk.bf16.mxu0 %vm12853_vm13, %v6646_v17  ;;  %v12872_v17 = vld [vmem:[#allocation15_spill] sm:$0xff]  ;;  %vm12875_vm13 = vmmov %vm12856_vm3 }
 0x5e1   : > { %vm12873_vm6 = vcmp.ne.s16.totalorder %v12872_v17, 0 }
 0x5e2   : > { %v6914_v13 = vsel %vm12873_vm6, %v6616_v37, 0  ;;  %v12878_v37 = vld [vmem:[#allocation27_spill] sm:$0xff]  ;;  %vm12892_vm6 = vcmp.ne.s16.totalorder %v12782_v62, 0 }
 0x5e3   : > { %v6934_v38 = vshrl.u32 %v6914_v13, 16 }
 0x5e5   : > { %v6936_v11 = vrot.slane %v6934_v38, 4 }
 0x5e7   : > { %8655 = vmatmul.mubr.msk.bf16.gmra.mrb[8].mxu0 %vm12837_vm1, %v12854_v27  ;;  %v6937_v27 = vshll.u32 %v6914_v13, 16 }
 0x5e8   : > { %8658 = vmatprep.mubr.msk.bf16.mxu0 %vm12857_vm9, %v6650_v43  ;;  %v6664_v43 = vsel %vm12875_vm13, %v12874_v51, %v11532_v49  ;;  %vm12877_vm9 = vmmov %vm12837_vm1 }
 0x5e9   : > { %vm12893_vm13 = vmmov %vm12837_vm1 }
 0x5ef   : > { %8659 = vmatmul.mubr.msk.bf16.gmra.mrb[12].mxu0 %vm12860_vm2, %v6652_v39  ;;  %v6666_v39 = vsel %vm12856_vm3, %v11532_v49, %v12876_v60  ;;  %vm12880_vm2 = vmmov %vm12837_vm1 }
 0x5f0   : > { %8662 = vmatprep.mubr.msk.bf16.mxu0 %vm12863_vm4, %v6654_v40  ;;  %v6939_v40 = vrot.slane %v6937_v27, 5  ;;  %vm12883_vm4 = vmmov %vm12837_vm1  ;;  %v12885_v27 = vld [vmem:[#allocation16_spill] sm:$0xff] }
 0x5f1   : > { %vm12894_vm3 = vmmov %vm12837_vm1 }
 0x5f7   : > { %8663 = vmatmul.mubr.msk.bf16.gmra.mrb[16].mxu0 %vm12865_vm12, %v12864_v12  ;;  %v6940_v12 = vor.u32 %v6939_v40, %v6936_v11  ;;  %vm12884_vm12 = vcmp.ne.s16.totalorder %v12766_v56, 0 }
 0x5f8   : > { %8666 = vmatprep.mubr.msk.bf16.mxu0 %vm12867_vm11, %v12866_v19  ;;  %v12881_v19 = vld [vmem:[#allocation22_spill] sm:$0xff]  ;;  %v6920_v38 = vsel %vm12884_vm12, %v11775_v59, 0  ;;  %vm12886_vm11 = vmmov %vm12837_vm1 }
 0x5f9   : > { %v6949_v48 = vsel %vm1386_vm0, %v6940_v12, %v11622_v24  ;;  %vm12882_vm10 = vcmp.ne.s16.totalorder %v12881_v19, 0  ;;  %v12887_v24 = vld [vmem:[#allocation23_spill] sm:$0xff]  ;;  %v12889_v12 = vld [vmem:[#allocation17_spill] sm:$0xff]  ;;  %vm12900_vm12 = vmmov %vm12837_vm1 }
 0x5fa   : > { %v9095_v19 = vld [vmem:[#allocation2 + $0x50] sm:$0xff] }
 0x5ff   : > { %8667 = vmatmul.mubr.msk.bf16.gmra.mrb[20].mxu0 %vm12869_vm14, %v12868_v14  ;;  %v6919_v14 = vsel %vm12882_vm10, %v11758_v61, 0  ;;  %vm12888_vm14 = vcmp.ne.s16.totalorder %v12887_v24, 0  ;;  %v6990_v61 = vshll.u32 %v6920_v38, 16  ;;  %vm12898_vm10 = vmmov %vm12837_vm1 }
 0x600   : > { %8670 = vmatprep.mubr.msk.bf16.mxu0 %vm12871_vm8, %v12870_v31  ;;  %v6978_v31 = vshrl.u32 %v6919_v14, 16  ;;  %v6981_v17 = vshll.u32 %v6919_v14, 16  ;;  %v6921_v51 = vsel %vm12888_vm14, %v11765_v1, 0  ;;  %vm12890_vm8 = vmmov %vm12837_vm1  ;;  %v6922_v14 = vsel %vm12892_vm6, %v9095_v19, 0 }
 0x601   : > { %v6999_v11 = vshll.u32 %v6921_v51, 16  ;;  %vm12905_vm14 = vmmov %vm12837_vm1 }
 0x602   : > { %v6980_v49 = vrot.slane %v6978_v31, 4  ;;  %v6983_v13 = vrot.slane %v6981_v17, 5  ;;  %v7005_v31 = vshrl.u32 %v6922_v14, 16  ;;  %v7008_v17 = vshll.u32 %v6922_v14, 16  ;;  %v12903_v14 = vld [vmem:[#allocation21_spill] sm:$0xff] }
 0x604   : > { %v6984_v60 = vor.u32 %v6983_v13, %v6980_v49 }
 0x607   : > { %8671 = vmatmul.mubr.msk.bf16.gmra.mrb[24].mxu0 %vm12837_vm1, %v6664_v43  ;;  %v6987_v43 = vshrl.u32 %v6920_v38, 16  ;;  %v7007_v38 = vrot.slane %v7005_v31, 4 }
 0x608   : > { %8674 = vmatprep.mubr.msk.bf16.mxu0 %vm12877_vm9, %v6666_v39  ;;  %v6996_v39 = vshrl.u32 %v6921_v51, 16  ;;  %vm12895_vm9 = vmmov %vm12837_vm1 }
 0x609   : > { %v6989_v40 = vrot.slane %v6987_v43, 4 }
 0x60a   : > { %v6998_v59 = vrot.slane %v6996_v39, 4 }
 0x60f   : > { %8675 = vmatmul.mubr.msk.bf16.gmra.mrb[28].mxu0 %vm12879_vm15, %v12878_v37  ;;  %v12891_v37 = vld [vmem:[#allocation24_spill] sm:$0xff]  ;;  %vm12896_vm15 = vmmov %vm12837_vm1 }
 0x610   : > { %8680 = vmatprep.mubr.msk.bf16.mxu0 %vm12880_vm2, %v6949_v48  ;;  %v6985_v56 = vsel %vm1386_vm0, %v12891_v37, %v6984_v60  ;;  %v7001_v48 = vrot.slane %v6999_v11, 5  ;;  %vm12897_vm2 = vmmov %vm12837_vm1 }
 0x612   : > { %v7002_v49 = vor.u32 %v7001_v48, %v6998_v59 }
 0x617   : > { %8681 = vmatmul.mubr.msk.bf16.vlgmr.msra.gmra.mrb[0].mxu0 %vm12883_vm4, %v11626_v23  ;;  %v6992_v23 = vrot.slane %v6990_v61, 5  ;;  %v9096_v61 = vld [vmem:[#allocation2 + $0x80] sm:$0xff]  ;;  %vm12899_vm4 = vcmp.ne.s16.totalorder %v12795_v36, 0 }
 0x618   : > { %8684 = vmatprep.mubr.msk.bf16.mxu0 %vm12886_vm11, %v12885_v27  ;;  %v7010_v27 = vrot.slane %v7008_v17, 5  ;;  %vm12904_vm11 = vmmov %vm12837_vm1 }
 0x619   : > { %v6993_v1 = vor.u32 %v6992_v23, %v6989_v40  ;;  %v6929_v40 = vsel %vm12899_vm4, %v11557_v41, 0  ;;  %v6913_v23 = vld [vmem:[#allocation2 + $0x90] sm:$0x1f] }
 0x61a   : > { %v7011_v51 = vor.u32 %v7010_v27, %v7007_v38  ;;  %v12015_v38 = vld [vmem:[%s12165_s10] ss:$0 sm:$0xff] }
 0x61b   : > { %v6994_v13 = vsel %vm1386_vm0, %v6984_v60, %v6993_v1  ;;  %v7003_v24 = vsel %vm1386_vm0, %v6993_v1, %v7002_v49  ;;  %v6928_v60 = vsel %vm4621_vm7, %v9096_v61, 0  ;;  %vm12902_vm7 = vmmov %vm12837_vm1 }
 0x61c   : > { %v7012_v62 = vsel %vm1386_vm0, %v7002_v49, %v7011_v51  ;;  %v7021_v43 = vsel %vm1386_vm0, %v7011_v51, %v11666_v30  ;;  %v7059_v39 = vshrl.u32 %v6928_v60, 16  ;;  %v7062_v11 = vshll.u32 %v6928_v60, 16 }
 0x61d   : > { %v7068_v30 = vshrl.u32 %v6929_v40, 16 }
 0x61e   : > { %v7061_v37 = vrot.slane %v7059_v39, 4 }
 0x61f   : > { %8685 = vmatmul.mubr.msk.bf16.gmra.mrb[4].mxu0 %vm12890_vm8, %v12889_v12  ;;  %v7071_v12 = vshll.u32 %v6929_v40, 16 }
 0x620   : > { %8688 = vmatprep.mubr.msk.bf16.mxu0 %vm12893_vm13, %v6985_v56  ;;  %v7064_v56 = vrot.slane %v7062_v11, 5  ;;  %vm12907_vm13 = vmmov %vm12837_vm1 }
 0x621   : > { %v7073_v59 = vrot.slane %v7071_v12, 5 }
 0x622   : > { %v7065_v48 = vor.u32 %v7064_v56, %v7061_v37 }
 0x624   : > { %v7066_v1 = vsel %vm1386_vm0, %v12903_v14, %v7065_v48 }
 0x627   : > { %8689 = vmatmul.mubr.msk.bf16.gmra.mrb[8].mxu0 %vm12837_vm1, %v6994_v13 }
 0x628   : > { %8692 = vmatprep.mubr.msk.bf16.mxu0 %vm12894_vm3, %v7003_v24  ;;  %vm12908_vm3 = vmmov %vm12897_vm2 }
 0x62f   : > { %8693 = vmatmul.mubr.msk.bf16.gmra.mrb[12].mxu0 %vm12895_vm9, %v7012_v62  ;;  %vm12909_vm9 = vmmov %vm12897_vm2 }
 0x630   : > { %8696 = vmatprep.mubr.msk.bf16.mxu0 %vm12896_vm15, %v7021_v43  ;;  %vm12910_vm15 = vmmov %vm12897_vm2 }
 0x637   : > { %8697 = vmatmul.mubr.msk.bf16.gmra.mrb[16].mxu0 %vm12897_vm2, %v11680_v4  ;;  %v6930_v4 = vsel %vm4623_vm5, %v6913_v23, 0  ;;  %vm12906_vm5 = vmmov %vm12837_vm1 }
 0x638   : > { %8700 = vmatprep.mubr.msk.bf16.mxu0 %vm12898_vm10, %v11685_v53  ;;  %v7070_v53 = vrot.slane %v7068_v30, 4  ;;  %v7077_v19 = vshrl.u32 %v6930_v4, 16  ;;  %v7080_v36 = vshll.u32 %v6930_v4, 16 }
 0x63a   : > { %v7074_v41 = vor.u32 %v7073_v59, %v7070_v53  ;;  %v7079_v31 = vrot.slane %v7077_v19, 4  ;;  %v7082_v17 = vrot.slane %v7080_v36, 5 }
 0x63c   : > { %v7083_v6 = vor.u32 %v7082_v17, %v7079_v31 }
 0x63e   : > { %v7084_v49 = vsel %vm1386_vm0, %v7074_v41, %v7083_v6 }
 0x63f   : > { %8701 = vmatmul.mubr.msk.bf16.gmra.mrb[20].mxu0 %vm12900_vm12, %v11688_v3  ;;  %v7075_v3 = vsel %vm1386_vm0, %v7065_v48, %v7074_v41  ;;  %vm12911_vm12 = vmmov %vm12908_vm3 }
 0x640   : > { %8704 = vmatprep.mubr.msk.bf16.mxu0 %vm12902_vm7, %v12901_v8 }
 0x647   : > { %8705 = vmatmul.mubr.msk.bf16.gmra.mrb[24].mxu0 %vm12904_vm11, %v7066_v1  ;;  %vm12912_vm11 = vmmov %vm12908_vm3 }
 0x648   : > { %8708 = vmatprep.mubr.msk.bf16.mxu0 %vm12905_vm14, %v7075_v3  ;;  %vm12913_vm14 = vmmov %vm12908_vm3 }
 0x64f   : > { %8709 = vmatmul.mubr.msk.bf16.gmra.mrb[28].mxu0 %vm12906_vm5, %v7084_v49  ;;  %vm12914_vm5 = vmmov %vm12908_vm3 }
 0x6ea   : > { %v8682_v13 = vpop.f32.mrb[0].mxu0 }
 0x6eb   : > { %v8712_v27 = vadd.f32 %v8682_v13, %v11796_v35  ;;  %v7170_v24 = vpop.f32.mrb[1].mxu0 }
 0x6ec   : > { %v8713_v51 = vadd.f32 %v7170_v24, %v11798_v21  ;;  %v8683_v62 = vpop.f32.mrb[2].mxu0 }
 0x6ed   : > { %v7338_v43 = vadd.f32 %v8712_v27, %v12015_v38  ;;  %v8714_v61 = vadd.f32 %v8683_v62, %v11800_v55  ;;  %v7173_v60 = vpop.f32.mrb[3].mxu0 }
 0x6ee   : > { %v7336_v39 = vadd.f32 %v8713_v51, %v12015_v38  ;;  %v8715_v11 = vadd.f32 %v7173_v60, %v11804_v18 }
 0x6ef   : > { %vm7370_vm0 = vcmp.ge.f32.partialorder %v7338_v43, 0.0  ;;  %v7402_v35 = vmul.f32 0.1, %v7338_v43  ;;  %v7339_v21 = vadd.f32 %v8714_v61, %v12015_v38 }
 0x6f0   : > { %vm7368_vm8 = vcmp.ge.f32.partialorder %v7336_v39, 0.0  ;;  %v7400_v55 = vmul.f32 0.1, %v7336_v39  ;;  %v7337_v40 = vadd.f32 %v8715_v11, %v12015_v38 }
 0x6f1   : > { %v7434_v23 = vsel %vm7370_vm0, %v7338_v43, %v7402_v35  ;;  %vm7371_vm6 = vcmp.ge.f32.partialorder %v7339_v21, 0.0  ;;  %v7403_v18 = vmul.f32 0.1, %v7339_v21 }
 0x6f2   : > { %7466 = vst.msk [vmem:[%s12028_s21 + $0x10] sm:$0xff] %vm12907_vm13, %v7434_v23  ;;  %v7432_v30 = vsel %vm7368_vm8, %v7336_v39, %v7400_v55  ;;  %vm7369_vm1 = vcmp.ge.f32.partialorder %v7337_v40, 0.0  ;;  %v7401_v12 = vmul.f32 0.1, %v7337_v40  ;;  %v8686_v37 = vpop.f32.mrb[4].mxu0  ;;  %vm12915_vm13 = vmmov %vm12908_vm3 }
 0x6f3   : > { %7464 = vst.msk [vmem:[%s12028_s21] sm:$0xff] %vm12908_vm3, %v7432_v30  ;;  %v7435_v56 = vsel %vm7371_vm6, %v7339_v21, %v7403_v18  ;;  %v8716_v4 = vadd.f32 %v8686_v37, %v11814_v47  ;;  %v7186_v8 = vpop.f32.mrb[5].mxu0 }
 0x6f4   : > { %7467 = vst.msk [vmem:[%s12028_s21 + $0x18] sm:$0xff] %vm12909_vm9, %v7435_v56  ;;  %v7433_v53 = vsel %vm7369_vm1, %v7337_v40, %v7401_v12  ;;  %v8717_v59 = vadd.f32 %v7186_v8, %v11816_v29  ;;  %v8687_v48 = vpop.f32.mrb[6].mxu0  ;;  %vm12916_vm9 = vmmov %vm12908_vm3 }
 0x6f5   : > { %7465 = vst.msk [vmem:[%s12028_s21 + $0x8] sm:$0xff] %vm12910_vm15, %v7433_v53  ;;  %v7342_v19 = vadd.f32 %v8716_v4, %v12015_v38  ;;  %v8718_v36 = vadd.f32 %v8687_v48, %v11818_v46  ;;  %v7189_v41 = vpop.f32.mrb[7].mxu0  ;;  %vm12917_vm15 = vmmov %vm12908_vm3 }
 0x6f6   : > { %v7340_v14 = vadd.f32 %v8717_v59, %v12015_v38  ;;  %v8719_v47 = vadd.f32 %v7189_v41, %v11822_v57 }
 0x6f7   : > { %vm7374_vm2 = vcmp.ge.f32.partialorder %v7342_v19, 0.0  ;;  %v7406_v1 = vmul.f32 0.1, %v7342_v19  ;;  %v7343_v31 = vadd.f32 %v8718_v36, %v12015_v38 }
 0x6f8   : > { %vm7372_vm10 = vcmp.ge.f32.partialorder %v7340_v14, 0.0  ;;  %v7404_v29 = vmul.f32 0.1, %v7340_v14  ;;  %v7341_v17 = vadd.f32 %v8719_v47, %v12015_v38 }
 0x6f9   : > { %v7438_v3 = vsel %vm7374_vm2, %v7342_v19, %v7406_v1  ;;  %vm7375_vm4 = vcmp.ge.f32.partialorder %v7343_v31, 0.0  ;;  %v7407_v6 = vmul.f32 0.1, %v7343_v31 }
 0x6fa   : > { %7470 = vst.msk [vmem:[%s12028_s21 + $0x30] sm:$0xff] %vm12911_vm12, %v7438_v3  ;;  %v7436_v46 = vsel %vm7372_vm10, %v7340_v14, %v7404_v29  ;;  %vm7373_vm7 = vcmp.ge.f32.partialorder %v7341_v17, 0.0  ;;  %v7405_v49 = vmul.f32 0.1, %v7341_v17  ;;  %v8690_v13 = vpop.f32.mrb[8].mxu0  ;;  %vm12918_vm12 = vmmov %vm12908_vm3 }
 0x6fb   : > { %7468 = vst.msk [vmem:[%s12028_s21 + $0x20] sm:$0xff] %vm12912_vm11, %v7436_v46  ;;  %v7439_v57 = vsel %vm7375_vm4, %v7343_v31, %v7407_v6  ;;  %v8720_v27 = vadd.f32 %v8690_v13, %v11832_v32  ;;  %v7202_v24 = vpop.f32.mrb[9].mxu0  ;;  %vm12919_vm11 = vmmov %vm12908_vm3 }
 0x6fc   : > { %7471 = vst.msk [vmem:[%s12028_s21 + $0x38] sm:$0xff] %vm12913_vm14, %v7439_v57  ;;  %v7437_v51 = vsel %vm7373_vm7, %v7341_v17, %v7405_v49  ;;  %v8721_v62 = vadd.f32 %v7202_v24, %v11834_v10  ;;  %v8691_v43 = vpop.f32.mrb[10].mxu0  ;;  %vm12920_vm14 = vmmov %vm12908_vm3 }
 0x6fd   : > { %7469 = vst.msk [vmem:[%s12028_s21 + $0x28] sm:$0xff] %vm12914_vm5, %v7437_v51  ;;  %v7346_v61 = vadd.f32 %v8720_v27, %v12015_v38  ;;  %v8722_v60 = vadd.f32 %v8691_v43, %v11836_v44  ;;  %v7205_v39 = vpop.f32.mrb[11].mxu0  ;;  %vm12921_vm5 = vmmov %vm12908_vm3 }
 0x6fe   : > { %v7344_v11 = vadd.f32 %v8721_v62, %v12015_v38  ;;  %v8723_v32 = vadd.f32 %v7205_v39, %v11840_v25 }
 0x6ff   : > { %vm7378_vm0 = vcmp.ge.f32.partialorder %v7346_v61, 0.0  ;;  %v7410_v35 = vmul.f32 0.1, %v7346_v61  ;;  %v7347_v21 = vadd.f32 %v8722_v60, %v12015_v38 }
 0x700   : > { %vm7376_vm8 = vcmp.ge.f32.partialorder %v7344_v11, 0.0  ;;  %v7408_v10 = vmul.f32 0.1, %v7344_v11  ;;  %v7345_v55 = vadd.f32 %v8723_v32, %v12015_v38 }
 0x701   : > { %v7442_v40 = vsel %vm7378_vm0, %v7346_v61, %v7410_v35  ;;  %vm7379_vm6 = vcmp.ge.f32.partialorder %v7347_v21, 0.0  ;;  %v7411_v23 = vmul.f32 0.1, %v7347_v21 }
 0x702   : > { %7474 = vst.msk [vmem:[%s12028_s21 + $0x50] sm:$0xff] %vm12915_vm13, %v7442_v40  ;;  %v7440_v44 = vsel %vm7376_vm8, %v7344_v11, %v7408_v10  ;;  %vm7377_vm1 = vcmp.ge.f32.partialorder %v7345_v55, 0.0  ;;  %v7409_v18 = vmul.f32 0.1, %v7345_v55  ;;  %v8694_v30 = vpop.f32.mrb[12].mxu0  ;;  %vm12922_vm13 = vmmov %vm12908_vm3 }
 0x703   : > { %7472 = vst.msk [vmem:[%s12028_s21 + $0x40] sm:$0xff] %vm12908_vm3, %v7440_v44  ;;  %v7443_v25 = vsel %vm7379_vm6, %v7347_v21, %v7411_v23  ;;  %v8724_v12 = vadd.f32 %v8694_v30, %v11850_v33  ;;  %v7218_v37 = vpop.f32.mrb[13].mxu0 }
 0x704   : > { %7475 = vst.msk [vmem:[%s12028_s21 + $0x58] sm:$0xff] %vm12916_vm9, %v7443_v25  ;;  %v7441_v56 = vsel %vm7377_vm1, %v7345_v55, %v7409_v18  ;;  %v8725_v4 = vadd.f32 %v7218_v37, %v11852_v45  ;;  %v8695_v8 = vpop.f32.mrb[14].mxu0  ;;  %vm12923_vm9 = vmmov %vm12908_vm3 }
 0x705   : > { %7473 = vst.msk [vmem:[%s12028_s21 + $0x48] sm:$0xff] %vm12917_vm15, %v7441_v56  ;;  %v7350_v53 = vadd.f32 %v8724_v12, %v12015_v38  ;;  %v8726_v59 = vadd.f32 %v8695_v8, %v11854_v54  ;;  %v7221_v48 = vpop.f32.mrb[15].mxu0  ;;  %vm12924_vm15 = vmmov %vm12908_vm3 }
 0x706   : > { %v7348_v19 = vadd.f32 %v8725_v4, %v12015_v38  ;;  %v8727_v33 = vadd.f32 %v7221_v48, %v11858_v16 }
 0x707   : > { %vm7382_vm2 = vcmp.ge.f32.partialorder %v7350_v53, 0.0  ;;  %v7414_v36 = vmul.f32 0.1, %v7350_v53  ;;  %v7351_v41 = vadd.f32 %v8726_v59, %v12015_v38 }
 0x708   : > { %vm7380_vm10 = vcmp.ge.f32.partialorder %v7348_v19, 0.0  ;;  %v7412_v45 = vmul.f32 0.1, %v7348_v19  ;;  %v7349_v14 = vadd.f32 %v8727_v33, %v12015_v38 }
 0x709   : > { %v7446_v47 = vsel %vm7382_vm2, %v7350_v53, %v7414_v36  ;;  %vm7383_vm4 = vcmp.ge.f32.partialorder %v7351_v41, 0.0  ;;  %v7415_v1 = vmul.f32 0.1, %v7351_v41 }
 0x70a   : > { %7478 = vst.msk [vmem:[%s12028_s21 + $0x70] sm:$0xff] %vm12918_vm12, %v7446_v47  ;;  %v7444_v54 = vsel %vm7380_vm10, %v7348_v19, %v7412_v45  ;;  %vm7381_vm7 = vcmp.ge.f32.partialorder %v7349_v14, 0.0  ;;  %v7413_v31 = vmul.f32 0.1, %v7349_v14  ;;  %v8698_v29 = vpop.f32.mrb[16].mxu0  ;;  %vm12925_vm12 = vmmov %vm12908_vm3 }
 0x70b   : > { %7476 = vst.msk [vmem:[%s12028_s21 + $0x60] sm:$0xff] %vm12919_vm11, %v7444_v54  ;;  %v7447_v16 = vsel %vm7383_vm4, %v7351_v41, %v7415_v1  ;;  %v8728_v17 = vadd.f32 %v8698_v29, %v11865_v22  ;;  %v7234_v3 = vpop.f32.mrb[17].mxu0  ;;  %vm12926_vm11 = vmmov %vm12908_vm3 }
 0x70c   : > { %7479 = vst.msk [vmem:[%s12028_s21 + $0x78] sm:$0xff] %vm12920_vm14, %v7447_v16  ;;  %v7445_v6 = vsel %vm7381_vm7, %v7349_v14, %v7413_v31  ;;  %v8729_v46 = vadd.f32 %v7234_v3, %v11867_v58  ;;  %v8699_v49 = vpop.f32.mrb[18].mxu0  ;;  %vm12927_vm14 = vmmov %vm12908_vm3 }
 0x70d   : > { %7477 = vst.msk [vmem:[%s12028_s21 + $0x68] sm:$0xff] %vm12921_vm5, %v7445_v6  ;;  %v7354_v13 = vadd.f32 %v8728_v17, %v12015_v38  ;;  %v8730_v57 = vadd.f32 %v8699_v49, %v11869_v26  ;;  %v7237_v27 = vpop.f32.mrb[19].mxu0  ;;  %vm12928_vm5 = vmmov %vm12908_vm3 }
 0x70e   : > { %v7352_v24 = vadd.f32 %v8729_v46, %v12015_v38  ;;  %v8731_v22 = vadd.f32 %v7237_v27, %v11873_v50 }
 0x70f   : > { %vm7386_vm0 = vcmp.ge.f32.partialorder %v7354_v13, 0.0  ;;  %v7418_v51 = vmul.f32 0.1, %v7354_v13  ;;  %v7355_v62 = vadd.f32 %v8730_v57, %v12015_v38 }
 0x710   : > { %vm7384_vm8 = vcmp.ge.f32.partialorder %v7352_v24, 0.0  ;;  %v7416_v58 = vmul.f32 0.1, %v7352_v24  ;;  %v7353_v43 = vadd.f32 %v8731_v22, %v12015_v38 }
 0x711   : > { %v7450_v61 = vsel %vm7386_vm0, %v7354_v13, %v7418_v51  ;;  %vm7387_vm6 = vcmp.ge.f32.partialorder %v7355_v62, 0.0  ;;  %v7419_v60 = vmul.f32 0.1, %v7355_v62 }
 0x712   : > { %7482 = vst.msk [vmem:[%s12028_s21 + $0x90] sm:$0xff] %vm12922_vm13, %v7450_v61  ;;  %v7448_v26 = vsel %vm7384_vm8, %v7352_v24, %v7416_v58  ;;  %vm7385_vm1 = vcmp.ge.f32.partialorder %v7353_v43, 0.0  ;;  %v7417_v39 = vmul.f32 0.1, %v7353_v43  ;;  %v8702_v11 = vpop.f32.mrb[20].mxu0  ;;  %vm12929_vm13 = vmmov %vm12908_vm3 }
 0x713   : > { %7480 = vst.msk [vmem:[%s12028_s21 + $0x80] sm:$0xff] %vm12908_vm3, %v7448_v26  ;;  %v7451_v50 = vsel %vm7387_vm6, %v7355_v62, %v7419_v60  ;;  %v8732_v32 = vadd.f32 %v8702_v11, %v11878_v2  ;;  %v7250_v35 = vpop.f32.mrb[21].mxu0 }
 0x714   : > { %7483 = vst.msk [vmem:[%s12028_s21 + $0x98] sm:$0xff] %vm12923_vm9, %v7451_v50  ;;  %v7449_v21 = vsel %vm7385_vm1, %v7353_v43, %v7417_v39  ;;  %v8733_v10 = vadd.f32 %v7250_v35, %v11880_v42  ;;  %v8703_v55 = vpop.f32.mrb[22].mxu0  ;;  %vm12930_vm9 = vmmov %vm12908_vm3 }
 0x715   : > { %7481 = vst.msk [vmem:[%s12028_s21 + $0x88] sm:$0xff] %vm12924_vm15, %v7449_v21  ;;  %v7358_v40 = vadd.f32 %v8732_v32, %v12015_v38  ;;  %v8734_v23 = vadd.f32 %v8703_v55, %v11882_v63  ;;  %v7253_v44 = vpop.f32.mrb[23].mxu0  ;;  %vm12931_vm15 = vmmov %vm12908_vm3 }
 0x716   : > { %v7356_v18 = vadd.f32 %v8733_v10, %v12015_v38  ;;  %v8735_v2 = vadd.f32 %v7253_v44, %v11886_v5 }
 0x717   : > { %vm7390_vm2 = vcmp.ge.f32.partialorder %v7358_v40, 0.0  ;;  %v7422_v30 = vmul.f32 0.1, %v7358_v40  ;;  %v7359_v25 = vadd.f32 %v8734_v23, %v12015_v38 }
 0x718   : > { %vm7388_vm10 = vcmp.ge.f32.partialorder %v7356_v18, 0.0  ;;  %v7420_v42 = vmul.f32 0.1, %v7356_v18  ;;  %v7357_v12 = vadd.f32 %v8735_v2, %v12015_v38 }
 0x719   : > { %v7454_v37 = vsel %vm7390_vm2, %v7358_v40, %v7422_v30  ;;  %vm7391_vm4 = vcmp.ge.f32.partialorder %v7359_v25, 0.0  ;;  %v7423_v56 = vmul.f32 0.1, %v7359_v25 }
 0x71a   : > { %7486 = vst.msk [vmem:[%s12028_s21 + $0xb0] sm:$0xff] %vm12925_vm12, %v7454_v37  ;;  %v7452_v63 = vsel %vm7388_vm10, %v7356_v18, %v7420_v42  ;;  %vm7389_vm7 = vcmp.ge.f32.partialorder %v7357_v12, 0.0  ;;  %v7421_v4 = vmul.f32 0.1, %v7357_v12  ;;  %v8706_v8 = vpop.f32.mrb[24].mxu0  ;;  %vm12932_vm12 = vmmov %vm12908_vm3 }
 0x71b   : > { %7484 = vst.msk [vmem:[%s12028_s21 + $0xa0] sm:$0xff] %vm12926_vm11, %v7452_v63  ;;  %v7455_v5 = vsel %vm7391_vm4, %v7359_v25, %v7423_v56  ;;  %v8736_v53 = vadd.f32 %v8706_v8, %v11891_v9  ;;  %v7266_v59 = vpop.f32.mrb[25].mxu0  ;;  %vm12933_vm11 = vmmov %vm12908_vm3 }
 0x71c   : > { %7487 = vst.msk [vmem:[%s12028_s21 + $0xb8] sm:$0xff] %vm12927_vm14, %v7455_v5  ;;  %v7453_v48 = vsel %vm7389_vm7, %v7357_v12, %v7421_v4  ;;  %v8737_v19 = vadd.f32 %v7266_v59, %v11893_v52  ;;  %v8707_v33 = vpop.f32.mrb[26].mxu0  ;;  %vm12934_vm14 = vmmov %vm12908_vm3 }
 0x71d   : > { %7485 = vst.msk [vmem:[%s12028_s21 + $0xa8] sm:$0xff] %vm12928_vm5, %v7453_v48  ;;  %v7362_v36 = vadd.f32 %v8736_v53, %v12015_v38  ;;  %v8738_v41 = vadd.f32 %v8707_v33, %v11897_v0  ;;  %v7269_v45 = vpop.f32.mrb[27].mxu0  ;;  %vm12935_vm5 = vmmov %vm12908_vm3 }
 0x71e   : > { %v7360_v14 = vadd.f32 %v8737_v19, %v12015_v38  ;;  %v8739_v9 = vadd.f32 %v7269_v45, %v11901_v34 }
 0x71f   : > { %vm7394_vm0 = vcmp.ge.f32.partialorder %v7362_v36, 0.0  ;;  %v7426_v47 = vmul.f32 0.1, %v7362_v36  ;;  %v7363_v1 = vadd.f32 %v8738_v41, %v12015_v38 }
 0x720   : > { %vm7392_vm8 = vcmp.ge.f32.partialorder %v7360_v14, 0.0  ;;  %v7424_v52 = vmul.f32 0.1, %v7360_v14  ;;  %v7361_v54 = vadd.f32 %v8739_v9, %v12015_v38 }
 0x721   : > { %v7458_v31 = vsel %vm7394_vm0, %v7362_v36, %v7426_v47  ;;  %vm7395_vm6 = vcmp.ge.f32.partialorder %v7363_v1, 0.0  ;;  %v7427_v29 = vmul.f32 0.1, %v7363_v1 }
 0x722   : > { %7490 = vst.msk [vmem:[%s12028_s21 + $0xd0] sm:$0xff] %vm12929_vm13, %v7458_v31  ;;  %v7456_v0 = vsel %vm7392_vm8, %v7360_v14, %v7424_v52  ;;  %vm7393_vm1 = vcmp.ge.f32.partialorder %v7361_v54, 0.0  ;;  %v7425_v16 = vmul.f32 0.1, %v7361_v54  ;;  %v8710_v17 = vpop.f32.mrb[28].mxu0 }
 0x723   : > { %7488 = vst.msk [vmem:[%s12028_s21 + $0xc0] sm:$0xff] %vm12908_vm3, %v7456_v0  ;;  %v7459_v34 = vsel %vm7395_vm6, %v7363_v1, %v7427_v29  ;;  %v8740_v3 = vadd.f32 %v8710_v17, %v11907_v20  ;;  %v7282_v6 = vpop.f32.mrb[29].mxu0 }
 0x724   : > { %7491 = vst.msk [vmem:[%s12028_s21 + $0xd8] sm:$0xff] %vm12930_vm9, %v7459_v34  ;;  %v7457_v46 = vsel %vm7393_vm1, %v7361_v54, %v7425_v16  ;;  %v8741_v49 = vadd.f32 %v7282_v6, %v11909_v7  ;;  %v8711_v13 = vpop.f32.mrb[30].mxu0 }
 0x725   : > { %7489 = vst.msk [vmem:[%s12028_s21 + $0xc8] sm:$0xff] %vm12931_vm15, %v7457_v46  ;;  %v7366_v57 = vadd.f32 %v8740_v3, %v12015_v38  ;;  %v8742_v27 = vadd.f32 %v8711_v13, %v11911_v15  ;;  %v7285_v24 = vpop.f32.mrb[31].mxu0 }
 0x726   : > { %v7364_v22 = vadd.f32 %v8741_v49, %v12015_v38  ;;  %v8743_v20 = vadd.f32 %v7285_v24, %v11915_v28 }
 0x727   : > { %vm7398_vm2 = vcmp.ge.f32.partialorder %v7366_v57, 0.0  ;;  %v7430_v51 = vmul.f32 0.1, %v7366_v57  ;;  %v7367_v7 = vadd.f32 %v8742_v27, %v12015_v38 }
 0x728   : > { %vm7396_vm10 = vcmp.ge.f32.partialorder %v7364_v22, 0.0  ;;  %v7428_v62 = vmul.f32 0.1, %v7364_v22  ;;  %v7365_v58 = vadd.f32 %v8743_v20, %v12015_v38 }
 0x729   : > { %v7462_v43 = vsel %vm7398_vm2, %v7366_v57, %v7430_v51  ;;  %vm7399_vm4 = vcmp.ge.f32.partialorder %v7367_v7, 0.0  ;;  %v7431_v61 = vmul.f32 0.1, %v7367_v7 }
 0x72a   : > { %7494 = vst.msk [vmem:[%s12028_s21 + $0xf0] sm:$0xff] %vm12932_vm12, %v7462_v43  ;;  %v7460_v15 = vsel %vm7396_vm10, %v7364_v22, %v7428_v62  ;;  %vm7397_vm7 = vcmp.ge.f32.partialorder %v7365_v58, 0.0  ;;  %v7429_v60 = vmul.f32 0.1, %v7365_v58 }
 0x72b   : > { %7492 = vst.msk [vmem:[%s12028_s21 + $0xe0] sm:$0xff] %vm12933_vm11, %v7460_v15  ;;  %v7463_v28 = vsel %vm7399_vm4, %v7367_v7, %v7431_v61 }
 0x72c   : > { %7495 = vst.msk [vmem:[%s12028_s21 + $0xf8] sm:$0xff] %vm12934_vm14, %v7463_v28  ;;  %v7461_v26 = vsel %vm7397_vm7, %v7365_v58, %v7429_v60 }
 0x72d   : > { %7493 = vst.msk [vmem:[%s12028_s21 + $0xe8] sm:$0xff] %vm12935_vm5, %v7461_v26 }
 0x72e PF: > { %s28_s24 = sadd.s32 1, %s9103_s24  }
 0x72f   : > { %p25_p4 = scmp.ge.s32.totalorder %s28_s24, 4  }
 0x731   :  { %27 = sbr.rel (!%p25_p4) target bundleno = 3 (0x3), region = 156 }

</bundles_post_ra>
